<compile_context>
chip_gen: v6e
topology: v6e:2x2x1
jax: 0.10.0
libtpu: 0.0.40
codegen_flags: <defaults>
</compile_context>

<pallas_src>
import functools
import math

import jax
import jax.numpy as jnp
from jax import lax
from jax.experimental import pallas as pl
from jax.experimental.pallas import tpu as pltpu


def _round_up(x: int, m: int) -> int:
    return ((x + m - 1) // m) * m


def _posemb_kernel(div_ref, sin_ref, cos_ref, *, tile: int):
    # div_ref: (1, Dh) inverse-frequency row (hoisted prologue).
    # sin_ref / cos_ref: (tile, Dh) output tiles (batch dim squeezed by BlockSpec).
    S, Dh = sin_ref.shape
    base = (pl.program_id(0) * tile).astype(jnp.float32)          # global row offset
    row = lax.broadcasted_iota(jnp.int32, (S, Dh), 0).astype(jnp.float32)
    # Positions are small integers -> exact in f32 -> theta is bit-identical to
    # the reference's position * div_term.
    theta = (base + row) * div_ref[...]                            # (S, Dh)
    sin_ref[...] = jnp.sin(theta).astype(sin_ref.dtype)
    cos_ref[...] = jnp.cos(theta).astype(cos_ref.dtype)


@functools.lru_cache(maxsize=None)
def _pe_table(d_model: int, max_len: int, freq: float, tile_s: int, dtype_name: str):
    """Builds the full (1, max_len, d_model) table with a Pallas kernel.
    Cached: mirrors the PyTorch module's __init__-time register_buffer."""
    dtype = jnp.dtype(dtype_name)

    # Half-width feature axis: kernel column j carries theta_j = pos * div_term[j];
    # sin goes to final column 2j, cos to 2j+1 (interleaved below, once).
    d_half = (d_model + 1) // 2
    d_half_pad = _round_up(d_half, 128)           # lane-dense (unmasked) stores

    # Seq tiling: full blocks only, tile a multiple of 8, and >= 2 blocks when
    # possible so both v7x TensorCores get work on the "parallel" axis.
    n_blocks = pl.cdiv(max_len, tile_s)
    if max_len >= 16:
        n_blocks = max(n_blocks, 2)
    tile = _round_up(pl.cdiv(max_len, n_blocks), 8)
    padded_len = n_blocks * tile

    # Hoisted per-column prologue: d_half exp() total, computed once outside
    # the grid and DMA'd in as a tiny row (padded columns are harmless and cropped).
    j = jnp.arange(d_half_pad, dtype=jnp.float32)
    div_row = jnp.exp((2.0 * j) * jnp.float32(-(math.log(freq) / d_model)))
    div_row = div_row.reshape(1, d_half_pad)

    sin_t, cos_t = pl.pallas_call(
        functools.partial(_posemb_kernel, tile=tile),
        out_shape=(jax.ShapeDtypeStruct((1, padded_len, d_half_pad), dtype),
                   jax.ShapeDtypeStruct((1, padded_len, d_half_pad), dtype)),
        grid=(n_blocks,),
        in_specs=[pl.BlockSpec((1, d_half_pad), lambda i: (0, 0))],
        out_specs=(pl.BlockSpec((None, tile, d_half_pad), lambda i: (0, i, 0)),
                   pl.BlockSpec((None, tile, d_half_pad), lambda i: (0, i, 0))),
        compiler_params=pltpu.CompilerParams(
            dimension_semantics=("parallel",)),
        cost_estimate=pl.CostEstimate(
            flops=3 * padded_len * d_half_pad,
            transcendentals=2 * padded_len * d_half_pad,
            bytes_accessed=2 * padded_len * d_half_pad * dtype.itemsize
                           + 4 * d_half_pad),
    )(div_row)

    # One-time interleave (even cols <- sin, odd cols <- cos) and crop.  For odd
    # d_model the extra trailing cos column is dropped, matching div_term[:-1].
    inter = jnp.stack([sin_t[..., :d_half], cos_t[..., :d_half]], axis=-1)
    pe = inter.reshape(1, padded_len, 2 * d_half)[:, :max_len, :d_model]
    return jax.block_until_ready(pe)


def positional_embedding(x: jax.Array, *, max_len: int = 512, freq: float = 64.0,
                         tile_s: int = 256, dtype=jnp.float32) -> jax.Array:
    """Equivalent of PositionalEmbedding(d_model=x.shape[-1], max_len, freq)(x):
    returns pe[:, :x.shape[1]] of shape (1, seq_len, d_model)."""
    seq_len, d_model = x.shape[1], x.shape[2]
    assert seq_len <= max_len, "sequence length exceeds max_len"
    pe = _pe_table(int(d_model), int(max_len), float(freq), int(tile_s),
                   jnp.dtype(dtype).name)
    return pe[:, :seq_len, :]


def _reference(seq_len: int, d_model: int, max_len: int = 512, freq: float = 64.0) -> jnp.ndarray:
    # Pure-JAX reference mirroring the PyTorch __init__ construction.
    pe = jnp.zeros((max_len, d_model), dtype=jnp.float32)
    position = jnp.arange(0, max_len, dtype=jnp.float32)[:, None]
    div_term = jnp.exp(jnp.arange(0, d_model, 2, dtype=jnp.float32)
                       * -(math.log(freq) / d_model))
    div_term2 = div_term[:-1] if d_model % 2 == 1 else div_term
    pe = pe.at[:, 0::2].set(jnp.sin(position * div_term))
    pe = pe.at[:, 1::2].set(jnp.cos(position * div_term2))
    return pe[None, :seq_len, :]


if __name__ == "__main__":
    key = jax.random.PRNGKey(0)
    # Tolerance note: kernel arguments to sin/cos are bit-identical to the
    # reference; the margin only covers cross-implementation ULP differences of
    # the transcendentals at arguments up to max_len.
    ATOL, RTOL = 5e-5, 1e-5

    # Primary small test matching the module's expected layout (B, S, D).
    B, S, D = 2, 8, 32
    x = jax.random.normal(key, (B, S, D), dtype=jnp.float32)
    out = jax.block_until_ready(positional_embedding(x, max_len=512, freq=64.0))
    ref = _reference(S, D, max_len=512, freq=64.0)
    assert out.shape == (1, S, D), out.shape
    assert out.dtype == jnp.float32
    assert jnp.allclose(out, ref, atol=ATOL, rtol=RTOL), "mismatch vs reference (small)"

    # Long sequence + lane-dense d_model: exercises the multi-block grid and the
    # forward-time slice of the cached max_len table.
    S2, D2 = 300, 128
    x2 = jnp.zeros((1, S2, D2), dtype=jnp.float32)
    out2 = jax.block_until_ready(positional_embedding(x2, max_len=512, freq=64.0))
    ref2 = _reference(S2, D2, max_len=512, freq=64.0)
    assert out2.shape == (1, S2, D2)
    assert jnp.allclose(out2, ref2, atol=ATOL, rtol=RTOL), "mismatch vs reference (long)"

    # Odd d_model edge case (PyTorch drops the last cos column's div_term).
    S3, D3 = 8, 33
    x3 = jnp.zeros((1, S3, D3), dtype=jnp.float32)
    out3 = jax.block_until_ready(positional_embedding(x3, max_len=512, freq=64.0))
    ref3 = _reference(S3, D3, max_len=512, freq=64.0)
    assert jnp.allclose(out3, ref3, atol=ATOL, rtol=RTOL), "mismatch vs reference (odd D)"

    # Cached-table fast path: a repeated forward reuses the prebuilt table.
    out_again = jax.block_until_ready(positional_embedding(x, max_len=512, freq=64.0))
    assert jnp.array_equal(out_again, out)

    print("KERNEL_OK")
</pallas_src>

<mosaic_0001>
module attributes {stable_mosaic.version = 11 : i64} {
  func.func @_posemb_kernel(%arg0: i32, %arg1: memref<1x128xf32, #tpu.memory_space<vmem>>, %arg2: memref<1x256x128xf32, #tpu.memory_space<vmem>>, %arg3: memref<1x256x128xf32, #tpu.memory_space<vmem>>) attributes {dimension_semantics = [#tpu.dimension_semantics<parallel>], iteration_bounds = array<i64: 2>, scalar_prefetch = 0 : i64, scratch_operands = 0 : i64, tpu.core_type = #tpu.core_type<tc>, window_params = [{pipeline_mode = #tpu.pipeline_mode<synchronous>, transform_indices = @transform_0, window_bounds = array<i64: 1, 128>}, {transform_indices = @transform_1, window_bounds = array<i64: 1, 256, 128>}, {transform_indices = @transform_2, window_bounds = array<i64: 1, 256, 128>}]} {
    %c256_i32 = arith.constant 256 : i32
    %0 = arith.muli %arg0, %c256_i32 : i32
    %1 = arith.sitofp %0 : i32 to f32
    %2 = tpu.iota {dimensions = array<i32: 0>} : vector<256x128xi32>
    %3 = arith.sitofp %2 : vector<256x128xi32> to vector<256x128xf32>
    %4 = vector.broadcast %1 : f32 to vector<256x128xf32>
    %5 = arith.addf %4, %3 : vector<256x128xf32>
    %c0 = arith.constant 0 : index
    %c0_0 = arith.constant 0 : index
    %6 = vector.load %arg1[%c0, %c0_0] : memref<1x128xf32, #tpu.memory_space<vmem>>, vector<1x128xf32>
    %7 = vector.broadcast %6 : vector<1x128xf32> to vector<256x128xf32>
    %8 = arith.mulf %5, %7 : vector<256x128xf32>
    %9 = math.sin %8 : vector<256x128xf32>
    %c0_1 = arith.constant 0 : index
    %c0_2 = arith.constant 0 : index
    %c0_3 = arith.constant 0 : index
    %10 = vector.load %arg2[%c0_1, %c0_2, %c0_3] : memref<1x256x128xf32, #tpu.memory_space<vmem>>, vector<1x256x128xf32>
    %11 = vector.shape_cast %10 : vector<1x256x128xf32> to vector<256x128xf32>
    %12 = vector.shape_cast %9 : vector<256x128xf32> to vector<1x256x128xf32>
    tpu.vector_store %arg2[%c0_1, %c0_2, %c0_3], %12 {strides = array<i32>} : memref<1x256x128xf32, #tpu.memory_space<vmem>>, vector<1x256x128xf32>,
    %13 = math.cos %8 : vector<256x128xf32>
    %c0_4 = arith.constant 0 : index
    %c0_5 = arith.constant 0 : index
    %c0_6 = arith.constant 0 : index
    %14 = vector.load %arg3[%c0_4, %c0_5, %c0_6] : memref<1x256x128xf32, #tpu.memory_space<vmem>>, vector<1x256x128xf32>
    %15 = vector.shape_cast %14 : vector<1x256x128xf32> to vector<256x128xf32>
    %16 = vector.shape_cast %13 : vector<256x128xf32> to vector<1x256x128xf32>
    tpu.vector_store %arg3[%c0_4, %c0_5, %c0_6], %16 {strides = array<i32>} : memref<1x256x128xf32, #tpu.memory_space<vmem>>, vector<1x256x128xf32>,
    return
  }
  func.func @transform_0(%arg0: i32) -> (i32, i32) {
    %c0_i32 = arith.constant 0 : i32
    %c0_i32_0 = arith.constant 0 : i32
    %c0_i32_1 = arith.constant 0 : i32
    return %c0_i32, %c0_i32_0 : i32, i32
  }
  func.func @transform_1(%arg0: i32) -> (i32, i32, i32) {
    %c0_i32 = arith.constant 0 : i32
    %c0_i32_0 = arith.constant 0 : i32
    %c0_i32_1 = arith.constant 0 : i32
    return %c0_i32, %arg0, %c0_i32_0 : i32, i32, i32
  }
  func.func @transform_2(%arg0: i32) -> (i32, i32, i32) {
    %c0_i32 = arith.constant 0 : i32
    %c0_i32_0 = arith.constant 0 : i32
    %c0_i32_1 = arith.constant 0 : i32
    return %c0_i32, %arg0, %c0_i32_0 : i32, i32, i32
  }
}

</mosaic_0001>

<bundles_post_ra>
// kernel: tpu_custom_call.1
= control target key start
LH: loop header
LB: loop body
LE: loop exit
PB: predicated region body
PF: predicated region fallthrough
CT: control target
= control target key end

     0   :  { %8 = vsyncpa [#allocation3], 0  ;;  %s11501_s0 = inlined_call_operand.hbm [shape: f32[1,128], index: 0, kind: input, shape index: {}]   ;;  %s11502_s1 = inlined_call_operand.hbm [shape: f32[1,512,128], index: 1, kind: output, shape index: {0}]   ;;  %s11503_s2 = inlined_call_operand.hbm [shape: f32[1,512,128], index: 2, kind: output, shape index: {1}]  }
   0x1   :  { %9 = vsyncpa [#allocation4], 0 }
   0x2   :  { %11 = vsyncpa [#allocation4 + $0x1], 0 }
   0x3   :  { %12 = vsyncpa [#allocation7], 0 }
   0x4   :  { %14 = vsyncpa [#allocation7 + $0x1], 0  ;;  %s7851_s9 = smov 0   ;;  %s7853_s10 = smov 0  }
   0x5   :  { %s7855_s11 = smov 0   ;;  %s7857_s12 = smov 0  }
   0x6 LB: > { %s7872_s13 = sadd.s32 4294967295, %s7823_s12   ;;  %s7104_s14 = sadd.s32 4294967294, %s7823_s12   ;;  %s7823_s12 = sphi %s7857_s12, %s12112_s12   ;;  %s7819_s11 = sphi %s7855_s11, %s12111_s11   ;;  %s7815_s10 = sphi %s7853_s10, %s12110_s10   ;;  %s7811_s9 = sphi %s7851_s9, %s12109_s9  }
   0x7   : > { %s7876_s15 = sadd.s32 1, %s7823_s12   ;;  %s48_s16 = sadd.s32 1, %s7819_s11 }
   0x8   : > { %s45_s17 = ssub.s32 %s7823_s12, %s7876_s15  ;;  %p58_p0 = scmp.ne.s32.totalorder %s7819_s11, %s7815_s10 }
   0x9   : > { %p46_p1 = scmp.eq.s32.totalorder %s45_s17, 0  ;;  %p59_p2 = scmp.eq.s32.totalorder %s7872_s13, 1 }
   0xa   : > { %p64_p3 = scmp.ne.s32.totalorder %s7815_s10, %s7811_s9  ;;  %p65_p4 = scmp.eq.s32.totalorder %s7104_s14, 1 }
   0xb   : > { %s7887_s18 = scalar_select %p46_p1, %s7819_s11, %s48_s16  }
   0xc   : > { %p7889_p5 = por %p59_p2, %p58_p0  ;;  %p7893_p6 = por %p65_p4, %p64_p3 }
   0xd   : > { %p7105_p7 = scmp.ge.s32.totalorder %s7823_s12, 1  ;;  %p98_p8 = scmp.lt.s32.totalorder %s7823_s12, 3 }
   0xe   : > { %p7526_p9 = scmp.eq.s32.totalorder %s7872_s13, 0  ;;  %s7825_s22 = smov [#allocation2]  }
   0xf   : > { %p7900_p10 = pnand %p7105_p7, %p98_p8  ;;  %s111_s23 = sshll.u32 %s7825_s22, 4  ;;  %s112_s23 = int_to_ptr.vmem [resolvable:$true] %s111_s23 }
  0x10   : > { %s7714_s24 = scalar_lea.vmem %s112_s23, 16  ;;  %s7721_s25 = scalar_lea.vmem %s112_s23, 32 }
  0x11   : > { %p7515_p11 = pneg %p7900_p10  ;;  %p7715_p0 = scmp.ne.s32.totalorder %s112_s23, %s7714_s24 }
  0x12   : > { %p7722_p3 = scmp.lt.s32.totalorder %s112_s23, %s112_s23  ;;  %p7723_p4 = scmp.lt.s32.totalorder %s7721_s25, %s7714_s24 }
  0x13   : > { %p7516_p12 = pnand %p7526_p9, %p7515_p11 }
  0x14   : > { %p7724_p7 = por %p7723_p4, %p7722_p3 }
  0x15   : > { %p7705_p13 = pneg %p7516_p12 }
  0x17   : > { %p7717_p1 = pnand %p7715_p0, %p7705_p13 }
  0x19   : > { %p7718_p2 = pneg %p7717_p1 }
  0x1b   : > { %p7725_p8 = pnand %p7724_p7, %p7718_p2 }
  0x1d   : > { %7728 = shalt.err (!%p7725_p8)
}
  0x1e   : > { %7518 = dma.hbm_to_vmem [thread:$0]  (!%p7516_p12), %s11501_s0, 16, %s112_s23, [#allocation3]  }
  0x1f   : > { %124 = sbr.rel (%p7900_p10) target bundleno = 983 (0x3d7), region = 24 }
  0x24   : > { %7798 = dma.done.wait (%p7526_p9), [#allocation3], 16  }
  0x25   : > { %7800 = vsyncadd (%p7526_p9), [#allocation3], 4294967280  ;;  %s7111_s28 = sshll.u32 %s7872_s13, 8  ;;  %v150_v0 = vlaneseq  ;;  %v7926_v9 = vld [vmem:[#allocation2] ss:$0 sm:$0xff]  ;;  %s8209_s30 = sand.u32 1, %s7815_s10  }
  0x26   : > { %s149_s29 = scvt.s32.f32 %s7111_s28  ;;  %v11524_v45 = vmov 683565275   ;;  %v11522_v47 = vmov 2475754826   ;;  %v11517_v49 = vmov 2131351028  }
  0x27   : > { %v7918_v1 = vshrl.u32 %v150_v0, 7  ;;  %v11515_v51 = vmov 2102212464   ;;  %v11530_v53 = vmov 920167782   ;;  %s7109_s3 = sshll.u32 %s8209_s30, 8 }
  0x28   : > { %v7920_v2 = vstv %s149_s29  ;;  %v11526_v60 = vmov 1326507024   ;;  %s8258_s4 = scalar_lea.vmem [#allocation5], %s7109_s3  ;;  %s10893_s5 = scalar_lea.vmem [#allocation6], %s7109_s3 }
  0x29   : > { %v183_v3 = vcvt.s32.f32 %v7918_v1  ;;  %v152_v4 = vadd.s32 8, %v7918_v1  ;;  %v153_v5 = vadd.s32 16, %v7918_v1  ;;  %v154_v18 = vadd.s32 24, %v7918_v1  ;;  %s7377_s6 = sshll.u32 %s7872_s13, 12  ;;  %s6994_s7 = sshll.u32 %s8258_s4, 4  ;;  %s11324_s7 = int_to_ptr.vmem [resolvable:$true] %s6994_s7 }
  0x2a   : > { %v7950_v32 = vadd.s32 32, %v7918_v1  ;;  %v7953_v35 = vadd.s32 40, %v7918_v1  ;;  %v7956_v36 = vadd.s32 48, %v7918_v1  ;;  %s11322_s16 = scalar_lea.hbm %s11502_s1, %s7377_s6  ;;  %s6976_s17 = scalar_lea.sflag [#allocation4], %s8209_s30 }
  0x2b   : > { %v216_v6 = vadd.f32 %v7920_v2, %v183_v3  ;;  %v184_v7 = vcvt.s32.f32 %v152_v4  ;;  %v185_v8 = vcvt.s32.f32 %v153_v5  ;;  %v186_v27 = vcvt.s32.f32 %v154_v18  ;;  %s7729_s21 = scalar_lea.vmem %s11324_s7, 4096  ;;  %s7832_s22 = smov [#allocation5]  }
  0x2c   : > { %p7730_p9 = scmp.ne.s32.totalorder %s11324_s7, %s7729_s21  ;;  %s7733_s23 = sshll.u32 %s7832_s22, 4  ;;  %s7734_s23 = int_to_ptr.vmem [resolvable:$false] %s7733_s23 }
  0x2d   : > { %v7929_v10 = vmul.f32 %v7926_v9, %v216_v6  ;;  %v217_v11 = vadd.f32 %v7920_v2, %v184_v7  ;;  %v218_v12 = vadd.f32 %v7920_v2, %v185_v8  ;;  %v7960_v40 = vadd.f32 %v7920_v2, %v186_v27  ;;  %s7735_s24 = scalar_lea.vmem %s7734_s23, 8192  ;;  %p7736_p12 = scmp.lt.s32.totalorder %s11324_s7, %s7734_s23 }
  0x2e   : > { %p7731_p10 = pnand %p7730_p9, %p7889_p5  ;;  %p7737_p13 = scmp.lt.s32.totalorder %s7735_s24, %s7729_s21 }
  0x2f   : > { %v287_v13 = vand.u32 2147483647, %v7929_v10  ;;  %v290_v14 = vand.u32 2139095040, %v7929_v10  ;;  %v7936_v15 = vmul.f32 %v7926_v9, %v217_v11  ;;  %v7939_v16 = vmul.f32 %v7926_v9, %v218_v12 }
  0x30   : > { %vm289_vm12 = vcmp.lt.s32.totalorder %v7929_v10, 0  ;;  %p7732_p11 = pneg %p7731_p10  ;;  %p7738_p0 = por %p7737_p13, %p7736_p12 }
  0x31   : > { %v291_v17 = vshrl.u32 %v290_v14, 23  ;;  %v294_v19 = vand.u32 8388607, %v287_v13  ;;  %v391_v20 = vand.u32 2147483647, %v7936_v15  ;;  %v394_v21 = vand.u32 2139095040, %v7936_v15 }
  0x32   : > { %v498_v25 = vand.u32 2139095040, %v7939_v16  ;;  %v495_v39 = vand.u32 2147483647, %v7939_v16  ;;  %vm393_vm14 = vcmp.lt.s32.totalorder %v7936_v15, 0  ;;  %vm8075_vm15 = vcmp.le.f32.partialorder %v287_v13, 0.7853982  ;;  %p7739_p1 = pnand %p7738_p0, %p7732_p11 }
  0x33   : > { %v7113_v22 = vadd.s32 4294967169, %v291_v17  ;;  %v395_v23 = vshrl.u32 %v394_v21, 23  ;;  %v398_v24 = vand.u32 8388607, %v391_v20  ;;  %v295_v28 = vor.u32 8388608, %v294_v19 }
  0x34   : > { %v499_v31 = vshrl.u32 %v498_v25, 23 }
  0x35   : > { %v297_v26 = vadd.s32 1, %v7113_v22  ;;  %v7117_v29 = vadd.s32 4294967169, %v395_v23  ;;  %v399_v30 = vor.u32 8388608, %v398_v24  ;;  %v7962_v41 = vshll.u32 %v295_v28, 8 }
  0x36   : > { %v7966_v43 = vadd.s32 4294967169, %v499_v31 }
  0x37   : > { %vm298_vm0 = vcmp.gt.s32.totalorder %v297_v26, 0  ;;  %v401_v34 = vadd.s32 1, %v7117_v29  ;;  %v7964_v42 = vshll.u32 %v399_v30, 8 }
  0x38   : > { %v299_v33 = vsel %vm298_vm0, %v297_v26, 0  ;;  %vm8081_vm0 = vcmp.le.f32.partialorder %v391_v20, 0.7853982 }
  0x39   : > { %v300_v37 = vshrl.u32 %v299_v33, 5  ;;  %v301_v38 = vand.u32 31, %v299_v33  ;;  %vm402_vm1 = vcmp.gt.s32.totalorder %v401_v34, 0 }
  0x3a   : > { %v403_v3 = vsel %vm402_vm1, %v401_v34, 0 }
  0x3b   : > { %v302_v44 = vsub.s32 32, %v301_v38  ;;  %v304_v46 = vshll.u32 %v11524_v45, %v301_v38  ;;  %v307_v48 = vshll.u32 %v11522_v47, %v301_v38  ;;  %v310_v50 = vshll.u32 %v11517_v49, %v301_v38 }
  0x3c   : > { %v313_v52 = vshll.u32 %v11515_v51, %v301_v38  ;;  %v316_v54 = vshll.u32 %v11530_v53, %v301_v38  ;;  %vm319_vm2 = vcmp.lt.s32.totalorder %v300_v37, 1  ;;  %vm320_vm3 = vcmp.lt.s32.totalorder %v300_v37, 2 }
  0x3d   : > { %v303_v55 = vshrl.u32 %v11524_v45, %v302_v44  ;;  %v305_v56 = vshrl.u32 %v11522_v47, %v302_v44  ;;  %v308_v57 = vshrl.u32 %v11517_v49, %v302_v44  ;;  %v311_v58 = vshrl.u32 %v11515_v51, %v302_v44 }
  0x3e   : > { %v314_v59 = vshrl.u32 %v11530_v53, %v302_v44  ;;  %v317_v61 = vshrl.u32 %v11526_v60, %v302_v44  ;;  %vm321_vm4 = vcmp.lt.s32.totalorder %v300_v37, 3  ;;  %vm322_vm5 = vcmp.lt.s32.totalorder %v300_v37, 4 }
  0x3f   : > { %v306_v62 = vor.u32 %v305_v56, %v304_v46  ;;  %v309_v63 = vor.u32 %v308_v57, %v307_v48  ;;  %v312_v0 = vor.u32 %v311_v58, %v310_v50  ;;  %v404_v6 = vshrl.u32 %v403_v3, 5 }
  0x40   : > { %v315_v4 = vor.u32 %v314_v59, %v313_v52  ;;  %v318_v5 = vor.u32 %v317_v61, %v316_v54  ;;  %v405_v7 = vand.u32 31, %v403_v3  ;;  %v505_v59 = vadd.s32 1, %v7966_v43 }
  0x41   : > { %v323_v8 = vsel %vm319_vm2, %v303_v55, %v306_v62  ;;  %v324_v11 = vsel %vm322_vm5, %v312_v0, 2102212464  ;;  %v327_v12 = vsel %vm319_vm2, %v306_v62, %v309_v63  ;;  %v331_v14 = vsel %vm319_vm2, %v309_v63, %v312_v0 }
  0x42   : > { %v325_v17 = vsel %vm321_vm4, %v309_v63, %v324_v11  ;;  %v328_v18 = vsel %vm322_vm5, %v315_v4, 920167782  ;;  %v332_v19 = vsel %vm322_vm5, %v318_v5, 1326507024  ;;  %v406_v21 = vsub.s32 32, %v405_v7 }
  0x43   : > { %v326_v22 = vsel %vm320_vm3, %v323_v8, %v325_v17  ;;  %v329_v23 = vsel %vm321_vm4, %v312_v0, %v328_v18  ;;  %v333_v24 = vsel %vm321_vm4, %v315_v4, %v332_v19  ;;  %v408_v25 = vshll.u32 %v11524_v45, %v405_v7 }
  0x44   : > { %v330_v26 = vsel %vm320_vm3, %v327_v12, %v329_v23  ;;  %v334_v27 = vsel %vm320_vm3, %v331_v14, %v333_v24  ;;  %v342_v28 = vmul.u32 %v7962_v41, %v326_v22  ;;  %v407_v29 = vshrl.u32 %v11524_v45, %v406_v21 }
  0x45   : > { %v7993_v30 = vmul.u32.u64.low %v7962_v41, %v334_v27  ;;  %v7994_v31 = vmul.u32.u64.high %v7962_v41, %v334_v27, %v7993_v30  ;;  %v7997_v33 = vmul.u32.u64.low %v7962_v41, %v330_v26  ;;  %v7998_v34 = vmul.u32.u64.high %v7962_v41, %v330_v26, %v7997_v33 }
  0x46   : > { %v409_v38 = vshrl.u32 %v11522_v47, %v406_v21  ;;  %v411_v44 = vshll.u32 %v11522_v47, %v405_v7  ;;  %v412_v37 = vshrl.u32 %v11517_v49, %v406_v21  ;;  %v414_v46 = vshll.u32 %v11517_v49, %v405_v7 }
  0x47   : > { %v415_v48 = vshrl.u32 %v11515_v51, %v406_v21  ;;  %v417_v50 = vshll.u32 %v11515_v51, %v405_v7  ;;  %v418_v52 = vshrl.u32 %v11530_v53, %v406_v21  ;;  %v420_v54 = vshll.u32 %v11530_v53, %v405_v7 }
  0x48   : > { %v410_v55 = vor.u32 %v409_v38, %v408_v25  ;;  %v413_v41 = vor.u32 %v412_v37, %v411_v44  ;;  %v421_v56 = vshrl.u32 %v11526_v60, %v406_v21  ;;  %vm423_vm6 = vcmp.lt.s32.totalorder %v404_v6, 1 }
  0x49   : > { %vm344_vm7 = vc.u32 %v7994_v31, %v7997_v33  ;;  %v345_v57 = vadd.s32 1, %v7998_v34  ;;  %v416_v58 = vor.u32 %v415_v48, %v414_v46  ;;  %v419_v61 = vor.u32 %v418_v52, %v417_v50 }
  0x4a   : > { %v422_v62 = vor.u32 %v421_v56, %v420_v54  ;;  %vm424_vm8 = vcmp.lt.s32.totalorder %v404_v6, 2  ;;  %vm425_vm9 = vcmp.lt.s32.totalorder %v404_v6, 3  ;;  %vm426_vm10 = vcmp.lt.s32.totalorder %v404_v6, 4 }
  0x4b   : > { %v346_v63 = vsel %vm344_vm7, %v345_v57, %v7998_v34  ;;  %v427_v0 = vsel %vm423_vm6, %v407_v29, %v410_v55  ;;  %v431_v3 = vsel %vm423_vm6, %v410_v55, %v413_v41  ;;  %v428_v5 = vsel %vm426_vm10, %v416_v58, 2102212464 }
  0x4c   : > { %v347_v4 = vadd.s32 %v346_v63, %v342_v28  ;;  %v432_v7 = vsel %vm426_vm10, %v419_v61, 920167782  ;;  %v435_v8 = vsel %vm423_vm6, %v413_v41, %v416_v58  ;;  %v429_v11 = vsel %vm425_vm9, %v413_v41, %v428_v5 }
  0x4d   : > { %v433_v12 = vsel %vm425_vm9, %v416_v58, %v432_v7  ;;  %v436_v14 = vsel %vm426_vm10, %v422_v62, 1326507024  ;;  %vm506_vm11 = vcmp.gt.s32.totalorder %v505_v59, 0  ;;  %v187_v19 = vcvt.s32.f32 %v7950_v32 }
  0x4e   : > { %v348_v43 = vadd.s32 536870912, %v347_v4  ;;  %v434_v17 = vsel %vm424_vm8, %v431_v3, %v433_v12  ;;  %v437_v18 = vsel %vm425_vm9, %v419_v61, %v436_v14  ;;  %v430_v21 = vsel %vm424_vm8, %v427_v0, %v429_v11 }
  0x4f   : > { %v438_v22 = vsel %vm424_vm8, %v435_v8, %v437_v18  ;;  %v8023_v23 = vmul.u32.u64.low %v7964_v42, %v434_v17  ;;  %v8024_v24 = vmul.u32.u64.high %v7964_v42, %v434_v17, %v8023_v23  ;;  %v507_v28 = vsel %vm506_vm11, %v505_v59, 0 }
  0x50   : > { %v349_v25 = vshrl.u32 %v348_v43, 30  ;;  %v8028_v26 = vmul.u32.u64.low %v7964_v42, %v438_v22  ;;  %v8029_v27 = vmul.u32.u64.high %v7964_v42, %v438_v22, %v8028_v26  ;;  %v502_v29 = vand.u32 8388607, %v495_v39 }
  0x51   : > { %v509_v30 = vand.u32 31, %v507_v28  ;;  %v8035_v32 = vmul.f32 %v7926_v9, %v7960_v40  ;;  %v446_v34 = vmul.u32 %v7964_v42, %v430_v21  ;;  %v449_v38 = vadd.s32 1, %v8024_v24 }
  0x52   : > { %v350_v6 = vshll.u32 %v349_v25, 30  ;;  %v188_v37 = vcvt.s32.f32 %v7953_v35  ;;  %v189_v46 = vcvt.s32.f32 %v7956_v36  ;;  %vm448_vm13 = vc.u32 %v8029_v27, %v8023_v23 }
  0x53   : > { %11753 = vst [vmem:[#allocation11_spill] sm:$0xff] %v8035_v32  ;;  %v510_v44 = vsub.s32 32, %v509_v30  ;;  %v8047_v40 = vadd.f32 %v7920_v2, %v187_v19  ;;  %v450_v50 = vsel %vm448_vm13, %v449_v38, %v8024_v24  ;;  %v503_v42 = vor.u32 8388608, %v502_v29 }
  0x54   : > { %v8042_v48 = vsub.s32 %v347_v4, %v350_v6  ;;  %v8050_v52 = vshrl.u32 %v507_v28, 5  ;;  %v602_v54 = vand.u32 2139095040, %v8035_v32  ;;  %v373_v41 = vsub.s32 4, %v349_v25 }
  0x55   : > { %v451_v56 = vadd.s32 %v450_v50, %v446_v34  ;;  %v512_v57 = vshll.u32 %v11524_v45, %v509_v30  ;;  %v513_v58 = vshrl.u32 %v11522_v47, %v510_v44  ;;  %v515_v59 = vshll.u32 %v11522_v47, %v509_v30 }
  0x56   : > { %v353_v55 = vsub.s32 0, %v8042_v48  ;;  %v516_v61 = vshrl.u32 %v11517_v49, %v510_v44  ;;  %v521_v62 = vshll.u32 %v11515_v51, %v509_v30  ;;  %v518_v3 = vshll.u32 %v11517_v49, %v509_v30 }
  0x57   : > { %v452_v0 = vadd.s32 536870912, %v451_v56  ;;  %v519_v4 = vshrl.u32 %v11515_v51, %v510_v44  ;;  %v522_v5 = vshrl.u32 %v11530_v53, %v510_v44  ;;  %v524_v7 = vshll.u32 %v11530_v53, %v509_v30 }
  0x58   : > { %v7114_v63 = vmin.u32 %v353_v55, %v8042_v48  ;;  %v525_v8 = vshrl.u32 %v11526_v60, %v510_v44  ;;  %v8066_v11 = vshll.u32 %v503_v42, 8  ;;  %v343_v12 = vadd.s32 %v7997_v33, %v7994_v31 }
  0x59   : > { %v374_v43 = vsel %vm289_vm12, %v373_v41, %v349_v25  ;;  %v603_v17 = vshrl.u32 %v602_v54, 23  ;;  %v453_v18 = vshrl.u32 %v452_v0, 30  ;;  %v511_v19 = vshrl.u32 %v11524_v45, %v510_v44 }
  0x5a   : > { %v355_v14 = vclz %v7114_v63  ;;  %v514_v21 = vor.u32 %v513_v58, %v512_v57  ;;  %v523_v22 = vor.u32 %v522_v5, %v521_v62  ;;  %v517_v33 = vor.u32 %v516_v61, %v515_v59 }
  0x5b   : > { %v520_v25 = vor.u32 %v519_v4, %v518_v3  ;;  %vm530_vm1 = vcmp.lt.s32.totalorder %v8050_v52, 4  ;;  %v454_v28 = vshll.u32 %v453_v18, 30  ;;  %v526_v29 = vor.u32 %v525_v8, %v524_v7 }
  0x5c   : > { %v7115_v26 = vadd.s32 4294967294, %v355_v14  ;;  %vm527_vm2 = vcmp.lt.s32.totalorder %v8050_v52, 1  ;;  %vm529_vm3 = vcmp.lt.s32.totalorder %v8050_v52, 3  ;;  %v477_v13 = vsub.s32 4, %v453_v18 }
  0x5d   : > { %v532_v30 = vsel %vm530_vm1, %v520_v25, 2102212464  ;;  %v536_v20 = vsel %vm530_vm1, %v523_v22, 920167782  ;;  %v8092_v34 = vsub.s32 %v451_v56, %v454_v28  ;;  %vm528_vm5 = vcmp.lt.s32.totalorder %v8050_v52, 2 }
  0x5e   : > { %vm7116_vm4 = vcmp.lt.s32.totalorder %v7115_v26, 0  ;;  %v531_v38 = vsel %vm527_vm2, %v511_v19, %v514_v21  ;;  %v535_v54 = vsel %vm527_vm2, %v514_v21, %v517_v33  ;;  %v533_v41 = vsel %vm529_vm3, %v517_v33, %v532_v30 }
  0x5f   : > { %v358_v6 = vsel %vm7116_vm4, 0, %v7115_v26  ;;  %v457_v55 = vsub.s32 0, %v8092_v34  ;;  %v537_v56 = vsel %vm529_vm3, %v520_v25, %v536_v20  ;;  %v539_v57 = vsel %vm527_vm2, %v517_v33, %v520_v25 }
  0x60   : > { %v359_v44 = vsub.s32 32, %v358_v6  ;;  %v360_v50 = vshll.u32 %v8042_v48, %v358_v6  ;;  %v363_v42 = vsub.s32 4294967266, %v358_v6  ;;  %v478_v48 = vsel %vm393_vm14, %v477_v13, %v453_v18 }
  0x61   : > { %v540_v61 = vsel %vm530_vm1, %v526_v29, 1326507024  ;;  %v7118_v62 = vmin.u32 %v457_v55, %v8092_v34  ;;  %v538_v63 = vsel %vm528_vm5, %v535_v54, %v537_v56  ;;  %v599_v3 = vand.u32 2147483647, %v8035_v32 }
  0x62   : > { %v361_v58 = vshrl.u32 %v343_v12, %v359_v44  ;;  %v364_v59 = vadd.s32 127, %v363_v42  ;;  %v541_v0 = vsel %vm529_vm3, %v523_v22, %v540_v61  ;;  %v7125_v8 = vadd.s32 4294967169, %v603_v17 }
  0x63   : > { %v542_v7 = vsel %vm528_vm5, %v539_v57, %v541_v0  ;;  %v8121_v12 = vsel %vm8075_vm15, 0, %v374_v43  ;;  %v459_v14 = vclz %v7118_v62  ;;  %v8125_v18 = vsel %vm8081_vm0, 0, %v478_v48 }
  0x64   : > { %v362_v4 = vor.u32 %v361_v58, %v360_v50  ;;  %v365_v5 = vshll.u32 %v364_v59, 23  ;;  %v534_v19 = vsel %vm528_vm5, %v531_v38, %v533_v41  ;;  %v609_v43 = vadd.s32 1, %v7125_v8 }
  0x65   : > { %v8130_v26 = vmul.u32.u64.low %v8066_v11, %v542_v7  ;;  %v8131_v33 = vmul.u32.u64.high %v8066_v11, %v542_v7, %v8130_v26  ;;  %v7119_v25 = vadd.s32 4294967294, %v459_v14  ;;  %v447_v13 = vadd.s32 %v8023_v23, %v8029_v27 }
  0x66   : > { %v366_v21 = vor.u32 4788187, %v365_v5  ;;  %v369_v22 = vcvt.s32.f32 %v362_v4  ;;  %v8134_v17 = vmul.u32.u64.low %v8066_v11, %v538_v63  ;;  %v8135_v28 = vmul.u32.u64.high %v8066_v11, %v538_v63, %v8134_v17 }
  0x67   : > { %v606_v52 = vand.u32 8388607, %v599_v3  ;;  %v8143_v30 = vmul.f32 %v7926_v9, %v8047_v40  ;;  %v380_v20 = vadd.s32 3, %v8121_v12  ;;  %vm7120_vm6 = vcmp.lt.s32.totalorder %v7119_v25, 0 }
  0x68   : > { %v367_v29 = vand.u32 2147483647, %v366_v21  ;;  %v484_v6 = vadd.s32 3, %v8125_v18  ;;  %vm610_vm7 = vcmp.gt.s32.totalorder %v609_v43, 0  ;;  %v462_v44 = vsel %vm7120_vm6, 0, %v7119_v25 }
  0x69   : > { %11758 = vst [vmem:[#allocation12_spill] sm:$0xff] %v8143_v30  ;;  %v550_v50 = vmul.u32 %v8066_v11, %v534_v19  ;;  %vm552_vm8 = vc.u32 %v8131_v33, %v8134_v17  ;;  %v463_v23 = vsub.s32 32, %v462_v44  ;;  %v464_v27 = vshll.u32 %v8092_v34, %v462_v44 }
  0x6a   : > { %v370_v38 = vmul.f32 %v369_v22, %v367_v29  ;;  %v467_v42 = vsub.s32 4294967266, %v462_v44  ;;  %v553_v54 = vadd.s32 1, %v8135_v28  ;;  %v607_v55 = vor.u32 8388608, %v606_v52 }
  0x6b   : > { %v611_v41 = vsel %vm610_vm7, %v609_v43, 0  ;;  %v8154_v56 = vadd.f32 %v7920_v2, %v188_v37  ;;  %v465_v57 = vshrl.u32 %v447_v13, %v463_v23  ;;  %v703_v59 = vand.u32 2147483647, %v8143_v30 }
  0x6c   : > { %v371_v40 = vxor.u32 2147483648, %v370_v38  ;;  %v468_v58 = vadd.s32 127, %v467_v42  ;;  %v554_v11 = vsel %vm552_vm8, %v553_v54, %v8135_v28  ;;  %v8160_v48 = vand.u32 3, %v380_v20 }
  0x6d   : > { %v555_v61 = vadd.s32 %v554_v11, %v550_v50  ;;  %v613_v62 = vand.u32 31, %v611_v41  ;;  %v466_v63 = vor.u32 %v465_v57, %v464_v27  ;;  %v8165_v0 = vand.u32 3, %v484_v6 }
  0x6e   : > { %v372_v34 = vsel %vm289_vm12, %v371_v40, %v370_v38  ;;  %v469_v37 = vshll.u32 %v468_v58, 23  ;;  %v8167_v7 = vshll.u32 %v607_v55, 8  ;;  %v612_v52 = vshrl.u32 %v611_v41, 5 }
  0x6f   : > { %v375_v35 = vsel %vm8075_vm15, %v7929_v10, %v372_v34  ;;  %v556_v4 = vadd.s32 536870912, %v555_v61  ;;  %v614_v5 = vsub.s32 32, %v613_v62  ;;  %v473_v14 = vcvt.s32.f32 %v466_v63 }
  0x70   : > { %7570 = vcosq.f32 %v375_v35  ;;  %v470_v8 = vor.u32 4788187, %v469_v37  ;;  %v616_v19 = vshll.u32 %v11524_v45, %v613_v62  ;;  %v619_v24 = vshll.u32 %v11522_v47, %v613_v62 }
  0x71   : > { %7572 = vsinq.f32 %v375_v35  ;;  %v8170_v21 = vshrl.u32 %v556_v4, 30  ;;  %v617_v22 = vshrl.u32 %v11522_v47, %v614_v5  ;;  %v620_v26 = vshrl.u32 %v11517_v49, %v614_v5 }
  0x72   : > { %v471_v25 = vand.u32 2147483647, %v470_v8  ;;  %v622_v28 = vshll.u32 %v11517_v49, %v613_v62  ;;  %v623_v43 = vshrl.u32 %v11515_v51, %v614_v5  ;;  %v625_v29 = vshll.u32 %v11515_v51, %v613_v62 }
  0x73   : > { %v558_v13 = vshll.u32 %v8170_v21, 30  ;;  %v706_v20 = vand.u32 2139095040, %v8143_v30  ;;  %v8182_v6 = vand.u32 8388607, %v703_v59  ;;  %vm386_vm9 = vcmp.eq.s32.totalorder %v8160_v48, 2 }
  0x74   : > { %v474_v38 = vmul.f32 %v473_v14, %v471_v25  ;;  %v8186_v44 = vadd.s32 %v8134_v17, %v8131_v33  ;;  %v626_v50 = vshrl.u32 %v11530_v53, %v614_v5  ;;  %v628_v23 = vshll.u32 %v11530_v53, %v613_v62 }
  0x75   : > { %vm383_vm10 = vcmp.eq.s32.totalorder %v8160_v48, 0  ;;  %v8191_v27 = vsub.s32 %v555_v61, %v558_v13  ;;  %v615_v42 = vshrl.u32 %v11524_v45, %v614_v5  ;;  %v618_v54 = vor.u32 %v617_v22, %v616_v19 }
  0x76   : > { %v629_v40 = vshrl.u32 %v11526_v60, %v614_v5  ;;  %vm382_vm11 = vcmp.lt.s32.totalorder %v8160_v48, 2  ;;  %v475_v55 = vxor.u32 2147483648, %v474_v38  ;;  %v621_v41 = vor.u32 %v620_v26, %v619_v24 }
  0x77   : > { %v624_v57 = vor.u32 %v623_v43, %v622_v28  ;;  %v627_v33 = vor.u32 %v626_v50, %v625_v29  ;;  %vm379_vm12 = vweird.f32 %v7929_v10  ;;  %v561_v17 = vsub.s32 0, %v8191_v27 }
  0x78   : > { %vm631_vm13 = vcmp.lt.s32.totalorder %v612_v52, 1  ;;  %vm634_vm15 = vcmp.lt.s32.totalorder %v612_v52, 4  ;;  %v707_v58 = vshrl.u32 %v706_v20, 23  ;;  %v476_v11 = vsel %vm393_vm14, %v475_v55, %v474_v38 }
  0x79   : > { %v630_v34 = vor.u32 %v629_v40, %v628_v23  ;;  %vm633_vm1 = vcmp.lt.s32.totalorder %v612_v52, 3  ;;  %v636_v61 = vsel %vm634_vm15, %v624_v57, 2102212464  ;;  %v479_v62 = vsel %vm8081_vm0, %v7936_v15, %v476_v11 }
  0x7a   : > { %vm497_vm2 = vcmp.lt.s32.totalorder %v7939_v16, 0  ;;  %v7122_v35 = vmin.u32 %v561_v17, %v8191_v27  ;;  %v635_v63 = vsel %vm631_vm13, %v615_v42, %v618_v54  ;;  %v637_v37 = vsel %vm633_vm1, %v621_v41, %v636_v61 }
  0x7b   : > { %7574 = vcosq.f32 %v479_v62  ;;  %vm632_vm14 = vcmp.lt.s32.totalorder %v612_v52, 2  ;;  %v639_v4 = vsel %vm631_vm13, %v618_v54, %v621_v41  ;;  %v640_v5 = vsel %vm634_vm15, %v627_v33, 920167782 }
  0x7c   : > { %7576 = vsinq.f32 %v479_v62  ;;  %v563_v31 = vclz %v7122_v35  ;;  %v643_v8 = vsel %vm631_vm13, %v621_v41, %v624_v57  ;;  %v7129_v14 = vadd.s32 4294967169, %v707_v58 }
  0x7d   : > { %v8214_v19 = vpop.eup %7570  ;;  %v581_v22 = vsub.s32 4, %v8170_v21  ;;  %v638_v24 = vsel %vm632_vm14, %v635_v63, %v637_v37  ;;  %v641_v26 = vsel %vm633_vm1, %v624_v57, %v640_v5  ;;  %v644_v25 = vsel %vm634_vm15, %v630_v34, 1326507024 }
  0x7e   : > { %v8220_v28 = vpop.eup %7572  ;;  %v11510_v43 = vxor.u32 2147483648, %v8214_v19  ;;  %v7123_v29 = vadd.s32 4294967294, %v563_v31  ;;  %v642_v13 = vsel %vm632_vm14, %v639_v4, %v641_v26  ;;  %v645_v20 = vsel %vm633_vm1, %v627_v33, %v644_v25 }
  0x7f   : > { %v11513_v38 = vxor.u32 2147483648, %v8220_v28  ;;  %v646_v50 = vsel %vm632_vm14, %v643_v8, %v645_v20  ;;  %v8229_v23 = vmul.u32.u64.low %v8167_v7, %v642_v13  ;;  %v8230_v42 = vmul.u32.u64.high %v8167_v7, %v642_v13, %v8229_v23 }
  0x80   : > { %v388_v54 = vsel %vm386_vm9, %v11510_v43, %v8220_v28  ;;  %vm7124_vm0 = vcmp.lt.s32.totalorder %v7123_v29, 0  ;;  %v8238_v40 = vmul.u32.u64.low %v8167_v7, %v646_v50  ;;  %v8239_v55 = vmul.u32.u64.high %v8167_v7, %v646_v50, %v8238_v40 }
  0x81   : > { %v385_v52 = vsel %vm383_vm10, %v8214_v19, %v11513_v38  ;;  %v566_v41 = vsel %vm7124_vm0, 0, %v7123_v29  ;;  %v654_v57 = vmul.u32 %v8167_v7, %v638_v24  ;;  %v713_v33 = vadd.s32 1, %v7129_v14 }
  0x82   : > { %v389_v17 = vsel %vm382_vm11, %v385_v52, %v388_v54  ;;  %v567_v58 = vsub.s32 32, %v566_v41  ;;  %v568_v11 = vshll.u32 %v8191_v27, %v566_v41  ;;  %v571_v34 = vsub.s32 4294967266, %v566_v41 }
  0x83   : > { %v390_v61 = vsel %vm379_vm12, nan, %v389_v17  ;;  %v582_v62 = vsel %vm497_vm2, %v581_v22, %v8170_v21  ;;  %v657_v35 = vadd.s32 1, %v8230_v42  ;;  %vm714_vm3 = vcmp.gt.s32.totalorder %v713_v33, 0 }
  0x84   : > { %3615 = vst [vmem:[%s8258_s4] sm:$0xff] %v390_v61  ;;  %v569_v48 = vshrl.u32 %v8186_v44, %v567_v58  ;;  %v572_v7 = vadd.s32 127, %v571_v34  ;;  %vm656_vm4 = vc.u32 %v8239_v55, %v8229_v23  ;;  %v8265_v27 = vmul.f32 %v7926_v9, %v8154_v56 }
  0x85   : > { %vm8269_vm5 = vcmp.le.f32.partialorder %v495_v39, 0.7853982  ;;  %v658_v63 = vsel %vm656_vm4, %v657_v35, %v8230_v42  ;;  %v711_v37 = vor.u32 8388608, %v8182_v6  ;;  %v715_v4 = vsel %vm714_vm3, %v713_v33, 0 }
  0x86   : > { %11759 = vst [vmem:[#allocation13_spill] sm:$0xff] %v8265_v27  ;;  %v570_v5 = vor.u32 %v569_v48, %v568_v11  ;;  %v573_v44 = vshll.u32 %v572_v7, 23  ;;  %v8277_v31 = vsel %vm8269_vm5, 0, %v582_v62  ;;  %v659_v8 = vadd.s32 %v658_v63, %v654_v57 }
  0x87   : > { %vm483_vm6 = vweird.f32 %v7936_v15  ;;  %vm486_vm7 = vcmp.lt.s32.totalorder %v8165_v0, 2  ;;  %vm487_vm8 = vcmp.eq.s32.totalorder %v8165_v0, 0  ;;  %v717_v39 = vand.u32 31, %v715_v4 }
  0x88   : > { %v8282_v56 = vpop.eup %7574  ;;  %vm490_vm9 = vcmp.eq.s32.totalorder %v8165_v0, 2  ;;  %v574_v6 = vor.u32 4788187, %v573_v44  ;;  %v577_v14 = vcvt.s32.f32 %v570_v5  ;;  %v660_v22 = vadd.s32 536870912, %v659_v8 }
  0x89   : > { %v8285_v24 = vpop.eup %7576  ;;  %v11508_v26 = vxor.u32 2147483648, %v8282_v56  ;;  %v8289_v25 = vadd.s32 3, %v8277_v31  ;;  %v718_v29 = vsub.s32 32, %v717_v39  ;;  %v8291_v13 = vshll.u32 %v711_v37, 8 }
  0x8a   : > { %v11509_v20 = vxor.u32 2147483648, %v8285_v24  ;;  %v575_v50 = vand.u32 2147483647, %v574_v6  ;;  %v8295_v42 = vadd.s32 %v8229_v23, %v8239_v55  ;;  %v661_v54 = vshrl.u32 %v660_v22, 30 }
  0x8b   : > { %v492_v40 = vsel %vm490_vm9, %v11508_v26, %v8285_v24  ;;  %vm601_vm10 = vcmp.lt.s32.totalorder %v8035_v32, 0  ;;  %v720_v52 = vshll.u32 %v11524_v45, %v717_v39  ;;  %v721_v41 = vshrl.u32 %v11522_v47, %v718_v29 }
  0x8c   : > { %v723_v57 = vshll.u32 %v11522_v47, %v717_v39  ;;  %v489_v23 = vsel %vm487_vm8, %v8282_v56, %v11509_v20  ;;  %v578_v55 = vmul.f32 %v577_v14, %v575_v50  ;;  %v662_v33 = vshll.u32 %v661_v54, 30 }
  0x8d   : > { %v724_v17 = vshrl.u32 %v11517_v49, %v718_v29  ;;  %v493_v58 = vsel %vm486_vm7, %v489_v23, %v492_v40  ;;  %v716_v11 = vshrl.u32 %v715_v4, 5  ;;  %v726_v34 = vshll.u32 %v11517_v49, %v717_v39 }
  0x8e   : > { %v727_v61 = vshrl.u32 %v11515_v51, %v718_v29  ;;  %v494_v62 = vsel %vm483_vm6, nan, %v493_v58  ;;  %v579_v35 = vxor.u32 2147483648, %v578_v55  ;;  %v8316_v48 = vsub.s32 %v659_v8, %v662_v33 }
  0x8f   : > { %v719_v7 = vshrl.u32 %v11524_v45, %v718_v29  ;;  %3616 = vst [vmem:[%s8258_s4 + $0x8] sm:$0xff] %v494_v62  ;;  %v685_v63 = vsub.s32 4, %v661_v54  ;;  %v722_v37 = vor.u32 %v721_v41, %v720_v52  ;;  %v729_v5 = vshll.u32 %v11515_v51, %v717_v39 }
  0x90   : > { %v730_v0 = vshrl.u32 %v11530_v53, %v718_v29  ;;  %v580_v4 = vsel %vm497_vm2, %v579_v35, %v578_v55  ;;  %vm8326_vm11 = vcmp.le.f32.partialorder %v599_v3, 0.7853982  ;;  %v665_v8 = vsub.s32 0, %v8316_v48 }
  0x91   : > { %v725_v6 = vor.u32 %v724_v17, %v723_v57  ;;  %v732_v14 = vshll.u32 %v11530_v53, %v717_v39  ;;  %v583_v22 = vsel %vm8269_vm5, %v7939_v16, %v580_v4  ;;  %v728_v50 = vor.u32 %v727_v61, %v726_v34 }
  0x92   : > { %v731_v40 = vor.u32 %v730_v0, %v729_v5  ;;  %v733_v52 = vshrl.u32 %v11526_v60, %v718_v29  ;;  %7578 = vcosq.f32 %v583_v22  ;;  %v7126_v41 = vmin.u32 %v665_v8, %v8316_v48 }
  0x93   : > { %vm735_vm13 = vcmp.lt.s32.totalorder %v716_v11, 1  ;;  %v810_v3 = vand.u32 2139095040, %v8265_v27  ;;  %7580 = vsinq.f32 %v583_v22  ;;  %vm737_vm15 = vcmp.lt.s32.totalorder %v716_v11, 3 }
  0x94   : > { %v734_v23 = vor.u32 %v733_v52, %v732_v14  ;;  %vm738_vm1 = vcmp.lt.s32.totalorder %v716_v11, 4  ;;  %v667_v57 = vclz %v7126_v41  ;;  %v686_v39 = vsel %vm601_vm10, %v685_v63, %v661_v54 }
  0x95   : > { %vm736_vm2 = vcmp.lt.s32.totalorder %v716_v11, 2  ;;  %v739_v21 = vsel %vm735_vm13, %v719_v7, %v722_v37  ;;  %v740_v55 = vsel %vm738_vm1, %v728_v50, 2102212464  ;;  %v743_v33 = vsel %vm735_vm13, %v722_v37, %v725_v6 }
  0x96   : > { %v744_v17 = vsel %vm738_vm1, %v731_v40, 920167782  ;;  %v747_v29 = vsel %vm735_vm13, %v725_v6, %v728_v50  ;;  %v7127_v58 = vadd.s32 4294967294, %v667_v57  ;;  %v741_v34 = vsel %vm737_vm15, %v725_v6, %v740_v55 }
  0x97   : > { %v745_v61 = vsel %vm737_vm15, %v728_v50, %v744_v17  ;;  %v748_v62 = vsel %vm738_vm1, %v734_v23, 1326507024  ;;  %v742_v35 = vsel %vm736_vm2, %v739_v21, %v741_v34  ;;  %v811_v4 = vshrl.u32 %v810_v3, 23 }
  0x98   : > { %v746_v5 = vsel %vm736_vm2, %v743_v33, %v745_v61  ;;  %v749_v0 = vsel %vm737_vm15, %v731_v40, %v748_v62  ;;  %vm7128_vm14 = vcmp.lt.s32.totalorder %v7127_v58, 0  ;;  %v8350_v37 = vsel %vm8326_vm11, 0, %v686_v39 }
  0x99   : > { %v750_v8 = vsel %vm736_vm2, %v747_v29, %v749_v0  ;;  %v8344_v54 = vmul.u32.u64.low %v8291_v13, %v746_v5  ;;  %v8345_v7 = vmul.u32.u64.high %v8291_v13, %v746_v5, %v8344_v54  ;;  %v670_v63 = vsel %vm7128_vm14, 0, %v7127_v58 }
  0x9a   : > { %v8353_v6 = vmul.u32.u64.low %v8291_v13, %v750_v8  ;;  %v8354_v14 = vmul.u32.u64.high %v8291_v13, %v750_v8, %v8353_v6  ;;  %v671_v22 = vsub.s32 32, %v670_v63  ;;  %v672_v11 = vshll.u32 %v8316_v48, %v670_v63 }
  0x9b   : > { %v675_v50 = vsub.s32 4294967266, %v670_v63  ;;  %v7133_v40 = vadd.s32 4294967169, %v811_v4  ;;  %v589_v52 = vand.u32 3, %v8289_v25  ;;  %v758_v41 = vmul.u32 %v8291_v13, %v742_v35 }
  0x9c   : > { %v807_v3 = vand.u32 2147483647, %v8265_v27  ;;  %v673_v23 = vshrl.u32 %v8295_v42, %v671_v22  ;;  %v761_v39 = vadd.s32 1, %v8345_v7  ;;  %v692_v55 = vadd.s32 3, %v8350_v37 }
  0x9d   : > { %v676_v57 = vadd.s32 127, %v675_v50  ;;  %v817_v21 = vadd.s32 1, %v7133_v40  ;;  %vm760_vm0 = vc.u32 %v8354_v14, %v8344_v54  ;;  %v222_v48 = vadd.f32 %v7920_v2, %v189_v46 }
  0x9e   : > { %v8369_v25 = vadd.s32 56, %v7918_v1  ;;  %v674_v13 = vor.u32 %v673_v23, %v672_v11  ;;  %v762_v42 = vsel %vm760_vm0, %v761_v39, %v8345_v7  ;;  %vm594_vm4 = vcmp.eq.s32.totalorder %v589_v52, 2 }
  0x9f   : > { %v677_v33 = vshll.u32 %v676_v57, 23  ;;  %vm818_vm3 = vcmp.gt.s32.totalorder %v817_v21, 0  ;;  %v8372_v17 = vpop.eup %7578  ;;  %v763_v29 = vadd.s32 %v762_v42, %v758_v41  ;;  %v814_v58 = vand.u32 8388607, %v807_v3 }
  0xa0   : > { %v819_v34 = vsel %vm818_vm3, %v817_v21, 0  ;;  %v8376_v61 = vpop.eup %7580  ;;  %vm591_vm5 = vcmp.eq.s32.totalorder %v589_v52, 0  ;;  %v11506_v36 = vxor.u32 2147483648, %v8372_v17  ;;  %v681_v62 = vcvt.s32.f32 %v674_v13 }
  0xa1   : > { %v678_v46 = vor.u32 4788187, %v677_v33  ;;  %vm590_vm7 = vcmp.lt.s32.totalorder %v589_v52, 2  ;;  %v11507_v35 = vxor.u32 2147483648, %v8376_v61  ;;  %v764_v5 = vadd.s32 536870912, %v763_v29 }
  0xa2   : > { %v821_v0 = vand.u32 31, %v819_v34  ;;  %vm587_vm8 = vweird.f32 %v7939_v16  ;;  %v596_v4 = vsel %vm594_vm4, %v11506_v36, %v8376_v61  ;;  %v8384_v7 = vand.u32 3, %v692_v55 }
  0xa3   : > { %v679_v8 = vand.u32 2147483647, %v678_v46  ;;  %v593_v63 = vsel %vm591_vm5, %v8372_v17, %v11507_v35  ;;  %v8389_v6 = vshrl.u32 %v764_v5, 30  ;;  %v815_v22 = vor.u32 8388608, %v814_v58 }
  0xa4   : > { %v822_v11 = vsub.s32 32, %v821_v0  ;;  %v597_v50 = vsel %vm590_vm7, %v593_v63, %v596_v4  ;;  %v820_v52 = vshrl.u32 %v819_v34, 5  ;;  %v824_v41 = vshll.u32 %v11524_v45, %v821_v0 }
  0xa5   : > { %v682_v40 = vmul.f32 %v681_v62, %v679_v8  ;;  %v598_v23 = vsel %vm587_vm8, nan, %v597_v50  ;;  %v766_v57 = vshll.u32 %v8389_v6, 30  ;;  %v827_v39 = vshll.u32 %v11522_v47, %v821_v0 }
  0xa6   : > { %v830_v21 = vshll.u32 %v11517_v49, %v821_v0  ;;  %3617 = vst [vmem:[%s8258_s4 + $0x10] sm:$0xff] %v598_v23  ;;  %v825_v13 = vshrl.u32 %v11522_v47, %v822_v11  ;;  %v828_v33 = vshrl.u32 %v11517_v49, %v822_v11  ;;  %v831_v42 = vshrl.u32 %v11515_v51, %v822_v11 }
  0xa7   : > { %v683_v55 = vxor.u32 2147483648, %v682_v40  ;;  %v8401_v58 = vsub.s32 %v763_v29, %v766_v57  ;;  %v833_v34 = vshll.u32 %v11515_v51, %v821_v0  ;;  %v834_v46 = vshrl.u32 %v11530_v53, %v822_v11 }
  0xa8   : > { %v8406_v62 = vmul.f32 %v7926_v9, %v222_v48  ;;  %v823_v4 = vshrl.u32 %v11524_v45, %v822_v11  ;;  %v826_v8 = vor.u32 %v825_v13, %v824_v41  ;;  %vm839_vm9 = vcmp.lt.s32.totalorder %v820_v52, 1 }
  0xa9   : > { %v684_v5 = vsel %vm601_vm10, %v683_v55, %v682_v40  ;;  %v769_v29 = vsub.s32 0, %v8401_v58  ;;  %v829_v50 = vor.u32 %v828_v33, %v827_v39  ;;  %v832_v23 = vor.u32 %v831_v42, %v830_v21 }
  0xaa   : > { %11764 = vst [vmem:[#allocation14_spill] sm:$0xff] %v8406_v62  ;;  %v687_v63 = vsel %vm8326_vm11, %v8035_v32, %v684_v5  ;;  %v835_v57 = vor.u32 %v834_v46, %v833_v34  ;;  %v836_v9 = vshll.u32 %v11530_v53, %v821_v0  ;;  %v837_v48 = vshrl.u32 %v11526_v60, %v822_v11 }
  0xab   : > { %7582 = vcosq.f32 %v687_v63  ;;  %v759_v40 = vadd.s32 %v8344_v54, %v8354_v14  ;;  %v7130_v41 = vmin.u32 %v769_v29, %v8401_v58  ;;  %v855_v55 = vshll.u32 %v815_v22, 8 }
  0xac   : > { %7584 = vsinq.f32 %v687_v63  ;;  %v838_v13 = vor.u32 %v837_v48, %v836_v9  ;;  %vm841_vm10 = vcmp.lt.s32.totalorder %v820_v52, 3  ;;  %vm842_vm11 = vcmp.lt.s32.totalorder %v820_v52, 4 }
  0xad   : > { %v914_v44 = vand.u32 2139095040, %v8406_v62  ;;  %v771_v39 = vclz %v7130_v41  ;;  %vm840_vm13 = vcmp.lt.s32.totalorder %v820_v52, 2  ;;  %v843_v21 = vsel %vm839_vm9, %v823_v4, %v826_v8 }
  0xae   : > { %v847_v0 = vsel %vm839_vm9, %v826_v8, %v829_v50  ;;  %vm8425_vm15 = vcmp.le.f32.partialorder %v703_v59, 0.7853982  ;;  %v844_v54 = vsel %vm842_vm11, %v832_v23, 2102212464  ;;  %v848_v14 = vsel %vm842_vm11, %v835_v57, 920167782 }
  0xaf   : > { %v851_v22 = vsel %vm839_vm9, %v829_v50, %v832_v23  ;;  %v852_v33 = vsel %vm842_vm11, %v838_v13, 1326507024  ;;  %v7131_v42 = vadd.s32 4294967294, %v771_v39  ;;  %v845_v34 = vsel %vm841_vm10, %v829_v50, %v844_v54 }
  0xb0   : > { %v849_v46 = vsel %vm841_vm10, %v832_v23, %v848_v14  ;;  %v853_v5 = vsel %vm841_vm10, %v835_v57, %v852_v33  ;;  %v789_v63 = vsub.s32 4, %v8389_v6  ;;  %v915_v29 = vshrl.u32 %v914_v44, 23 }
  0xb1   : > { %v850_v4 = vsel %vm840_vm13, %v847_v0, %v849_v46  ;;  %v854_v8 = vsel %vm840_vm13, %v851_v22, %v853_v5  ;;  %vm7132_vm1 = vcmp.lt.s32.totalorder %v7131_v42, 0  ;;  %v846_v59 = vsel %vm840_vm13, %v843_v21, %v845_v34 }
  0xb2   : > { %v8434_v9 = vmul.u32.u64.low %v855_v55, %v854_v8  ;;  %v8435_v48 = vmul.u32.u64.high %v855_v55, %v854_v8, %v8434_v9  ;;  %vm691_vm2 = vweird.f32 %v8035_v32  ;;  %v774_v41 = vsel %vm7132_vm1, 0, %v7131_v42 }
  0xb3   : > { %v8438_v13 = vmul.u32.u64.low %v855_v55, %v850_v4  ;;  %v8439_v50 = vmul.u32.u64.high %v855_v55, %v850_v4, %v8438_v13  ;;  %v7137_v23 = vadd.s32 4294967169, %v915_v29  ;;  %vm705_vm14 = vcmp.lt.s32.totalorder %v8143_v30, 0 }
  0xb4   : > { %v775_v57 = vsub.s32 32, %v774_v41  ;;  %v776_v39 = vshll.u32 %v8401_v58, %v774_v41  ;;  %v779_v44 = vsub.s32 4294967266, %v774_v41  ;;  %vm694_vm0 = vcmp.lt.s32.totalorder %v8384_v7, 2 }
  0xb5   : > { %vm695_vm3 = vcmp.eq.s32.totalorder %v8384_v7, 0  ;;  %v790_v52 = vsel %vm705_vm14, %v789_v63, %v8389_v6  ;;  %v921_v21 = vadd.s32 1, %v7137_v23  ;;  %v862_v14 = vmul.u32 %v855_v55, %v846_v59 }
  0xb6   : > { %v777_v0 = vshrl.u32 %v759_v40, %v775_v57  ;;  %v780_v54 = vadd.s32 127, %v779_v44  ;;  %vm864_vm4 = vc.u32 %v8435_v48, %v8438_v13  ;;  %vm698_vm5 = vcmp.eq.s32.totalorder %v8384_v7, 2 }
  0xb7   : > { %v865_v58 = vadd.s32 1, %v8439_v50  ;;  %v911_v22 = vand.u32 2147483647, %v8406_v62  ;;  %vm922_vm7 = vcmp.gt.s32.totalorder %v921_v21, 0  ;;  %v8458_v6 = vsel %vm8425_vm15, 0, %v790_v52 }
  0xb8   : > { %v8454_v33 = vpop.eup %7582  ;;  %v778_v42 = vor.u32 %v777_v0, %v776_v39  ;;  %v781_v34 = vshll.u32 %v780_v54, 23  ;;  %v923_v40 = vsel %vm922_vm7, %v921_v21, 0  ;;  %v190_v4 = vcvt.s32.f32 %v8369_v25 }
  0xb9   : > { %v8460_v55 = vpop.eup %7584  ;;  %v11504_v46 = vxor.u32 2147483648, %v8454_v33  ;;  %v866_v5 = vsel %vm864_vm4, %v865_v58, %v8439_v50  ;;  %v925_v63 = vand.u32 31, %v923_v40  ;;  %v796_v23 = vadd.s32 3, %v8458_v6 }
  0xba   : > { %v11505_v8 = vxor.u32 2147483648, %v8460_v55  ;;  %v782_v29 = vor.u32 4788187, %v781_v34  ;;  %v785_v59 = vcvt.s32.f32 %v778_v42  ;;  %v867_v9 = vadd.s32 %v866_v5, %v862_v14 }
  0xbb   : > { %v700_v41 = vsel %vm698_vm5, %v11504_v46, %v8460_v55  ;;  %v918_v50 = vand.u32 8388607, %v911_v22  ;;  %v926_v57 = vsub.s32 32, %v925_v63  ;;  %v924_v52 = vshrl.u32 %v923_v40, 5 }
  0xbc   : > { %v697_v25 = vsel %vm695_vm3, %v8454_v33, %v11505_v8  ;;  %v783_v39 = vand.u32 2147483647, %v782_v29  ;;  %v868_v44 = vadd.s32 536870912, %v867_v9  ;;  %v928_v0 = vshll.u32 %v11524_v45, %v925_v63 }
  0xbd   : > { %v701_v21 = vsel %vm694_vm0, %v697_v25, %v700_v41  ;;  %v929_v54 = vshrl.u32 %v11522_v47, %v926_v57  ;;  %v931_v14 = vshll.u32 %v11522_v47, %v925_v63  ;;  %v932_v5 = vshrl.u32 %v11517_v49, %v926_v57 }
  0xbe   : > { %v702_v58 = vsel %vm691_vm2, nan, %v701_v21  ;;  %v786_v42 = vmul.f32 %v785_v59, %v783_v39  ;;  %v869_v34 = vshrl.u32 %v868_v44, 30  ;;  %v934_v29 = vshll.u32 %v11517_v49, %v925_v63 }
  0xbf   : > { %3618 = vst [vmem:[%s8258_s4 + $0x18] sm:$0xff] %v702_v58  ;;  %v935_v40 = vshrl.u32 %v11515_v51, %v926_v57  ;;  %v937_v7 = vshll.u32 %v11515_v51, %v925_v63  ;;  %v938_v41 = vshrl.u32 %v11530_v53, %v926_v57  ;;  %v919_v8 = vor.u32 8388608, %v918_v50 }
  0xc0   : > { %v787_v25 = vxor.u32 2147483648, %v786_v42  ;;  %v870_v46 = vshll.u32 %v869_v34, 30  ;;  %v223_v36 = vadd.f32 %v7920_v2, %v190_v4  ;;  %v927_v21 = vshrl.u32 %v11524_v45, %v926_v57 }
  0xc1   : > { %v930_v59 = vor.u32 %v929_v54, %v928_v0  ;;  %v940_v39 = vshll.u32 %v11530_v53, %v925_v63  ;;  %v941_v44 = vshrl.u32 %v11526_v60, %v926_v57  ;;  %v933_v26 = vor.u32 %v932_v5, %v931_v14  ;;  %v8504_v57 = vld [vmem:[#allocation2] ss:$0 sm:$0xff] }
  0xc2   : > { %v788_v58 = vsel %vm705_vm14, %v787_v25, %v786_v42  ;;  %v8498_v35 = vsub.s32 %v867_v9, %v870_v46  ;;  %v939_v20 = vor.u32 %v938_v41, %v937_v7  ;;  %v936_v43 = vor.u32 %v935_v40, %v934_v29 }
  0xc3   : > { %v791_v50 = vsel %vm8425_vm15, %v8143_v30, %v788_v58  ;;  %v942_v4 = vor.u32 %v941_v44, %v940_v39  ;;  %vm943_vm9 = vcmp.lt.s32.totalorder %v924_v52, 1  ;;  %vm945_vm10 = vcmp.lt.s32.totalorder %v924_v52, 3 }
  0xc4   : > { %7586 = vcosq.f32 %v791_v50  ;;  %v873_v0 = vsub.s32 0, %v8498_v35  ;;  %vm946_vm11 = vcmp.lt.s32.totalorder %v924_v52, 4  ;;  %vm944_vm13 = vcmp.lt.s32.totalorder %v924_v52, 2 }
  0xc5   : > { %7588 = vsinq.f32 %v791_v50  ;;  %v948_v63 = vsel %vm946_vm11, %v936_v43, 2102212464  ;;  %v8507_v46 = vmul.f32 %v8504_v57, %v223_v36  ;;  %v947_v11 = vsel %vm943_vm9, %v927_v21, %v930_v59 }
  0xc6   : > { %v7134_v9 = vmin.u32 %v873_v0, %v8498_v35  ;;  %v951_v54 = vsel %vm943_vm9, %v930_v59, %v933_v26  ;;  %v952_v14 = vsel %vm946_vm11, %v939_v20, 920167782  ;;  %v949_v42 = vsel %vm945_vm10, %v933_v26, %v948_v63 }
  0xc7   : > { %11767 = vst [vmem:[#allocation15_spill] sm:$0xff] %v8507_v46  ;;  %v953_v5 = vsel %vm945_vm10, %v936_v43, %v952_v14  ;;  %v955_v29 = vsel %vm943_vm9, %v933_v26, %v936_v43  ;;  %v956_v40 = vsel %vm946_vm11, %v942_v4, 1326507024  ;;  %v797_v7 = vand.u32 3, %v796_v23 }
  0xc8   : > { %v875_v41 = vclz %v7134_v9  ;;  %v159_v25 = vadd.s32 64, %v7918_v1  ;;  %v893_v36 = vsub.s32 4, %v869_v34  ;;  %v954_v39 = vsel %vm944_vm13, %v951_v54, %v953_v5 }
  0xc9   : > { %v957_v44 = vsel %vm945_vm10, %v939_v20, %v956_v40  ;;  %v959_v21 = vshll.u32 %v919_v8, 8  ;;  %v950_v59 = vsel %vm944_vm13, %v947_v11, %v949_v42  ;;  %v1018_v0 = vand.u32 2139095040, %v8507_v46 }
  0xca   : > { %v7135_v58 = vadd.s32 4294967294, %v875_v41  ;;  %v958_v50 = vsel %vm944_vm13, %v955_v29, %v957_v44  ;;  %vm795_vm15 = vweird.f32 %v8143_v30  ;;  %vm809_vm1 = vcmp.lt.s32.totalorder %v8265_v27, 0 }
  0xcb   : > { %v8521_v63 = vmul.u32.u64.low %v959_v21, %v958_v50  ;;  %v8522_v43 = vmul.u32.u64.high %v959_v21, %v958_v50, %v8521_v63  ;;  %v8524_v26 = vmul.u32.u64.low %v959_v21, %v954_v39  ;;  %v8525_v23 = vmul.u32.u64.high %v959_v21, %v954_v39, %v8524_v26 }
  0xcc   : > { %v863_v20 = vadd.s32 %v8438_v13, %v8435_v48  ;;  %vm7136_vm14 = vcmp.lt.s32.totalorder %v7135_v58, 0  ;;  %v1019_v8 = vshrl.u32 %v1018_v0, 23  ;;  %vm8533_vm0 = vcmp.le.f32.partialorder %v807_v3, 0.7853982 }
  0xcd   : > { %v878_v4 = vsel %vm7136_vm14, 0, %v7135_v58  ;;  %v894_v9 = vsel %vm809_vm1, %v893_v36, %v869_v34  ;;  %v966_v11 = vmul.u32 %v959_v21, %v950_v59  ;;  %vm798_vm3 = vcmp.lt.s32.totalorder %v797_v7, 2 }
  0xce   : > { %v879_v54 = vsub.s32 32, %v878_v4  ;;  %v880_v14 = vshll.u32 %v8498_v35, %v878_v4  ;;  %v883_v42 = vsub.s32 4294967266, %v878_v4  ;;  %v7141_v5 = vadd.s32 4294967169, %v1019_v8 }
  0xcf   : > { %vm968_vm4 = vc.u32 %v8522_v43, %v8524_v26  ;;  %v969_v48 = vadd.s32 1, %v8525_v23  ;;  %v191_v13 = vcvt.s32.f32 %v159_v25  ;;  %v8544_v40 = vsel %vm8533_vm0, 0, %v894_v9 }
  0xd0   : > { %v881_v3 = vshrl.u32 %v863_v20, %v879_v54  ;;  %v884_v29 = vadd.s32 127, %v883_v42  ;;  %v1025_v41 = vadd.s32 1, %v7141_v5  ;;  %vm799_vm5 = vcmp.eq.s32.totalorder %v797_v7, 0 }
  0xd1   : > { %v8546_v34 = vpop.eup %7586  ;;  %vm802_vm7 = vcmp.eq.s32.totalorder %v797_v7, 2  ;;  %v970_v35 = vsel %vm968_vm4, %v969_v48, %v8525_v23  ;;  %v11514_v36 = vand.u32 2147483647, %v8507_v46  ;;  %v900_v50 = vadd.s32 3, %v8544_v40 }
  0xd2   : > { %11770 = vst [vmem:[#allocation16_spill] sm:$0xff] %v8546_v34  ;;  %v8550_v39 = vpop.eup %7588  ;;  %v11511_v44 = vxor.u32 2147483648, %v8546_v34  ;;  %v882_v25 = vor.u32 %v881_v3, %v880_v14  ;;  %v885_v21 = vshll.u32 %v884_v29, 23  ;;  %v971_v58 = vadd.s32 %v970_v35, %v966_v11 }
  0xd3   : > { %11771 = vst [vmem:[#allocation17_spill] sm:$0xff] %v8550_v39  ;;  %v11512_v59 = vxor.u32 2147483648, %v8550_v39  ;;  %vm1026_vm9 = vcmp.gt.s32.totalorder %v1025_v41, 0  ;;  %v224_v0 = vadd.f32 %v7920_v2, %v191_v13  ;;  %v1022_v9 = vand.u32 8388607, %v11514_v36 }
  0xd4   : > { %v804_v63 = vsel %vm802_vm7, %v11511_v44, %v8550_v39  ;;  %v886_v23 = vor.u32 4788187, %v885_v21  ;;  %v889_v20 = vcvt.s32.f32 %v882_v25  ;;  %v972_v8 = vadd.s32 536870912, %v971_v58 }
  0xd5   : > { %v801_v4 = vsel %vm799_vm5, %v8546_v34, %v11512_v59  ;;  %v1027_v11 = vsel %vm1026_vm9, %v1025_v41, 0  ;;  %v8569_v13 = vmul.f32 %v8504_v57, %v224_v0  ;;  %v8572_v29 = vand.u32 3, %v900_v50 }
  0xd6   : > { %v805_v54 = vsel %vm798_vm3, %v801_v4, %v804_v63  ;;  %v887_v14 = vand.u32 2147483647, %v886_v23  ;;  %v973_v42 = vshrl.u32 %v972_v8, 30  ;;  %v1029_v48 = vand.u32 31, %v1027_v11 }
  0xd7   : > { %v806_v5 = vsel %vm795_vm15, nan, %v805_v54  ;;  %11772 = vst [vmem:[#allocation18_spill] sm:$0xff] %v8569_v13  ;;  %v1028_v25 = vshrl.u32 %v1027_v11, 5  ;;  %v967_v21 = vadd.s32 %v8524_v26, %v8522_v43  ;;  %v1023_v41 = vor.u32 8388608, %v1022_v9 }
  0xd8   : > { %3619 = vst [vmem:[%s8258_s4 + $0x20] sm:$0xff] %v806_v5  ;;  %v890_v3 = vmul.f32 %v889_v20, %v887_v14  ;;  %v974_v35 = vshll.u32 %v973_v42, 30  ;;  %v1030_v7 = vsub.s32 32, %v1029_v48  ;;  %v1032_v63 = vshll.u32 %v11524_v45, %v1029_v48 }
  0xd9   : > { %v1035_v4 = vshll.u32 %v11522_v47, %v1029_v48  ;;  %v1038_v0 = vshll.u32 %v11517_v49, %v1029_v48  ;;  %vm913_vm10 = vcmp.lt.s32.totalorder %v8406_v62, 0  ;;  %v1041_v11 = vshll.u32 %v11515_v51, %v1029_v48 }
  0xda   : > { %v891_v23 = vxor.u32 2147483648, %v890_v3  ;;  %v8576_v8 = vsub.s32 %v971_v58, %v974_v35  ;;  %v1033_v50 = vshrl.u32 %v11522_v47, %v1030_v7  ;;  %v1036_v20 = vshrl.u32 %v11517_v49, %v1030_v7 }
  0xdb   : > { %v1122_v43 = vand.u32 2139095040, %v8569_v13  ;;  %v1039_v9 = vshrl.u32 %v11515_v51, %v1030_v7  ;;  %vm1047_vm11 = vcmp.lt.s32.totalorder %v1028_v25, 1  ;;  %v1031_v14 = vshrl.u32 %v11524_v45, %v1030_v7 }
  0xdc   : > { %v892_v26 = vsel %vm809_vm1, %v891_v23, %v890_v3  ;;  %v977_v58 = vsub.s32 0, %v8576_v8  ;;  %v1034_v5 = vor.u32 %v1033_v50, %v1032_v63  ;;  %v1042_v35 = vshrl.u32 %v11530_v53, %v1030_v7 }
  0xdd   : > { %v895_v54 = vsel %vm8533_vm0, %v8265_v27, %v892_v26  ;;  %v1037_v59 = vor.u32 %v1036_v20, %v1035_v4  ;;  %v1040_v38 = vor.u32 %v1039_v9, %v1038_v0  ;;  %v1044_v23 = vshll.u32 %v11530_v53, %v1029_v48 }
  0xde   : > { %7590 = vcosq.f32 %v895_v54  ;;  %v7138_v44 = vmin.u32 %v977_v58, %v8576_v8  ;;  %v1043_v3 = vor.u32 %v1042_v35, %v1041_v11  ;;  %v1045_v36 = vshrl.u32 %v11526_v60, %v1030_v7 }
  0xdf   : > { %7592 = vsinq.f32 %v895_v54  ;;  %vm8599_vm13 = vcmp.le.f32.partialorder %v911_v22, 0.7853982  ;;  %v997_v50 = vsub.s32 4, %v973_v42  ;;  %v1063_v26 = vshll.u32 %v1023_v41, 8 }
  0xe0   : > { %v979_v63 = vclz %v7138_v44  ;;  %v1123_v51 = vshrl.u32 %v1122_v43, 23  ;;  %v1046_v49 = vor.u32 %v1045_v36, %v1044_v23  ;;  %vm1048_vm1 = vcmp.lt.s32.totalorder %v1028_v25, 2 }
  0xe1   : > { %vm1049_vm14 = vcmp.lt.s32.totalorder %v1028_v25, 3  ;;  %vm1050_vm0 = vcmp.lt.s32.totalorder %v1028_v25, 4  ;;  %v1051_v0 = vsel %vm1047_vm11, %v1031_v14, %v1034_v5  ;;  %v1055_v7 = vsel %vm1047_vm11, %v1034_v5, %v1037_v59 }
  0xe2   : > { %v7139_v4 = vadd.s32 4294967294, %v979_v63  ;;  %v1052_v48 = vsel %vm1050_vm0, %v1040_v38, 2102212464  ;;  %v1056_v11 = vsel %vm1050_vm0, %v1043_v3, 920167782  ;;  %v1059_v22 = vsel %vm1047_vm11, %v1037_v59, %v1040_v38 }
  0xe3   : > { %v1053_v20 = vsel %vm1049_vm14, %v1037_v59, %v1052_v48  ;;  %v1060_v58 = vsel %vm1050_vm0, %v1046_v49, 1326507024  ;;  %v998_v44 = vsel %vm913_vm10, %v997_v50, %v973_v42  ;;  %v1057_v41 = vsel %vm1049_vm14, %v1040_v38, %v1056_v11 }
  0xe4   : > { %vm7140_vm3 = vcmp.lt.s32.totalorder %v7139_v4, 0  ;;  %v1061_v36 = vsel %vm1049_vm14, %v1043_v3, %v1060_v58  ;;  %v1054_v9 = vsel %vm1048_vm1, %v1051_v0, %v1053_v20  ;;  %v1058_v54 = vsel %vm1048_vm1, %v1055_v7, %v1057_v41 }
  0xe5   : > { %v982_v43 = vsel %vm7140_vm3, 0, %v7139_v4  ;;  %v1062_v14 = vsel %vm1048_vm1, %v1059_v22, %v1061_v36  ;;  %vm11748_vm4 = vweird.f32 %v8265_v27  ;;  %v7145_v49 = vadd.s32 4294967169, %v1123_v51 }
  0xe6   : > { %v983_v5 = vsub.s32 32, %v982_v43  ;;  %v984_v35 = vshll.u32 %v8576_v8, %v982_v43  ;;  %v987_v59 = vsub.s32 4294967266, %v982_v43  ;;  %v11521_v4 = vand.u32 2147483647, %v8569_v13 }
  0xe7   : > { %v8613_v23 = vmul.u32.u64.low %v1063_v26, %v1062_v14  ;;  %v8614_v63 = vmul.u32.u64.high %v1063_v26, %v1062_v14, %v8613_v23  ;;  %v8616_v42 = vmul.u32.u64.low %v1063_v26, %v1058_v54  ;;  %v8617_v38 = vmul.u32.u64.high %v1063_v26, %v1058_v54, %v8616_v42 }
  0xe8   : > { %v985_v3 = vshrl.u32 %v967_v21, %v983_v5  ;;  %v988_v50 = vadd.s32 127, %v987_v59  ;;  %v1129_v25 = vadd.s32 1, %v7145_v49  ;;  %vm902_vm5 = vcmp.lt.s32.totalorder %v8572_v29, 2 }
  0xe9   : > { %vm903_vm7 = vcmp.eq.s32.totalorder %v8572_v29, 0  ;;  %v8625_v8 = vsel %vm8599_vm13, 0, %v998_v44  ;;  %v160_v51 = vadd.s32 72, %v7918_v1  ;;  %v1070_v7 = vmul.u32 %v1063_v26, %v1054_v9 }
  0xea   : > { %11775 = vst [vmem:[#allocation19_spill] sm:$0xff] %v8625_v8  ;;  %v986_v0 = vor.u32 %v985_v3, %v984_v35  ;;  %v989_v48 = vshll.u32 %v988_v50, 23  ;;  %vm1130_vm9 = vcmp.gt.s32.totalorder %v1129_v25, 0  ;;  %vm906_vm11 = vcmp.eq.s32.totalorder %v8572_v29, 2 }
  0xeb   : > { %v8628_v20 = vpop.eup %7590  ;;  %vm1072_vm1 = vc.u32 %v8614_v63, %v8616_v42  ;;  %v1073_v21 = vadd.s32 1, %v8617_v38  ;;  %v1131_v11 = vsel %vm1130_vm9, %v1129_v25, 0  ;;  %v1126_v26 = vand.u32 8388607, %v11521_v4 }
  0xec   : > { %11776 = vst [vmem:[#allocation20_spill] sm:$0xff] %v8628_v20  ;;  %v8634_v22 = vpop.eup %7592  ;;  %v11519_v58 = vxor.u32 2147483648, %v8628_v20  ;;  %v990_v44 = vor.u32 4788187, %v989_v48  ;;  %v993_v41 = vcvt.s32.f32 %v986_v0  ;;  %v1004_v43 = vadd.s32 3, %v8625_v8 }
  0xed   : > { %11777 = vst [vmem:[#allocation21_spill] sm:$0xff] %v8634_v22  ;;  %v11520_v36 = vxor.u32 2147483648, %v8634_v22  ;;  %v1074_v9 = vsel %vm1072_vm1, %v1073_v21, %v8617_v38  ;;  %v1133_v54 = vand.u32 31, %v1131_v11  ;;  %v192_v59 = vcvt.s32.f32 %v160_v51 }
  0xee   : > { %v908_v14 = vsel %vm906_vm11, %v11519_v58, %v8634_v22  ;;  %v991_v5 = vand.u32 2147483647, %v990_v44  ;;  %v1075_v35 = vadd.s32 %v1074_v9, %v1070_v7  ;;  %v1132_v23 = vshrl.u32 %v1131_v11, 5 }
  0xef   : > { %v905_v49 = vsel %vm903_vm7, %v8628_v20, %v11520_v36  ;;  %v1134_v3 = vsub.s32 32, %v1133_v54  ;;  %v1136_v50 = vshll.u32 %v11524_v45, %v1133_v54  ;;  %v1139_v48 = vshll.u32 %v11522_v47, %v1133_v54 }
  0xf0   : > { %v909_v38 = vsel %vm902_vm5, %v905_v49, %v908_v14  ;;  %v994_v25 = vmul.f32 %v993_v41, %v991_v5  ;;  %v1076_v0 = vadd.s32 536870912, %v1075_v35  ;;  %v11778_v21 = vmov 2131351028  }
  0xf1   : > { %v910_v51 = vsel %vm11748_vm4, nan, %v909_v38  ;;  %v1137_v7 = vshrl.u32 %v11522_v47, %v1134_v3  ;;  %v1140_v44 = vshrl.u32 %v11778_v21, %v1134_v3  ;;  %v1142_v9 = vshll.u32 %v11778_v21, %v1133_v54 }
  0xf2   : > { %3620 = vst [vmem:[%s8258_s4 + $0x28] sm:$0xff] %v910_v51  ;;  %v995_v11 = vxor.u32 2147483648, %v994_v25  ;;  %v1077_v58 = vshrl.u32 %v1076_v0, 30  ;;  %v11779_v36 = vmov 2102212464   ;;  %v1127_v41 = vor.u32 8388608, %v1126_v26 }
  0xf3   : > { %v1143_v4 = vshrl.u32 %v11779_v36, %v1134_v3  ;;  %v1145_v29 = vshll.u32 %v11779_v36, %v1133_v54  ;;  %v1146_v14 = vshrl.u32 %v11530_v53, %v1134_v3  ;;  %v1148_v5 = vshll.u32 %v11530_v53, %v1133_v54 }
  0xf4   : > { %v225_v49 = vadd.f32 %v7920_v2, %v192_v59  ;;  %v996_v38 = vsel %vm913_vm10, %v995_v11, %v994_v25  ;;  %v1078_v47 = vshll.u32 %v1077_v58, 30  ;;  %v1138_v45 = vor.u32 %v1137_v7, %v1136_v50 }
  0xf5   : > { %vm1151_vm14 = vcmp.lt.s32.totalorder %v1132_v23, 1  ;;  %v999_v0 = vsel %vm8599_vm13, %v8406_v62, %v996_v38  ;;  %v1141_v51 = vor.u32 %v1140_v44, %v1139_v48  ;;  %v1147_v60 = vor.u32 %v1146_v14, %v1145_v29 }
  0xf6   : > { %v11780_v27 = vmov 1326507024   ;;  %7594 = vcosq.f32 %v999_v0  ;;  %v8671_v30 = vsub.s32 %v1075_v35, %v1078_v47  ;;  %v11781_v54 = vmov 683565275  }
  0xf7   : > { %v1149_v26 = vshrl.u32 %v11780_v27, %v1134_v3  ;;  %v1135_v53 = vshrl.u32 %v11781_v54, %v1134_v3  ;;  %v1144_v59 = vor.u32 %v1143_v4, %v1142_v9  ;;  %7596 = vsinq.f32 %v999_v0 }
  0xf8   : > { %vm1153_vm10 = vcmp.lt.s32.totalorder %v1132_v23, 3  ;;  %vm1154_vm0 = vcmp.lt.s32.totalorder %v1132_v23, 4  ;;  %v1081_v50 = vsub.s32 0, %v8671_v30  ;;  %vm1152_vm3 = vcmp.lt.s32.totalorder %v1132_v23, 2 }
  0xf9   : > { %v1150_v20 = vor.u32 %v1149_v26, %v1148_v5  ;;  %v1156_v25 = vsel %vm1154_vm0, %v1144_v59, 2102212464  ;;  %v8675_v52 = vand.u32 3, %v1004_v43  ;;  %v1159_v48 = vsel %vm1151_vm14, %v1138_v45, %v1141_v51 }
  0xfa   : > { %v1160_v7 = vsel %vm1154_vm0, %v1147_v60, 920167782  ;;  %v1167_v44 = vshll.u32 %v1127_v41, 8  ;;  %v7142_v47 = vmin.u32 %v1081_v50, %v8671_v30  ;;  %v1155_v35 = vsel %vm1151_vm14, %v1135_v53, %v1138_v45 }
  0xfb   : > { %v1157_v4 = vsel %vm1153_vm10, %v1141_v51, %v1156_v25  ;;  %v1161_v3 = vsel %vm1153_vm10, %v1144_v59, %v1160_v7  ;;  %v1163_v11 = vsel %vm1151_vm14, %v1141_v51, %v1144_v59  ;;  %v1164_v29 = vsel %vm1154_vm0, %v1150_v20, 1326507024 }
  0xfc   : > { %v1162_v9 = vsel %vm1152_vm3, %v1159_v48, %v1161_v3  ;;  %v8685_v43 = vmul.f32 %v8504_v57, %v225_v49  ;;  %vm1017_vm13 = vcmp.lt.s32.totalorder %v8507_v46, 0  ;;  %v1083_v14 = vclz %v7142_v47 }
  0xfd   : > { %v1101_v41 = vsub.s32 4, %v1077_v58  ;;  %v11783_v5 = vand.u32 2147483647, %v8507_v46  ;;  %v1165_v53 = vsel %vm1153_vm10, %v1147_v60, %v1164_v29  ;;  %vm11747_vm7 = vweird.f32 %v8406_v62 }
  0xfe   : > { %11782 = vst [vmem:[#allocation22_spill] sm:$0xff] %v8685_v43  ;;  %v8695_v38 = vmul.u32.u64.low %v1167_v44, %v1162_v9  ;;  %v8696_v0 = vmul.u32.u64.high %v1167_v44, %v1162_v9, %v8695_v38  ;;  %v7143_v20 = vadd.s32 4294967294, %v1083_v14  ;;  %v1158_v49 = vsel %vm1152_vm3, %v1155_v35, %v1157_v4 }
  0xff   : > { %vm8690_vm5 = vcmp.le.f32.partialorder %v11783_v5, 0.7853982  ;;  %v1166_v51 = vsel %vm1152_vm3, %v1163_v11, %v1165_v53  ;;  %v1226_v26 = vand.u32 2139095040, %v8685_v43  ;;  %vm1006_vm9 = vcmp.lt.s32.totalorder %v8675_v52, 2 }
 0x100   : > { %v8703_v59 = vmul.u32.u64.low %v1167_v44, %v1166_v51  ;;  %v8704_v50 = vmul.u32.u64.high %v1167_v44, %v1166_v51, %v8703_v59  ;;  %v161_v25 = vadd.s32 80, %v7918_v1  ;;  %v1071_v60 = vadd.s32 %v8616_v42, %v8614_v63 }
 0x101   : > { %vm7144_vm11 = vcmp.lt.s32.totalorder %v7143_v20, 0  ;;  %v1102_v48 = vsel %vm1017_vm13, %v1101_v41, %v1077_v58  ;;  %v1227_v7 = vshrl.u32 %v1226_v26, 23  ;;  %vm1007_vm1 = vcmp.eq.s32.totalorder %v8675_v52, 0 }
 0x102   : > { %v1086_v23 = vsel %vm7144_vm11, 0, %v7143_v20  ;;  %v1174_v47 = vmul.u32 %v1167_v44, %v1158_v49  ;;  %v1177_v35 = vadd.s32 1, %v8696_v0  ;;  %vm1010_vm14 = vcmp.eq.s32.totalorder %v8675_v52, 2 }
 0x103   : > { %v1087_v4 = vsub.s32 32, %v1086_v23  ;;  %v1088_v3 = vshll.u32 %v8671_v30, %v1086_v23  ;;  %v1091_v9 = vsub.s32 4294967266, %v1086_v23  ;;  %v7149_v11 = vadd.s32 4294967169, %v1227_v7  ;;  %v8714_v29 = vpop.eup %7594 }
 0x104   : > { %11786 = vst [vmem:[#allocation23_spill] sm:$0xff] %v8714_v29  ;;  %v8719_v63 = vsel %vm8690_vm5, 0, %v1102_v48  ;;  %vm1176_vm10 = vc.u32 %v8704_v50, %v8695_v38  ;;  %v11536_v42 = vand.u32 2147483647, %v8685_v43  ;;  %v8723_v58 = vpop.eup %7596  ;;  %v11534_v44 = vxor.u32 2147483648, %v8714_v29 }
 0x105   : > { %11787 = vst [vmem:[#allocation24_spill] sm:$0xff] %v8719_v63  ;;  %11788 = vst [vmem:[#allocation25_spill] sm:$0xff] %v8723_v58  ;;  %v1089_v14 = vshrl.u32 %v1071_v60, %v1087_v4  ;;  %v1092_v30 = vadd.s32 127, %v1091_v9  ;;  %v1178_v41 = vsel %vm1176_vm10, %v1177_v35, %v8696_v0  ;;  %v11535_v5 = vxor.u32 2147483648, %v8723_v58 }
 0x106   : > { %v1179_v53 = vadd.s32 %v1178_v41, %v1174_v47  ;;  %v1233_v20 = vadd.s32 1, %v7149_v11  ;;  %v193_v49 = vcvt.s32.f32 %v161_v25  ;;  %v1012_v51 = vsel %vm1010_vm14, %v11534_v44, %v8723_v58 }
 0x107   : > { %v1090_v26 = vor.u32 %v1089_v14, %v1088_v3  ;;  %v1093_v59 = vshll.u32 %v1092_v30, 23  ;;  %v1108_v48 = vadd.s32 3, %v8719_v63  ;;  %v1009_v0 = vsel %vm1007_vm1, %v8714_v29, %v11535_v5 }
 0x108   : > { %v1180_v60 = vadd.s32 536870912, %v1179_v53  ;;  %v1230_v7 = vand.u32 8388607, %v11536_v42  ;;  %vm1234_vm0 = vcmp.gt.s32.totalorder %v1233_v20, 0  ;;  %v1013_v25 = vsel %vm1006_vm9, %v1009_v0, %v1012_v51 }
 0x109   : > { %v1094_v23 = vor.u32 4788187, %v1093_v59  ;;  %v1097_v47 = vcvt.s32.f32 %v1090_v26  ;;  %v1235_v35 = vsel %vm1234_vm0, %v1233_v20, 0  ;;  %v1014_v4 = vsel %vm11747_vm7, nan, %v1013_v25 }
 0x10a   : > { %v8743_v3 = vshrl.u32 %v1180_v60, 30  ;;  %v1237_v9 = vand.u32 31, %v1235_v35  ;;  %3621 = vst [vmem:[%s8258_s4 + $0x30] sm:$0xff] %v1014_v4  ;;  %v8746_v14 = vand.u32 3, %v1108_v48  ;;  %v1231_v41 = vor.u32 8388608, %v1230_v7 }
 0x10b   : > { %v1095_v11 = vand.u32 2147483647, %v1094_v23  ;;  %v226_v52 = vadd.f32 %v7920_v2, %v193_v49  ;;  %v1175_v26 = vadd.s32 %v8695_v38, %v8704_v50  ;;  %v1236_v20 = vshrl.u32 %v1235_v35, 5 }
 0x10c   : > { %v1182_v30 = vshll.u32 %v8743_v3, 30  ;;  %v1238_v44 = vsub.s32 32, %v1237_v9  ;;  %v1240_v59 = vshll.u32 %v11781_v54, %v1237_v9  ;;  %v11789_v60 = vmov 2475754826  }
 0x10d   : > { %v1098_v51 = vmul.f32 %v1097_v47, %v1095_v11  ;;  %v1243_v23 = vshll.u32 %v11789_v60, %v1237_v9  ;;  %v1246_v48 = vshll.u32 %v11778_v21, %v1237_v9  ;;  %v1249_v49 = vshll.u32 %v11779_v36, %v1237_v9 }
 0x10e   : > { %v8752_v0 = vsub.s32 %v1179_v53, %v1182_v30  ;;  %v1241_v25 = vshrl.u32 %v11789_v60, %v1238_v44  ;;  %v1244_v7 = vshrl.u32 %v11778_v21, %v1238_v44  ;;  %v1247_v5 = vshrl.u32 %v11779_v36, %v1238_v44 }
 0x10f   : > { %v1099_v4 = vxor.u32 2147483648, %v1098_v51  ;;  %v11790_v50 = vmov 920167782   ;;  %v8762_v35 = vshll.u32 %v1231_v41, 8  ;;  %v8765_v53 = vmul.f32 %v8504_v57, %v226_v52 }
 0x110   : > { %v1185_v38 = vsub.s32 0, %v8752_v0  ;;  %v1250_v47 = vshrl.u32 %v11790_v50, %v1238_v44  ;;  %v1239_v30 = vshrl.u32 %v11781_v54, %v1238_v44  ;;  %v1242_v42 = vor.u32 %v1241_v25, %v1240_v59 }
 0x111   : > { %11791 = vst [vmem:[#allocation26_spill] sm:$0xff] %v8765_v53  ;;  %v1100_v11 = vsel %vm1017_vm13, %v1099_v4, %v1098_v51  ;;  %v1252_v62 = vshll.u32 %v11790_v50, %v1237_v9  ;;  %v1245_v58 = vor.u32 %v1244_v7, %v1243_v23  ;;  %v1248_v41 = vor.u32 %v1247_v5, %v1246_v48 }
 0x112   : > { %v1103_v63 = vsel %vm8690_vm5, %v8507_v46, %v1100_v11  ;;  %v7146_v29 = vmin.u32 %v1185_v38, %v8752_v0  ;;  %v1251_v22 = vor.u32 %v1250_v47, %v1249_v49  ;;  %v1253_v52 = vshrl.u32 %v11780_v27, %v1238_v44 }
 0x113   : > { %7598 = vcosq.f32 %v1103_v63  ;;  %vm1255_vm3 = vcmp.lt.s32.totalorder %v1236_v20, 1  ;;  %v1330_v59 = vand.u32 2139095040, %v8765_v53  ;;  %vm1256_vm13 = vcmp.lt.s32.totalorder %v1236_v20, 2 }
 0x114   : > { %7600 = vsinq.f32 %v1103_v63  ;;  %v1187_v51 = vclz %v7146_v29  ;;  %v1254_v9 = vor.u32 %v1253_v52, %v1252_v62  ;;  %vm1257_vm9 = vcmp.lt.s32.totalorder %v1236_v20, 3 }
 0x115   : > { %vm1258_vm11 = vcmp.lt.s32.totalorder %v1236_v20, 4  ;;  %v1259_v25 = vsel %vm1255_vm3, %v1239_v30, %v1242_v42  ;;  %v1263_v23 = vsel %vm1255_vm3, %v1242_v42, %v1245_v58  ;;  %v1267_v7 = vsel %vm1255_vm3, %v1245_v58, %v1248_v41 }
 0x116   : > { %v7147_v45 = vadd.s32 4294967294, %v1187_v51  ;;  %v1260_v38 = vsel %vm1258_vm11, %v1248_v41, 2102212464  ;;  %v1264_v48 = vsel %vm1258_vm11, %v1251_v22, 920167782  ;;  %v1205_v63 = vsub.s32 4, %v8743_v3 }
 0x117   : > { %v1261_v5 = vsel %vm1257_vm9, %v1245_v58, %v1260_v38  ;;  %v1268_v49 = vsel %vm1258_vm11, %v1254_v9, 1326507024  ;;  %v1265_v29 = vsel %vm1257_vm9, %v1248_v41, %v1264_v48  ;;  %v1331_v38 = vshrl.u32 %v1330_v59, 23 }
 0x118   : > { %vm7148_vm5 = vcmp.lt.s32.totalorder %v7147_v45, 0  ;;  %v1269_v44 = vsel %vm1257_vm9, %v1251_v22, %v1268_v49  ;;  %v1262_v11 = vsel %vm1256_vm13, %v1259_v25, %v1261_v5  ;;  %v1266_v62 = vsel %vm1256_vm13, %v1263_v23, %v1265_v29 }
 0x119   : > { %v1190_v47 = vsel %vm7148_vm5, 0, %v7147_v45  ;;  %v1270_v52 = vsel %vm1256_vm13, %v1267_v7, %v1269_v44  ;;  %v8788_v4 = vmul.u32.u64.low %v8762_v35, %v1266_v62  ;;  %v8789_v41 = vmul.u32.u64.high %v8762_v35, %v1266_v62, %v8788_v4 }
 0x11a   : > { %v1191_v51 = vsub.s32 32, %v1190_v47  ;;  %v1192_v30 = vshll.u32 %v8752_v0, %v1190_v47  ;;  %v1195_v42 = vsub.s32 4294967266, %v1190_v47  ;;  %vm1121_vm1 = vcmp.lt.s32.totalorder %v8569_v13, 0 }
 0x11b   : > { %v8784_v58 = vmul.u32.u64.low %v8762_v35, %v1270_v52  ;;  %v8785_v9 = vmul.u32.u64.high %v8762_v35, %v1270_v52, %v8784_v58  ;;  %v7153_v20 = vadd.s32 4294967169, %v1331_v38  ;;  %vm11746_vm14 = vweird.f32 %v8507_v46 }
 0x11c   : > { %v1193_v22 = vshrl.u32 %v1175_v26, %v1191_v51  ;;  %v1196_v45 = vadd.s32 127, %v1195_v42  ;;  %v11792_v0 = vand.u32 2147483647, %v8569_v13  ;;  %v1206_v25 = vsel %vm1121_vm1, %v1205_v63, %v8743_v3 }
 0x11d   : > { %v162_v23 = vadd.s32 88, %v7918_v1  ;;  %v1278_v26 = vmul.u32 %v8762_v35, %v1262_v11  ;;  %v1337_v7 = vadd.s32 1, %v7153_v20  ;;  %vm1114_vm0 = vcmp.eq.s32.totalorder %v8746_v14, 2 }
 0x11e   : > { %vm8796_vm10 = vcmp.le.f32.partialorder %v11792_v0, 0.7853982  ;;  %v1194_v5 = vor.u32 %v1193_v22, %v1192_v30  ;;  %v1197_v48 = vshll.u32 %v1196_v45, 23  ;;  %vm1280_vm3 = vc.u32 %v8785_v9, %v8788_v4 }
 0x11f   : > { %v1281_v49 = vadd.s32 1, %v8789_v41  ;;  %v11795_v29 = vand.u32 2147483647, %v8765_v53  ;;  %v8815_v62 = vsel %vm8796_vm10, 0, %v1206_v25  ;;  %vm1338_vm13 = vcmp.gt.s32.totalorder %v1337_v7, 0 }
 0x120   : > { %v8811_v47 = vpop.eup %7598  ;;  %v1198_v3 = vor.u32 4788187, %v1197_v48  ;;  %v1201_v63 = vcvt.s32.f32 %v1194_v5  ;;  %11797 = vst [vmem:[#allocation28_spill] sm:$0xff] %v8815_v62  ;;  %vm1111_vm9 = vcmp.eq.s32.totalorder %v8746_v14, 0  ;;  %v1339_v51 = vsel %vm1338_vm13, %v1337_v7, 0 }
 0x121   : > { %v1334_v44 = vand.u32 8388607, %v11795_v29  ;;  %11796 = vst [vmem:[#allocation27_spill] sm:$0xff] %v8811_v47  ;;  %v8817_v35 = vpop.eup %7600  ;;  %v11545_v11 = vxor.u32 2147483648, %v8811_v47  ;;  %v1282_v52 = vsel %vm1280_vm3, %v1281_v49, %v8789_v41  ;;  %vm1110_vm11 = vcmp.lt.s32.totalorder %v8746_v14, 2 }
 0x122   : > { %11798 = vst [vmem:[#allocation29_spill] sm:$0xff] %v8817_v35  ;;  %v11546_v30 = vxor.u32 2147483648, %v8817_v35  ;;  %v1199_v42 = vand.u32 2147483647, %v1198_v3  ;;  %v1283_v38 = vadd.s32 %v1282_v52, %v1278_v26  ;;  %v1212_v22 = vadd.s32 3, %v8815_v62 }
 0x123   : > { %v1116_v58 = vsel %vm1114_vm0, %v11545_v11, %v8817_v35  ;;  %v1341_v45 = vand.u32 31, %v1339_v51  ;;  %v194_v20 = vcvt.s32.f32 %v162_v23  ;;  %v1335_v5 = vor.u32 8388608, %v1334_v44 }
 0x124   : > { %v1113_v41 = vsel %vm1111_vm9, %v8811_v47, %v11546_v30  ;;  %v1202_v0 = vmul.f32 %v1201_v63, %v1199_v42  ;;  %v1284_v25 = vadd.s32 536870912, %v1283_v38  ;;  %v1340_v26 = vshrl.u32 %v1339_v51, 5 }
 0x125   : > { %v1117_v48 = vsel %vm1110_vm11, %v1113_v41, %v1116_v58  ;;  %v1342_v7 = vsub.s32 32, %v1341_v45  ;;  %v1344_v49 = vshll.u32 %v11781_v54, %v1341_v45  ;;  %v1347_v52 = vshll.u32 %v11789_v60, %v1341_v45 }
 0x126   : > { %v1118_v14 = vsel %vm11746_vm14, nan, %v1117_v48  ;;  %v1203_v29 = vxor.u32 2147483648, %v1202_v0  ;;  %v1285_v3 = vshrl.u32 %v1284_v25, 30  ;;  %v1350_v63 = vshll.u32 %v11778_v21, %v1341_v45 }
 0x127   : > { %3622 = vst [vmem:[%s8258_s4 + $0x38] sm:$0xff] %v1118_v14  ;;  %v1345_v23 = vshrl.u32 %v11789_v60, %v1342_v7  ;;  %v1348_v11 = vshrl.u32 %v11778_v21, %v1342_v7  ;;  %v1351_v44 = vshrl.u32 %v11779_v36, %v1342_v7  ;;  %v1353_v58 = vshll.u32 %v11779_v36, %v1341_v45 }
 0x128   : > { %v1204_v51 = vsel %vm1121_vm1, %v1203_v29, %v1202_v0  ;;  %v1286_v42 = vshll.u32 %v1285_v3, 30  ;;  %v227_v41 = vadd.f32 %v7920_v2, %v194_v20  ;;  %v1343_v48 = vshrl.u32 %v11781_v54, %v1342_v7 }
 0x129   : > { %v1207_v25 = vsel %vm8796_vm10, %v8569_v13, %v1204_v51  ;;  %v1346_v14 = vor.u32 %v1345_v23, %v1344_v49  ;;  %vm1359_vm5 = vcmp.lt.s32.totalorder %v1340_v26, 1  ;;  %v1349_v46 = vor.u32 %v1348_v11, %v1347_v52 }
 0x12a   : > { %7602 = vcosq.f32 %v1207_v25  ;;  %v8850_v30 = vsub.s32 %v1283_v38, %v1286_v42  ;;  %v1354_v47 = vshrl.u32 %v11790_v50, %v1342_v7  ;;  %v1352_v0 = vor.u32 %v1351_v44, %v1350_v63 }
 0x12b   : > { %7604 = vsinq.f32 %v1207_v25  ;;  %v1356_v29 = vshll.u32 %v11790_v50, %v1341_v45  ;;  %v1357_v20 = vshrl.u32 %v11780_v27, %v1342_v7  ;;  %vm1225_vm1 = vcmp.lt.s32.totalorder %v8685_v43, 0 }
 0x12c   : > { %v1289_v59 = vsub.s32 0, %v8850_v30  ;;  %v1355_v51 = vor.u32 %v1354_v47, %v1353_v58  ;;  %v1375_v35 = vshll.u32 %v1335_v5, 8  ;;  %v8858_v49 = vmul.f32 %v8504_v57, %v227_v41 }
 0x12d   : > { %v1358_v38 = vor.u32 %v1357_v20, %v1356_v29  ;;  %vm1360_vm10 = vcmp.lt.s32.totalorder %v1340_v26, 2  ;;  %vm1361_vm0 = vcmp.lt.s32.totalorder %v1340_v26, 3  ;;  %vm1362_vm3 = vcmp.lt.s32.totalorder %v1340_v26, 4 }
 0x12e   : > { %11799 = vst [vmem:[#allocation30_spill] sm:$0xff] %v8858_v49  ;;  %v7150_v11 = vmin.u32 %v1289_v59, %v8850_v30  ;;  %v1363_v52 = vsel %vm1359_vm5, %v1343_v48, %v1346_v14  ;;  %v1364_v45 = vsel %vm1362_vm3, %v1352_v0, 2102212464  ;;  %v1367_v7 = vsel %vm1359_vm5, %v1346_v14, %v1349_v46 }
 0x12f   : > { %v1365_v23 = vsel %vm1361_vm0, %v1349_v46, %v1364_v45  ;;  %v1368_v63 = vsel %vm1362_vm3, %v1355_v51, 920167782  ;;  %v1371_v47 = vsel %vm1359_vm5, %v1349_v46, %v1352_v0  ;;  %v1372_v5 = vsel %vm1362_vm3, %v1358_v38, 1326507024 }
 0x130   : > { %v1213_v44 = vand.u32 3, %v1212_v22  ;;  %v11800_v42 = vand.u32 2147483647, %v8685_v43  ;;  %v1291_v41 = vclz %v7150_v11  ;;  %v163_v25 = vadd.s32 96, %v7918_v1 }
 0x131   : > { %v1309_v48 = vsub.s32 4, %v1285_v3  ;;  %v1369_v29 = vsel %vm1361_vm0, %v1352_v0, %v1368_v63  ;;  %v1373_v14 = vsel %vm1361_vm0, %v1355_v51, %v1372_v5  ;;  %v1434_v20 = vand.u32 2139095040, %v8858_v49 }
 0x132   : > { %vm8867_vm13 = vcmp.le.f32.partialorder %v11800_v42, 0.7853982  ;;  %vm11567_vm9 = vweird.f32 %v8569_v13  ;;  %v7151_v46 = vadd.s32 4294967294, %v1291_v41  ;;  %v1366_v22 = vsel %vm1360_vm10, %v1363_v52, %v1365_v23 }
 0x133   : > { %v1370_v59 = vsel %vm1360_vm10, %v1367_v7, %v1369_v29  ;;  %v1374_v38 = vsel %vm1360_vm10, %v1371_v47, %v1373_v14  ;;  %vm1214_vm11 = vcmp.lt.s32.totalorder %v1213_v44, 2  ;;  %v1279_v0 = vadd.s32 %v8788_v4, %v8785_v9 }
 0x134   : > { %v8879_v45 = vmul.u32.u64.low %v1375_v35, %v1374_v38  ;;  %v8880_v11 = vmul.u32.u64.high %v1375_v35, %v1374_v38, %v8879_v45  ;;  %v8882_v42 = vmul.u32.u64.low %v1375_v35, %v1370_v59  ;;  %v8883_v62 = vmul.u32.u64.high %v1375_v35, %v1370_v59, %v8882_v42 }
 0x135   : > { %vm7152_vm5 = vcmp.lt.s32.totalorder %v7151_v46, 0  ;;  %v1435_v51 = vshrl.u32 %v1434_v20, 23  ;;  %vm1215_vm0 = vcmp.eq.s32.totalorder %v1213_v44, 0  ;;  %v1310_v52 = vsel %vm1225_vm1, %v1309_v48, %v1285_v3 }
 0x136   : > { %v1294_v63 = vsel %vm7152_vm5, 0, %v7151_v46  ;;  %v1382_v26 = vmul.u32 %v1375_v35, %v1366_v22  ;;  %vm1218_vm10 = vcmp.eq.s32.totalorder %v1213_v44, 2  ;;  %vm1384_vm3 = vc.u32 %v8880_v11, %v8882_v42 }
 0x137   : > { %v1295_v7 = vsub.s32 32, %v1294_v63  ;;  %v1296_v23 = vshll.u32 %v8850_v30, %v1294_v63  ;;  %v1299_v47 = vsub.s32 4294967266, %v1294_v63  ;;  %v7157_v5 = vadd.s32 4294967169, %v1435_v51  ;;  %v8891_v41 = vpop.eup %7602 }
 0x138   : > { %11803 = vst [vmem:[#allocation31_spill] sm:$0xff] %v8891_v41  ;;  %v1385_v4 = vadd.s32 1, %v8883_v62  ;;  %v195_v9 = vcvt.s32.f32 %v163_v25  ;;  %v8896_v29 = vpop.eup %7604  ;;  %v11553_v14 = vxor.u32 2147483648, %v8891_v41  ;;  %v8902_v20 = vsel %vm8867_vm13, 0, %v1310_v52 }
 0x139   : > { %11804 = vst [vmem:[#allocation32_spill] sm:$0xff] %v8896_v29  ;;  %v1297_v3 = vshrl.u32 %v1279_v0, %v1295_v7  ;;  %v1300_v35 = vadd.s32 127, %v1299_v47  ;;  %v1441_v48 = vadd.s32 1, %v7157_v5  ;;  %v11554_v30 = vxor.u32 2147483648, %v8896_v29  ;;  %11805 = vst [vmem:[#allocation33_spill] sm:$0xff] %v8902_v20 }
 0x13a   : > { %v1386_v46 = vsel %vm1384_vm3, %v1385_v4, %v8883_v62  ;;  %v11555_v22 = vand.u32 2147483647, %v8858_v49  ;;  %v1220_v25 = vsel %vm1218_vm10, %v11553_v14, %v8896_v29  ;;  %v228_v51 = vadd.f32 %v7920_v2, %v195_v9 }
 0x13b   : > { %v1298_v59 = vor.u32 %v1297_v3, %v1296_v23  ;;  %v1301_v38 = vshll.u32 %v1300_v35, 23  ;;  %v1387_v45 = vadd.s32 %v1386_v46, %v1382_v26  ;;  %v1217_v0 = vsel %vm1215_vm0, %v8891_v41, %v11554_v30 }
 0x13c   : > { %vm1442_vm5 = vcmp.gt.s32.totalorder %v1441_v48, 0  ;;  %v1221_v62 = vsel %vm1214_vm11, %v1217_v0, %v1220_v25  ;;  %v1316_v23 = vadd.s32 3, %v8902_v20  ;;  %v1438_v26 = vand.u32 8388607, %v11555_v22 }
 0x13d   : > { %v1302_v63 = vor.u32 4788187, %v1301_v38  ;;  %v1305_v52 = vcvt.s32.f32 %v1298_v59  ;;  %v1388_v7 = vadd.s32 536870912, %v1387_v45  ;;  %v1222_v47 = vsel %vm11567_vm9, nan, %v1221_v62 }
 0x13e   : > { %v1443_v5 = vsel %vm1442_vm5, %v1441_v48, 0  ;;  %3623 = vst [vmem:[%s8258_s4 + $0x40] sm:$0xff] %v1222_v47  ;;  %v8924_v44 = vadd.s32 104, %v7918_v1  ;;  %v8927_v9 = vadd.s32 112, %v7918_v1  ;;  %v8931_v38 = vmul.f32 %v8504_v57, %v228_v51 }
 0x13f   : > { %v1303_v4 = vand.u32 2147483647, %v1302_v63  ;;  %v8921_v3 = vshrl.u32 %v1388_v7, 30  ;;  %v1445_v35 = vand.u32 31, %v1443_v5  ;;  %v8933_v0 = vand.u32 3, %v1316_v23 }
 0x140   : > { %11806 = vst [vmem:[#allocation34_spill] sm:$0xff] %v8931_v38  ;;  %v1439_v48 = vor.u32 8388608, %v1438_v26  ;;  %v1383_v39 = vadd.s32 %v8882_v42, %v8880_v11  ;;  %vm1329_vm10 = vcmp.lt.s32.totalorder %v8765_v53, 0 }
 0x141   : > { %v1306_v46 = vmul.f32 %v1305_v52, %v1303_v4  ;;  %v1390_v25 = vshll.u32 %v8921_v3, 30  ;;  %v1446_v59 = vsub.s32 32, %v1445_v35  ;;  %v1448_v62 = vshll.u32 %v11781_v54, %v1445_v35 }
 0x142   : > { %v1451_v63 = vshll.u32 %v11789_v60, %v1445_v35  ;;  %v1454_v14 = vshll.u32 %v11778_v21, %v1445_v35  ;;  %v1457_v52 = vshll.u32 %v11779_v36, %v1445_v35  ;;  %v1444_v4 = vshrl.u32 %v1443_v5, 5 }
 0x143   : > { %v1307_v7 = vxor.u32 2147483648, %v1306_v46  ;;  %v8937_v47 = vsub.s32 %v1387_v45, %v1390_v25  ;;  %v1449_v30 = vshrl.u32 %v11789_v60, %v1446_v59  ;;  %v1452_v57 = vshrl.u32 %v11778_v21, %v1446_v59 }
 0x144   : > { %v1455_v51 = vshrl.u32 %v11779_v36, %v1446_v59  ;;  %v1458_v22 = vshrl.u32 %v11790_v50, %v1446_v59  ;;  %v1538_v45 = vand.u32 2139095040, %v8931_v38  ;;  %v1447_v5 = vshrl.u32 %v11781_v54, %v1446_v59 }
 0x145   : > { %v1308_v23 = vsel %vm1225_vm1, %v1307_v7, %v1306_v46  ;;  %v1393_v26 = vsub.s32 0, %v8937_v47  ;;  %v1450_v13 = vor.u32 %v1449_v30, %v1448_v62  ;;  %v1453_v41 = vor.u32 %v1452_v57, %v1451_v63 }
 0x146   : > { %v1311_v25 = vsel %vm8867_vm13, %v8685_v43, %v1308_v23  ;;  %v1456_v20 = vor.u32 %v1455_v51, %v1454_v14  ;;  %v1459_v34 = vor.u32 %v1458_v22, %v1457_v52  ;;  %v1460_v46 = vshll.u32 %v11790_v50, %v1445_v35 }
 0x147   : > { %7606 = vcosq.f32 %v1311_v25  ;;  %v7154_v29 = vmin.u32 %v1393_v26, %v8937_v47  ;;  %v1461_v7 = vshrl.u32 %v11780_v27, %v1446_v59  ;;  %vm1463_vm1 = vcmp.lt.s32.totalorder %v1444_v4, 1 }
 0x148   : > { %7608 = vsinq.f32 %v1311_v25  ;;  %v8958_v23 = vshll.u32 %v1439_v48, 8  ;;  %v1539_v32 = vshrl.u32 %v1538_v45, 23  ;;  %vm1464_vm13 = vcmp.lt.s32.totalorder %v1444_v4, 2 }
 0x149   : > { %v1395_v58 = vclz %v7154_v29  ;;  %v1462_v30 = vor.u32 %v1461_v7, %v1460_v46  ;;  %vm1465_vm11 = vcmp.lt.s32.totalorder %v1444_v4, 3  ;;  %vm1466_vm0 = vcmp.lt.s32.totalorder %v1444_v4, 4 }
 0x14a   : > { %v1467_v22 = vsel %vm1463_vm1, %v1447_v5, %v1450_v13  ;;  %v1468_v35 = vsel %vm1466_vm0, %v1456_v20, 2102212464  ;;  %v1471_v59 = vsel %vm1463_vm1, %v1450_v13, %v1453_v41  ;;  %v1472_v63 = vsel %vm1466_vm0, %v1459_v34, 920167782 }
 0x14b   : > { %v7155_v14 = vadd.s32 4294967294, %v1395_v58  ;;  %v1469_v62 = vsel %vm1465_vm11, %v1453_v41, %v1468_v35  ;;  %v1475_v11 = vsel %vm1463_vm1, %v1453_v41, %v1456_v20  ;;  %v1476_v42 = vsel %vm1466_vm0, %v1462_v30, 1326507024 }
 0x14c   : > { %v1413_v29 = vsub.s32 4, %v8921_v3  ;;  %v1473_v48 = vsel %vm1465_vm11, %v1456_v20, %v1472_v63  ;;  %v1477_v52 = vsel %vm1465_vm11, %v1459_v34, %v1476_v42  ;;  %v11807_v57 = vand.u32 2147483647, %v8765_v53 }
 0x14d   : > { %vm7156_vm3 = vcmp.lt.s32.totalorder %v7155_v14, 0  ;;  %v1470_v45 = vsel %vm1464_vm13, %v1467_v22, %v1469_v62  ;;  %v1474_v13 = vsel %vm1464_vm13, %v1471_v59, %v1473_v48  ;;  %v1478_v25 = vsel %vm1464_vm13, %v1475_v11, %v1477_v52 }
 0x14e   : > { %vm8967_vm5 = vcmp.le.f32.partialorder %v11807_v57, 0.7853982  ;;  %v1398_v26 = vsel %vm7156_vm3, 0, %v7155_v14  ;;  %vm11589_vm1 = vweird.f32 %v8685_v43  ;;  %v7161_v34 = vadd.s32 4294967169, %v1539_v32 }
 0x14f   : > { %v1399_v41 = vsub.s32 32, %v1398_v26  ;;  %v1400_v5 = vshll.u32 %v8937_v47, %v1398_v26  ;;  %v1403_v20 = vsub.s32 4294967266, %v1398_v26  ;;  %v11570_v4 = vand.u32 2147483647, %v8931_v38 }
 0x150   : > { %v8977_v46 = vmul.u32.u64.low %v8958_v23, %v1478_v25  ;;  %v8978_v7 = vmul.u32.u64.high %v8958_v23, %v1478_v25, %v8977_v46  ;;  %v8981_v58 = vmul.u32.u64.low %v8958_v23, %v1474_v13  ;;  %v8982_v30 = vmul.u32.u64.high %v8958_v23, %v1474_v13, %v8981_v58 }
 0x151   : > { %v1401_v14 = vshrl.u32 %v1383_v39, %v1399_v41  ;;  %v1404_v22 = vadd.s32 127, %v1403_v20  ;;  %v1545_v35 = vadd.s32 1, %v7161_v34  ;;  %vm1318_vm13 = vcmp.lt.s32.totalorder %v8933_v0, 2 }
 0x152   : > { %vm1319_vm11 = vcmp.eq.s32.totalorder %v8933_v0, 0  ;;  %vm1322_vm0 = vcmp.eq.s32.totalorder %v8933_v0, 2  ;;  %v196_v32 = vcvt.s32.f32 %v8924_v44  ;;  %v1486_v62 = vmul.u32 %v8958_v23, %v1470_v45 }
 0x153   : > { %v1402_v47 = vor.u32 %v1401_v14, %v1400_v5  ;;  %v1405_v59 = vshll.u32 %v1404_v22, 23  ;;  %vm1546_vm3 = vcmp.gt.s32.totalorder %v1545_v35, 0  ;;  %v1414_v39 = vsel %vm1329_vm10, %v1413_v29, %v8921_v3 }
 0x154   : > { %v8991_v63 = vpop.eup %7606  ;;  %vm1488_vm9 = vc.u32 %v8978_v7, %v8981_v58  ;;  %v1489_v11 = vadd.s32 1, %v8982_v30  ;;  %v1547_v42 = vsel %vm1546_vm3, %v1545_v35, 0  ;;  %v1542_v23 = vand.u32 8388607, %v11570_v4 }
 0x155   : > { %11810 = vst [vmem:[#allocation35_spill] sm:$0xff] %v8991_v63  ;;  %v8999_v48 = vpop.eup %7608  ;;  %v11568_v44 = vxor.u32 2147483648, %v8991_v63  ;;  %v1406_v52 = vor.u32 4788187, %v1405_v59  ;;  %v1409_v57 = vcvt.s32.f32 %v1402_v47  ;;  %v1549_v3 = vand.u32 31, %v1547_v42 }
 0x156   : > { %11811 = vst [vmem:[#allocation36_spill] sm:$0xff] %v8999_v48  ;;  %v11569_v26 = vxor.u32 2147483648, %v8999_v48  ;;  %v1490_v45 = vsel %vm1488_vm9, %v1489_v11, %v8982_v30  ;;  %v229_v29 = vadd.f32 %v7920_v2, %v196_v32  ;;  %v9014_v41 = vsel %vm8967_vm5, 0, %v1414_v39 }
 0x157   : > { %v1324_v13 = vsel %vm1322_vm0, %v11568_v44, %v8999_v48  ;;  %v1407_v25 = vand.u32 2147483647, %v1406_v52  ;;  %11812 = vst [vmem:[#allocation37_spill] sm:$0xff] %v9014_v41  ;;  %v1491_v5 = vadd.s32 %v1490_v45, %v1486_v62  ;;  %v9021_v34 = vshrl.u32 %v1547_v42, 5 }
 0x158   : > { %v1321_v20 = vsel %vm1319_vm11, %v8991_v63, %v11569_v26  ;;  %v1550_v46 = vsub.s32 32, %v1549_v3  ;;  %v1552_v30 = vshll.u32 %v11781_v54, %v1549_v3  ;;  %v1555_v32 = vshll.u32 %v11789_v60, %v1549_v3 }
 0x159   : > { %v1325_v14 = vsel %vm1318_vm13, %v1321_v20, %v1324_v13  ;;  %v1410_v22 = vmul.f32 %v1409_v57, %v1407_v25  ;;  %v1492_v35 = vadd.s32 536870912, %v1491_v5  ;;  %v1558_v39 = vshll.u32 %v11778_v21, %v1549_v3 }
 0x15a   : > { %v1326_v47 = vsel %vm11589_vm1, nan, %v1325_v14  ;;  %v1553_v59 = vshrl.u32 %v11789_v60, %v1550_v46  ;;  %v1556_v62 = vshrl.u32 %v11778_v21, %v1550_v46  ;;  %v1559_v52 = vshrl.u32 %v11779_v36, %v1550_v46 }
 0x15b   : > { %3624 = vst [vmem:[%s8258_s4 + $0x48] sm:$0xff] %v1326_v47  ;;  %v1411_v11 = vxor.u32 2147483648, %v1410_v22  ;;  %v1493_v42 = vshrl.u32 %v1492_v35, 30  ;;  %v1561_v0 = vshll.u32 %v11779_v36, %v1549_v3  ;;  %v1420_v57 = vadd.s32 3, %v9014_v41 }
 0x15c   : > { %v1543_v45 = vor.u32 8388608, %v1542_v23  ;;  %v1562_v13 = vshrl.u32 %v11790_v50, %v1550_v46  ;;  %v1564_v25 = vshll.u32 %v11790_v50, %v1549_v3  ;;  %v1554_v44 = vor.u32 %v1553_v59, %v1552_v30 }
 0x15d   : > { %v1412_v20 = vsel %vm1329_vm10, %v1411_v11, %v1410_v22  ;;  %v1494_v14 = vshll.u32 %v1493_v42, 30  ;;  %vm1567_vm9 = vcmp.lt.s32.totalorder %v9021_v34, 1  ;;  %v1557_v47 = vor.u32 %v1556_v62, %v1555_v32 }
 0x15e   : > { %v1415_v35 = vsel %vm8967_vm5, %v8765_v53, %v1412_v20  ;;  %v1563_v26 = vor.u32 %v1562_v13, %v1561_v0  ;;  %v1565_v4 = vshrl.u32 %v11780_v27, %v1550_v46  ;;  %v1551_v3 = vshrl.u32 %v11781_v54, %v1550_v46 }
 0x15f   : > { %7610 = vcosq.f32 %v1415_v35  ;;  %v9045_v23 = vsub.s32 %v1491_v5, %v1494_v14  ;;  %v1560_v41 = vor.u32 %v1559_v52, %v1558_v39  ;;  %vm1569_vm10 = vcmp.lt.s32.totalorder %v9021_v34, 3  ;;  %v9065_v52 = vld [vmem:[#allocation2] ss:$0 sm:$0xff] }
 0x160   : > { %7612 = vsinq.f32 %v1415_v35  ;;  %v1566_v22 = vor.u32 %v1565_v4, %v1564_v25  ;;  %vm1570_vm13 = vcmp.lt.s32.totalorder %v9021_v34, 4  ;;  %v9050_v30 = vand.u32 3, %v1420_v57 }
 0x161   : > { %v1497_v51 = vsub.s32 0, %v9045_v23  ;;  %vm1568_vm5 = vcmp.lt.s32.totalorder %v9021_v34, 2  ;;  %v1572_v32 = vsel %vm1570_vm13, %v1560_v41, 2102212464  ;;  %v1517_v5 = vsub.s32 4, %v1493_v42 }
 0x162   : > { %v1575_v46 = vsel %vm1567_vm9, %v1554_v44, %v1557_v47  ;;  %v1576_v4 = vsel %vm1570_vm13, %v1563_v26, 920167782  ;;  %v1583_v59 = vshll.u32 %v1543_v45, 8  ;;  %v1571_v39 = vsel %vm1567_vm9, %v1551_v3, %v1554_v44 }
 0x163   : > { %v7158_v62 = vmin.u32 %v1497_v51, %v9045_v23  ;;  %v1577_v11 = vsel %vm1569_vm10, %v1560_v41, %v1576_v4  ;;  %v9068_v0 = vmul.f32 %v9065_v52, %v229_v29  ;;  %v1573_v57 = vsel %vm1569_vm10, %v1557_v47, %v1572_v32 }
 0x164   : > { %v1578_v13 = vsel %vm1568_vm5, %v1575_v46, %v1577_v11  ;;  %v1579_v45 = vsel %vm1567_vm9, %v1557_v47, %v1560_v41  ;;  %v1580_v44 = vsel %vm1570_vm13, %v1566_v22, 1326507024  ;;  %v11814_v25 = vand.u32 2147483647, %v8858_v49 }
 0x165   : > { %11813 = vst [vmem:[#allocation38_spill] sm:$0xff] %v9068_v0  ;;  %vm1433_vm0 = vcmp.lt.s32.totalorder %v8858_v49, 0  ;;  %v1499_v29 = vclz %v7158_v62  ;;  %v197_v14 = vcvt.s32.f32 %v8927_v9  ;;  %v1581_v41 = vsel %vm1569_vm10, %v1563_v26, %v1580_v44 }
 0x166   : > { %vm9080_vm11 = vcmp.le.f32.partialorder %v11814_v25, 0.7853982  ;;  %v1518_v35 = vsel %vm1433_vm0, %v1517_v5, %v1493_v42  ;;  %v9090_v47 = vmul.u32.u64.low %v1583_v59, %v1578_v13  ;;  %v9091_v3 = vmul.u32.u64.high %v1583_v59, %v1578_v13, %v9090_v47 }
 0x167   : > { %vm11588_vm3 = vweird.f32 %v8765_v53  ;;  %v7159_v22 = vadd.s32 4294967294, %v1499_v29  ;;  %v1574_v51 = vsel %vm1568_vm5, %v1571_v39, %v1573_v57  ;;  %v1582_v32 = vsel %vm1568_vm5, %v1579_v45, %v1581_v41 }
 0x168   : > { %v1642_v9 = vand.u32 2139095040, %v9068_v0  ;;  %vm1422_vm9 = vcmp.lt.s32.totalorder %v9050_v30, 2  ;;  %v9100_v42 = vmul.u32.u64.low %v1583_v59, %v1582_v32  ;;  %v9101_v5 = vmul.u32.u64.high %v1583_v59, %v1582_v32, %v9100_v42 }
 0x169   : > { %v11574_v26 = vand.u32 2147483647, %v9068_v0  ;;  %v1487_v46 = vadd.s32 %v8981_v58, %v8978_v7  ;;  %vm7160_vm10 = vcmp.lt.s32.totalorder %v7159_v22, 0  ;;  %v230_v62 = vadd.f32 %v7920_v2, %v197_v14 }
 0x16a   : > { %v1643_v4 = vshrl.u32 %v1642_v9, 23  ;;  %v1502_v39 = vsel %vm7160_vm10, 0, %v7159_v22  ;;  %v9109_v34 = vsel %vm9080_vm11, 0, %v1518_v35  ;;  %v1590_v11 = vmul.u32 %v1583_v59, %v1574_v51 }
 0x16b   : > { %11817 = vst [vmem:[#allocation39_spill] sm:$0xff] %v9109_v34  ;;  %v1593_v57 = vadd.s32 1, %v9091_v3  ;;  %v1503_v13 = vsub.s32 32, %v1502_v39  ;;  %v1504_v45 = vshll.u32 %v9045_v23, %v1502_v39  ;;  %v1507_v44 = vsub.s32 4294967266, %v1502_v39 }
 0x16c   : > { %v7165_v25 = vadd.s32 4294967169, %v1643_v4  ;;  %v9113_v29 = vpop.eup %7610  ;;  %vm1423_vm13 = vcmp.eq.s32.totalorder %v9050_v30, 0  ;;  %vm1426_vm5 = vcmp.eq.s32.totalorder %v9050_v30, 2  ;;  %vm1592_vm10 = vc.u32 %v9101_v5, %v9090_v47 }
 0x16d   : > { %11818 = vst [vmem:[#allocation40_spill] sm:$0xff] %v9113_v29  ;;  %v1646_v7 = vand.u32 8388607, %v11574_v26  ;;  %v9120_v58 = vpop.eup %7612  ;;  %v11572_v59 = vxor.u32 2147483648, %v9113_v29  ;;  %v1505_v14 = vshrl.u32 %v1487_v46, %v1503_v13  ;;  %v1508_v35 = vadd.s32 127, %v1507_v44 }
 0x16e   : > { %11819 = vst [vmem:[#allocation41_spill] sm:$0xff] %v9120_v58  ;;  %v1594_v23 = vsel %vm1592_vm10, %v1593_v57, %v9091_v3  ;;  %v11573_v41 = vxor.u32 2147483648, %v9120_v58  ;;  %v1524_v22 = vadd.s32 3, %v9109_v34  ;;  %v1649_v32 = vadd.s32 1, %v7165_v25 }
 0x16f   : > { %v1595_v51 = vadd.s32 %v1594_v23, %v1590_v11  ;;  %v1428_v9 = vsel %vm1426_vm5, %v11572_v59, %v9120_v58  ;;  %v1506_v42 = vor.u32 %v1505_v14, %v1504_v45  ;;  %v1509_v4 = vshll.u32 %v1508_v35, 23 }
 0x170   : > { %v9130_v39 = vmul.f32 %v9065_v52, %v230_v62  ;;  %v1425_v3 = vsel %vm1423_vm13, %v9113_v29, %v11573_v41  ;;  %v1647_v57 = vor.u32 8388608, %v1646_v7  ;;  %vm1650_vm10 = vcmp.gt.s32.totalorder %v1649_v32, 0 }
 0x171   : > { %v1596_v46 = vadd.s32 536870912, %v1595_v51  ;;  %v1429_v11 = vsel %vm1422_vm9, %v1425_v3, %v1428_v9  ;;  %v1510_v13 = vor.u32 4788187, %v1509_v4  ;;  %v1513_v44 = vcvt.s32.f32 %v1506_v42 }
 0x172   : > { %11820 = vst [vmem:[#allocation42_spill] sm:$0xff] %v9130_v39  ;;  %v1651_v25 = vsel %vm1650_vm10, %v1649_v32, 0  ;;  %v1430_v45 = vsel %vm11588_vm3, nan, %v1429_v11  ;;  %v9142_v35 = vadd.s32 120, %v7918_v1  ;;  %v9145_v59 = vand.u32 3, %v1524_v22 }
 0x173   : > { %v1597_v62 = vshrl.u32 %v1596_v46, 30  ;;  %v1653_v14 = vand.u32 31, %v1651_v25  ;;  %3625 = vst [vmem:[%s8258_s4 + $0x50] sm:$0xff] %v1430_v45  ;;  %v1511_v23 = vand.u32 2147483647, %v1510_v13  ;;  %v9149_v30 = vadd.s32 128, %v7918_v1 }
 0x174   : > { %v11587_v7 = vand.u32 2147483647, %v9130_v39  ;;  %v9152_v9 = vadd.s32 %v9090_v47, %v9101_v5  ;;  %v1746_v4 = vand.u32 2139095040, %v9130_v39  ;;  %v1652_v46 = vshrl.u32 %v1651_v25, 5 }
 0x175   : > { %v1598_v32 = vshll.u32 %v1597_v62, 30  ;;  %v1654_v42 = vsub.s32 32, %v1653_v14  ;;  %v1514_v3 = vmul.f32 %v1513_v44, %v1511_v23  ;;  %v1656_v11 = vshll.u32 %v11781_v54, %v1653_v14 }
 0x176   : > { %v9156_v45 = vshll.u32 %v1647_v57, 8  ;;  %v1659_v41 = vshll.u32 %v11789_v60, %v1653_v14  ;;  %v1662_v26 = vshll.u32 %v11778_v21, %v1653_v14  ;;  %vm1537_vm9 = vcmp.lt.s32.totalorder %v8931_v38, 0 }
 0x177   : > { %v9158_v22 = vsub.s32 %v1595_v51, %v1598_v32  ;;  %v1657_v13 = vshrl.u32 %v11789_v60, %v1654_v42  ;;  %v1515_v47 = vxor.u32 2147483648, %v1514_v3  ;;  %v1660_v5 = vshrl.u32 %v11778_v21, %v1654_v42 }
 0x178   : > { %v1663_v44 = vshrl.u32 %v11779_v36, %v1654_v42  ;;  %v1665_v25 = vshll.u32 %v11779_v36, %v1653_v14  ;;  %v1666_v51 = vshrl.u32 %v11790_v50, %v1654_v42  ;;  %v1747_v23 = vshrl.u32 %v1746_v4, 23 }
 0x179   : > { %v1601_v57 = vsub.s32 0, %v9158_v22  ;;  %v9171_v32 = vand.u32 8388607, %v11587_v7  ;;  %v1516_v53 = vsel %vm1433_vm0, %v1515_v47, %v1514_v3  ;;  %v1655_v29 = vshrl.u32 %v11781_v54, %v1654_v42 }
 0x17a   : > { %v1658_v58 = vor.u32 %v1657_v13, %v1656_v11  ;;  %v1668_v34 = vshll.u32 %v11790_v50, %v1653_v14  ;;  %v1519_v43 = vsel %vm9080_vm11, %v8858_v49, %v1516_v53  ;;  %v1661_v48 = vor.u32 %v1660_v5, %v1659_v41 }
 0x17b   : > { %v7162_v63 = vmin.u32 %v1601_v57, %v9158_v22  ;;  %v1664_v4 = vor.u32 %v1663_v44, %v1662_v26  ;;  %7614 = vcosq.f32 %v1519_v43  ;;  %v1667_v8 = vor.u32 %v1666_v51, %v1665_v25 }
 0x17c   : > { %v1669_v7 = vshrl.u32 %v11780_v27, %v1654_v42  ;;  %vm1671_vm13 = vcmp.lt.s32.totalorder %v1652_v46, 1  ;;  %7616 = vsinq.f32 %v1519_v43  ;;  %v11821_v3 = vand.u32 2147483647, %v8931_v38 }
 0x17d   : > { %v1603_v14 = vclz %v7162_v63  ;;  %v1621_v13 = vsub.s32 4, %v1597_v62  ;;  %v7169_v20 = vadd.s32 4294967169, %v1747_v23  ;;  %vm1672_vm11 = vcmp.lt.s32.totalorder %v1652_v46, 2 }
 0x17e   : > { %vm9184_vm0 = vcmp.le.f32.partialorder %v11821_v3, 0.7853982  ;;  %v1670_v53 = vor.u32 %v1669_v7, %v1668_v34  ;;  %vm1673_vm5 = vcmp.lt.s32.totalorder %v1652_v46, 3  ;;  %vm1674_vm10 = vcmp.lt.s32.totalorder %v1652_v46, 4 }
 0x17f   : > { %v7163_v26 = vadd.s32 4294967294, %v1603_v14  ;;  %v1675_v41 = vsel %vm1671_vm13, %v1655_v29, %v1658_v58  ;;  %v1676_v47 = vsel %vm1674_vm10, %v1664_v4, 2102212464  ;;  %v1679_v42 = vsel %vm1671_vm13, %v1658_v58, %v1661_v48 }
 0x180   : > { %v1677_v43 = vsel %vm1673_vm5, %v1661_v48, %v1676_v47  ;;  %v1680_v5 = vsel %vm1674_vm10, %v1667_v8, 920167782  ;;  %v1683_v44 = vsel %vm1671_vm13, %v1661_v48, %v1664_v4  ;;  %v1684_v25 = vsel %vm1674_vm10, %v1670_v53, 1326507024 }
 0x181   : > { %vm7164_vm3 = vcmp.lt.s32.totalorder %v7163_v26, 0  ;;  %v1622_v63 = vsel %vm1537_vm9, %v1621_v13, %v1597_v62  ;;  %v1681_v57 = vsel %vm1673_vm5, %v1664_v4, %v1680_v5  ;;  %v1685_v34 = vsel %vm1673_vm5, %v1667_v8, %v1684_v25 }
 0x182   : > { %v1606_v7 = vsel %vm7164_vm3, 0, %v7163_v26  ;;  %v1678_v51 = vsel %vm1672_vm11, %v1675_v41, %v1677_v43  ;;  %v1682_v23 = vsel %vm1672_vm11, %v1679_v42, %v1681_v57  ;;  %v1686_v29 = vsel %vm1672_vm11, %v1683_v44, %v1685_v34 }
 0x183   : > { %v1607_v3 = vsub.s32 32, %v1606_v7  ;;  %v1608_v58 = vshll.u32 %v9158_v22, %v1606_v7  ;;  %v1611_v14 = vsub.s32 4294967266, %v1606_v7  ;;  %v1753_v47 = vadd.s32 1, %v7169_v20 }
 0x184   : > { %vm11609_vm13 = vweird.f32 %v8858_v49  ;;  %v9199_v48 = vmul.u32.u64.low %v9156_v45, %v1686_v29  ;;  %v9200_v53 = vmul.u32.u64.high %v9156_v45, %v1686_v29, %v9199_v48  ;;  %vm1526_vm3 = vcmp.lt.s32.totalorder %v9145_v59, 2 }
 0x185   : > { %v9203_v8 = vmul.u32.u64.low %v9156_v45, %v1682_v23  ;;  %v9204_v62 = vmul.u32.u64.high %v9156_v45, %v1682_v23, %v9203_v8  ;;  %v1609_v46 = vshrl.u32 %v9152_v9, %v1607_v3  ;;  %v1612_v4 = vadd.s32 127, %v1611_v14 }
 0x186   : > { %vm1754_vm11 = vcmp.gt.s32.totalorder %v1753_v47, 0  ;;  %vm1527_vm5 = vcmp.eq.s32.totalorder %v9145_v59, 0  ;;  %v9212_v22 = vsel %vm9184_vm0, 0, %v1622_v63  ;;  %v198_v20 = vcvt.s32.f32 %v9142_v35 }
 0x187   : > { %11824 = vst [vmem:[#allocation43_spill] sm:$0xff] %v9212_v22  ;;  %v1755_v13 = vsel %vm1754_vm11, %v1753_v47, 0  ;;  %v1610_v26 = vor.u32 %v1609_v46, %v1608_v58  ;;  %v1613_v41 = vshll.u32 %v1612_v4, 23  ;;  %v1694_v42 = vmul.u32 %v9156_v45, %v1678_v51 }
 0x188   : > { %v1757_v43 = vand.u32 31, %v1755_v13  ;;  %vm1530_vm10 = vcmp.eq.s32.totalorder %v9145_v59, 2  ;;  %vm1696_vm1 = vc.u32 %v9200_v53, %v9203_v8  ;;  %v1697_v9 = vadd.s32 1, %v9204_v62  ;;  %v9221_v44 = vpop.eup %7614 }
 0x189   : > { %v1751_v5 = vor.u32 8388608, %v9171_v32  ;;  %11825 = vst [vmem:[#allocation44_spill] sm:$0xff] %v9221_v44  ;;  %v1614_v25 = vor.u32 4788187, %v1613_v41  ;;  %v1617_v63 = vcvt.s32.f32 %v1610_v26  ;;  %v1628_v35 = vadd.s32 3, %v9212_v22  ;;  %v9224_v34 = vpop.eup %7616 }
 0x18a   : > { %v1758_v57 = vsub.s32 32, %v1757_v43  ;;  %11826 = vst [vmem:[#allocation45_spill] sm:$0xff] %v9224_v34  ;;  %v11590_v45 = vxor.u32 2147483648, %v9221_v44  ;;  %v1698_v7 = vsel %vm1696_vm1, %v1697_v9, %v9204_v62  ;;  %v1756_v51 = vshrl.u32 %v1755_v13, 5 }
 0x18b   : > { %v231_v23 = vadd.f32 %v7920_v2, %v198_v20  ;;  %v11591_v29 = vxor.u32 2147483648, %v9224_v34  ;;  %v1615_v3 = vand.u32 2147483647, %v1614_v25  ;;  %v1699_v32 = vadd.s32 %v1698_v7, %v1694_v42 }
 0x18c   : > { %v1760_v58 = vshll.u32 %v11781_v54, %v1757_v43  ;;  %v1532_v14 = vsel %vm1530_vm10, %v11590_v45, %v9224_v34  ;;  %v1761_v47 = vshrl.u32 %v11789_v60, %v1758_v57  ;;  %v1763_v48 = vshll.u32 %v11789_v60, %v1757_v43 }
 0x18d   : > { %v1764_v62 = vshrl.u32 %v11778_v21, %v1758_v57  ;;  %v1529_v46 = vsel %vm1527_vm5, %v9221_v44, %v11591_v29  ;;  %v1618_v4 = vmul.f32 %v1617_v63, %v1615_v3  ;;  %v1700_v13 = vadd.s32 536870912, %v1699_v32 }
 0x18e   : > { %v1769_v20 = vshll.u32 %v11779_v36, %v1757_v43  ;;  %v1533_v26 = vsel %vm1526_vm3, %v1529_v46, %v1532_v14  ;;  %v1759_v41 = vshrl.u32 %v11781_v54, %v1758_v57  ;;  %v1766_v42 = vshll.u32 %v11778_v21, %v1757_v43 }
 0x18f   : > { %v1767_v9 = vshrl.u32 %v11779_v36, %v1758_v57  ;;  %v1534_v25 = vsel %vm11609_vm13, nan, %v1533_v26  ;;  %v1619_v7 = vxor.u32 2147483648, %v1618_v4  ;;  %v1701_v45 = vshrl.u32 %v1700_v13, 30 }
 0x190   : > { %v1770_v29 = vshrl.u32 %v11790_v50, %v1758_v57  ;;  %3626 = vst [vmem:[%s8258_s4 + $0x58] sm:$0xff] %v1534_v25  ;;  %v1762_v63 = vor.u32 %v1761_v47, %v1760_v58  ;;  %v1765_v3 = vor.u32 %v1764_v62, %v1763_v48  ;;  %v1772_v44 = vshll.u32 %v11790_v50, %v1757_v43 }
 0x191   : > { %v1773_v59 = vshrl.u32 %v11780_v27, %v1758_v57  ;;  %v1620_v14 = vsel %vm1537_vm9, %v1619_v7, %v1618_v4  ;;  %v1702_v46 = vshll.u32 %v1701_v45, 30  ;;  %vm1775_vm1 = vcmp.lt.s32.totalorder %v1756_v51, 1 }
 0x192   : > { %v1771_v34 = vor.u32 %v1770_v29, %v1769_v20  ;;  %v1623_v26 = vsel %vm9184_vm0, %v8931_v38, %v1620_v14  ;;  %v1768_v13 = vor.u32 %v1767_v9, %v1766_v42  ;;  %vm1778_vm3 = vcmp.lt.s32.totalorder %v1756_v51, 4 }
 0x193   : > { %v1774_v49 = vor.u32 %v1773_v59, %v1772_v44  ;;  %7618 = vcosq.f32 %v1623_v26  ;;  %v9261_v58 = vsub.s32 %v1699_v32, %v1702_v46  ;;  %vm1777_vm11 = vcmp.lt.s32.totalorder %v1756_v51, 3 }
 0x194   : > { %v1791_v43 = vshll.u32 %v1751_v5, 8  ;;  %7620 = vsinq.f32 %v1623_v26  ;;  %vm1776_vm5 = vcmp.lt.s32.totalorder %v1756_v51, 2  ;;  %v1780_v57 = vsel %vm1778_vm3, %v1768_v13, 2102212464 }
 0x195   : > { %v1783_v47 = vsel %vm1775_vm1, %v1762_v63, %v1765_v3  ;;  %v1705_v29 = vsub.s32 0, %v9261_v58  ;;  %v1779_v48 = vsel %vm1775_vm1, %v1759_v41, %v1762_v63  ;;  %v1784_v11 = vsel %vm1778_vm3, %v1771_v34, 920167782 }
 0x196   : > { %v9269_v44 = vmul.f32 %v9065_v52, %v231_v23  ;;  %v1781_v32 = vsel %vm1777_vm11, %v1765_v3, %v1780_v57  ;;  %v1785_v62 = vsel %vm1777_vm11, %v1768_v13, %v1784_v11  ;;  %v1787_v5 = vsel %vm1775_vm1, %v1765_v3, %v1768_v13 }
 0x197   : > { %v1788_v4 = vsel %vm1778_vm3, %v1774_v49, 1326507024  ;;  %v7166_v20 = vmin.u32 %v1705_v29, %v9261_v58  ;;  %v1725_v42 = vsub.s32 4, %v1701_v45  ;;  %v1786_v9 = vsel %vm1776_vm5, %v1783_v47, %v1785_v62 }
 0x198   : > { %11827 = vst [vmem:[#allocation46_spill] sm:$0xff] %v9269_v44  ;;  %v1789_v41 = vsel %vm1777_vm11, %v1771_v34, %v1788_v4  ;;  %v9279_v7 = vmul.u32.u64.low %v1791_v43, %v1786_v9  ;;  %v9280_v23 = vmul.u32.u64.high %v1791_v43, %v1786_v9, %v9279_v7  ;;  %v1629_v63 = vand.u32 3, %v1628_v35 }
 0x199   : > { %v1790_v25 = vsel %vm1776_vm5, %v1787_v5, %v1789_v41  ;;  %v1707_v59 = vclz %v7166_v20  ;;  %v1782_v14 = vsel %vm1776_vm5, %v1779_v48, %v1781_v32  ;;  %vm1641_vm9 = vcmp.lt.s32.totalorder %v9068_v0, 0 }
 0x19a   : > { %v9285_v49 = vmul.u32.u64.low %v1791_v43, %v1790_v25  ;;  %v9286_v3 = vmul.u32.u64.high %v1791_v43, %v1790_v25, %v9285_v49  ;;  %v199_v46 = vcvt.s32.f32 %v9149_v30  ;;  %vm11608_vm0 = vweird.f32 %v8931_v38 }
 0x19b   : > { %v7167_v34 = vadd.s32 4294967294, %v1707_v59  ;;  %v1726_v26 = vsel %vm1641_vm9, %v1725_v42, %v1701_v45  ;;  %v1850_v13 = vand.u32 2139095040, %v9269_v44  ;;  %v11828_v35 = vand.u32 2147483647, %v9068_v0 }
 0x19c   : > { %v1798_v57 = vmul.u32 %v1791_v43, %v1782_v14  ;;  %v1801_v47 = vadd.s32 1, %v9280_v23  ;;  %v11600_v29 = vand.u32 2147483647, %v9269_v44  ;;  %vm1630_vm1 = vcmp.lt.s32.totalorder %v1629_v63, 2 }
 0x19d   : > { %vm9295_vm10 = vcmp.le.f32.partialorder %v11828_v35, 0.7853982  ;;  %v1695_v30 = vadd.s32 %v9203_v8, %v9200_v53  ;;  %vm7168_vm3 = vcmp.lt.s32.totalorder %v7167_v34, 0  ;;  %v1851_v48 = vshrl.u32 %v1850_v13, 23 }
 0x19e   : > { %v1710_v45 = vsel %vm7168_vm3, 0, %v7167_v34  ;;  %v9305_v11 = vsel %vm9295_vm10, 0, %v1726_v26  ;;  %vm1800_vm11 = vc.u32 %v9286_v3, %v9279_v7  ;;  %v232_v43 = vadd.f32 %v7920_v2, %v199_v46 }
 0x19f   : > { %11831 = vst [vmem:[#allocation47_spill] sm:$0xff] %v9305_v11  ;;  %v1711_v32 = vsub.s32 32, %v1710_v45  ;;  %v1712_v62 = vshll.u32 %v9261_v58, %v1710_v45  ;;  %v1715_v5 = vsub.s32 4294967266, %v1710_v45  ;;  %v1802_v4 = vsel %vm1800_vm11, %v1801_v47, %v9280_v23 }
 0x1a0   : > { %v9312_v20 = vpop.eup %7618  ;;  %vm1634_vm5 = vcmp.eq.s32.totalorder %v1629_v63, 2  ;;  %v1803_v53 = vadd.s32 %v1802_v4, %v1798_v57  ;;  %v7173_v8 = vadd.s32 4294967169, %v1851_v48  ;;  %v1854_v42 = vand.u32 8388607, %v11600_v29 }
 0x1a1   : > { %11832 = vst [vmem:[#allocation48_spill] sm:$0xff] %v9312_v20  ;;  %v9316_v9 = vpop.eup %7620  ;;  %vm1631_vm3 = vcmp.eq.s32.totalorder %v1629_v63, 0  ;;  %v11597_v41 = vxor.u32 2147483648, %v9312_v20  ;;  %v1713_v25 = vshrl.u32 %v1695_v30, %v1711_v32  ;;  %v1716_v59 = vadd.s32 127, %v1715_v5 }
 0x1a2   : > { %11833 = vst [vmem:[#allocation49_spill] sm:$0xff] %v9316_v9  ;;  %v11598_v58 = vxor.u32 2147483648, %v9316_v9  ;;  %v1732_v14 = vadd.s32 3, %v9305_v11  ;;  %v1804_v23 = vadd.s32 536870912, %v1803_v53  ;;  %v1857_v49 = vadd.s32 1, %v7173_v8 }
 0x1a3   : > { %v1636_v46 = vsel %vm1634_vm5, %v11597_v41, %v9316_v9  ;;  %v1714_v34 = vor.u32 %v1713_v25, %v1712_v62  ;;  %v1717_v26 = vshll.u32 %v1716_v59, 23  ;;  %v9325_v13 = vmul.f32 %v9065_v52, %v232_v43 }
 0x1a4   : > { %v1633_v35 = vsel %vm1631_vm3, %v9312_v20, %v11598_v58  ;;  %v9330_v57 = vshrl.u32 %v1804_v23, 30  ;;  %v1855_v47 = vor.u32 8388608, %v1854_v42  ;;  %vm1858_vm11 = vcmp.gt.s32.totalorder %v1857_v49, 0 }
 0x1a5   : > { %11834 = vst [vmem:[#allocation50_spill] sm:$0xff] %v9325_v13  ;;  %v1637_v30 = vsel %vm1630_vm1, %v1633_v35, %v1636_v46  ;;  %v1718_v48 = vor.u32 4788187, %v1717_v26  ;;  %v1721_v45 = vcvt.s32.f32 %v1714_v34  ;;  %v1859_v32 = vsel %vm1858_vm11, %v1857_v49, 0 }
 0x1a6   : > { %v1638_v62 = vsel %vm11608_vm0, nan, %v1637_v30  ;;  %v1806_v5 = vshll.u32 %v9330_v57, 30  ;;  %v11599_v43 = vand.u32 2147483647, %v9325_v13  ;;  %v1861_v8 = vand.u32 31, %v1859_v32 }
 0x1a7   : > { %3627 = vst [vmem:[%s8258_s4 + $0x60] sm:$0xff] %v1638_v62  ;;  %v1719_v4 = vand.u32 2147483647, %v1718_v48  ;;  %v9339_v25 = vadd.s32 136, %v7918_v1  ;;  %v9341_v42 = vand.u32 3, %v1732_v14  ;;  %v1799_v63 = vadd.s32 %v9279_v7, %v9286_v3 }
 0x1a8   : > { %v9345_v59 = vsub.s32 %v1803_v53, %v1806_v5  ;;  %v9347_v23 = vshll.u32 %v1855_v47, 8  ;;  %v1862_v46 = vsub.s32 32, %v1861_v8  ;;  %v1864_v34 = vshll.u32 %v11781_v54, %v1861_v8 }
 0x1a9   : > { %v1722_v49 = vmul.f32 %v1721_v45, %v1719_v4  ;;  %v1954_v26 = vand.u32 2139095040, %v9325_v13  ;;  %v1860_v30 = vshrl.u32 %v1859_v32, 5  ;;  %v1867_v48 = vshll.u32 %v11789_v60, %v1861_v8 }
 0x1aa   : > { %v1809_v35 = vsub.s32 0, %v9345_v59  ;;  %v9355_v14 = vand.u32 8388607, %v11599_v43  ;;  %v1865_v3 = vshrl.u32 %v11789_v60, %v1862_v46  ;;  %v1868_v53 = vshrl.u32 %v11778_v21, %v1862_v46 }
 0x1ab   : > { %v1723_v7 = vxor.u32 2147483648, %v1722_v49  ;;  %v1870_v47 = vshll.u32 %v11778_v21, %v1861_v8  ;;  %vm1745_vm1 = vcmp.lt.s32.totalorder %v9130_v39, 0  ;;  %v1829_v62 = vsub.s32 4, %v9330_v57 }
 0x1ac   : > { %v7170_v45 = vmin.u32 %v1809_v35, %v9345_v59  ;;  %v1871_v32 = vshrl.u32 %v11779_v36, %v1862_v46  ;;  %v1873_v5 = vshll.u32 %v11779_v36, %v1861_v8  ;;  %v1866_v41 = vor.u32 %v1865_v3, %v1864_v34 }
 0x1ad   : > { %v1724_v4 = vsel %vm1641_vm9, %v1723_v7, %v1722_v49  ;;  %v1869_v58 = vor.u32 %v1868_v53, %v1867_v48  ;;  %v1874_v43 = vshrl.u32 %v11790_v50, %v1862_v46  ;;  %vm1879_vm5 = vcmp.lt.s32.totalorder %v1860_v30, 1 }
 0x1ae   : > { %v1727_v29 = vsel %vm9295_vm10, %v9068_v0, %v1724_v4  ;;  %v1811_v38 = vclz %v7170_v45  ;;  %v1955_v35 = vshrl.u32 %v1954_v26, 23  ;;  %v1863_v20 = vshrl.u32 %v11781_v54, %v1862_v46 }
 0x1af   : > { %7622 = vcosq.f32 %v1727_v29  ;;  %v1872_v9 = vor.u32 %v1871_v32, %v1870_v47  ;;  %v1875_v11 = vor.u32 %v1874_v43, %v1873_v5  ;;  %v1876_v49 = vshll.u32 %v11790_v50, %v1861_v8 }
 0x1b0   : > { %7624 = vsinq.f32 %v1727_v29  ;;  %v7171_v22 = vadd.s32 4294967294, %v1811_v38  ;;  %v1877_v34 = vshrl.u32 %v11780_v27, %v1862_v46  ;;  %vm1880_vm9 = vcmp.lt.s32.totalorder %v1860_v30, 2 }
 0x1b1   : > { %vm1881_vm3 = vcmp.lt.s32.totalorder %v1860_v30, 3  ;;  %vm1882_vm11 = vcmp.lt.s32.totalorder %v1860_v30, 4  ;;  %v1887_v51 = vsel %vm1879_vm5, %v1866_v41, %v1869_v58  ;;  %v1883_v43 = vsel %vm1879_vm5, %v1863_v20, %v1866_v41 }
 0x1b2   : > { %vm7172_vm10 = vcmp.lt.s32.totalorder %v7171_v22, 0  ;;  %v1878_v48 = vor.u32 %v1877_v34, %v1876_v49  ;;  %v1884_v26 = vsel %vm1882_vm11, %v1872_v9, 2102212464  ;;  %v1888_v7 = vsel %vm1882_vm11, %v1875_v11, 920167782 }
 0x1b3   : > { %v1814_v3 = vsel %vm7172_vm10, 0, %v7171_v22  ;;  %v1885_v38 = vsel %vm1881_vm3, %v1869_v58, %v1884_v26  ;;  %v1889_v29 = vsel %vm1881_vm3, %v1872_v9, %v1888_v7  ;;  %v1891_v47 = vsel %vm1879_vm5, %v1869_v58, %v1872_v9 }
 0x1b4   : > { %v1815_v8 = vsub.s32 32, %v1814_v3  ;;  %v1816_v46 = vshll.u32 %v9345_v59, %v1814_v3  ;;  %v1819_v53 = vsub.s32 4294967266, %v1814_v3  ;;  %v1830_v45 = vsel %vm1745_vm1, %v1829_v62, %v9330_v57 }
 0x1b5   : > { %v1890_v32 = vsel %vm1880_vm9, %v1887_v51, %v1889_v29  ;;  %v1892_v22 = vsel %vm1882_vm11, %v1878_v48, 1326507024  ;;  %v7177_v5 = vadd.s32 4294967169, %v1955_v35  ;;  %v1886_v4 = vsel %vm1880_vm9, %v1883_v43, %v1885_v38 }
 0x1b6   : > { %v1817_v20 = vshrl.u32 %v1799_v63, %v1815_v8  ;;  %v1820_v41 = vadd.s32 127, %v1819_v53  ;;  %v1893_v49 = vsel %vm1881_vm3, %v1875_v11, %v1892_v22  ;;  %vm11633_vm10 = vweird.f32 %v9068_v0 }
 0x1b7   : > { %v1894_v59 = vsel %vm1880_vm9, %v1891_v47, %v1893_v49  ;;  %v9392_v9 = vmul.u32.u64.low %v9347_v23, %v1890_v32  ;;  %v9393_v58 = vmul.u32.u64.high %v9347_v23, %v1890_v32, %v9392_v9  ;;  %v1961_v57 = vadd.s32 1, %v7177_v5 }
 0x1b8   : > { %v1818_v62 = vor.u32 %v1817_v20, %v1816_v46  ;;  %v1821_v34 = vshll.u32 %v1820_v41, 23  ;;  %v9397_v35 = vmul.u32.u64.low %v9347_v23, %v1894_v59  ;;  %v9398_v63 = vmul.u32.u64.high %v9347_v23, %v1894_v59, %v9397_v35 }
 0x1b9   : > { %vm1734_vm5 = vcmp.lt.s32.totalorder %v9341_v42, 2  ;;  %vm1735_vm3 = vcmp.eq.s32.totalorder %v9341_v42, 0  ;;  %v11835_v11 = vand.u32 2147483647, %v9130_v39  ;;  %vm1962_vm9 = vcmp.gt.s32.totalorder %v1961_v57, 0 }
 0x1ba   : > { %v1822_v51 = vor.u32 4788187, %v1821_v34  ;;  %v1825_v48 = vcvt.s32.f32 %v1818_v62  ;;  %v1902_v26 = vmul.u32 %v9347_v23, %v1886_v4  ;;  %v1963_v7 = vsel %vm1962_vm9, %v1961_v57, 0 }
 0x1bb   : > { %vm9404_vm11 = vcmp.le.f32.partialorder %v11835_v11, 0.7853982  ;;  %vm1738_vm0 = vcmp.eq.s32.totalorder %v9341_v42, 2  ;;  %v1905_v43 = vadd.s32 1, %v9393_v58  ;;  %v1965_v38 = vand.u32 31, %v1963_v7 }
 0x1bc   : > { %v9412_v3 = vsel %vm9404_vm11, 0, %v1830_v45  ;;  %v9415_v29 = vpop.eup %7622  ;;  %v1823_v8 = vand.u32 2147483647, %v1822_v51  ;;  %vm1904_vm13 = vc.u32 %v9398_v63, %v9392_v9  ;;  %v1959_v46 = vor.u32 8388608, %v9355_v14 }
 0x1bd   : > { %11838 = vst [vmem:[#allocation51_spill] sm:$0xff] %v9412_v3  ;;  %11839 = vst [vmem:[#allocation52_spill] sm:$0xff] %v9415_v29  ;;  %v200_v23 = vcvt.s32.f32 %v9339_v25  ;;  %v9421_v53 = vpop.eup %7624  ;;  %v11610_v47 = vxor.u32 2147483648, %v9415_v29  ;;  %v1906_v45 = vsel %vm1904_vm13, %v1905_v43, %v9393_v58  ;;  %v1966_v32 = vsub.s32 32, %v1965_v38 }
 0x1be   : > { %11840 = vst [vmem:[#allocation53_spill] sm:$0xff] %v9421_v53  ;;  %v1968_v22 = vshll.u32 %v11781_v54, %v1965_v38  ;;  %v11613_v5 = vxor.u32 2147483648, %v9421_v53  ;;  %v1826_v20 = vmul.f32 %v1825_v48, %v1823_v8  ;;  %v1836_v41 = vadd.s32 3, %v9412_v3 }
 0x1bf   : > { %v1907_v4 = vadd.s32 %v1906_v45, %v1902_v26  ;;  %v1740_v25 = vsel %vm1738_vm0, %v11610_v47, %v9421_v53  ;;  %v1969_v14 = vshrl.u32 %v11789_v60, %v1966_v32  ;;  %v1971_v49 = vshll.u32 %v11789_v60, %v1965_v38 }
 0x1c0   : > { %v1972_v59 = vshrl.u32 %v11778_v21, %v1966_v32  ;;  %v1737_v58 = vsel %vm1735_vm3, %v9415_v29, %v11613_v5  ;;  %v1827_v57 = vxor.u32 2147483648, %v1826_v20  ;;  %v1964_v34 = vshrl.u32 %v1963_v7, 5 }
 0x1c1   : > { %v1908_v62 = vadd.s32 536870912, %v1907_v4  ;;  %v1741_v35 = vsel %vm1734_vm5, %v1737_v58, %v1740_v25  ;;  %v1970_v11 = vor.u32 %v1969_v14, %v1968_v22  ;;  %v1974_v51 = vshll.u32 %v11778_v21, %v1965_v38 }
 0x1c2   : > { %v1975_v48 = vshrl.u32 %v11779_v36, %v1966_v32  ;;  %v1742_v26 = vsel %vm11633_vm10, nan, %v1741_v35  ;;  %v1828_v43 = vsel %vm1745_vm1, %v1827_v57, %v1826_v20  ;;  %v1977_v45 = vshll.u32 %v11779_v36, %v1965_v38 }
 0x1c3   : > { %v9449_v8 = vshrl.u32 %v1908_v62, 30  ;;  %3628 = vst [vmem:[%s8258_s4 + $0x68] sm:$0xff] %v1742_v26  ;;  %v1831_v42 = vsel %vm9404_vm11, %v9130_v39, %v1828_v43  ;;  %v1973_v7 = vor.u32 %v1972_v59, %v1971_v49  ;;  %v1978_v22 = vshrl.u32 %v11790_v50, %v1966_v32 }
 0x1c4   : > { %v1980_v25 = vshll.u32 %v11790_v50, %v1965_v38  ;;  %7626 = vcosq.f32 %v1831_v42  ;;  %v1981_v58 = vshrl.u32 %v11780_v27, %v1966_v32  ;;  %v233_v20 = vadd.f32 %v7920_v2, %v200_v23 }
 0x1c5   : > { %v1910_v14 = vshll.u32 %v9449_v8, 30  ;;  %7628 = vsinq.f32 %v1831_v42  ;;  %v1976_v57 = vor.u32 %v1975_v48, %v1974_v51  ;;  %v1979_v62 = vor.u32 %v1978_v22, %v1977_v45 }
 0x1c6   : > { %vm1983_vm13 = vcmp.lt.s32.totalorder %v1964_v34, 1  ;;  %v1967_v30 = vshrl.u32 %v11781_v54, %v1966_v32  ;;  %v1982_v49 = vor.u32 %v1981_v58, %v1980_v25  ;;  %vm1985_vm0 = vcmp.lt.s32.totalorder %v1964_v34, 3 }
 0x1c7   : > { %v9461_v35 = vsub.s32 %v1907_v4, %v1910_v14  ;;  %vm1984_vm1 = vcmp.lt.s32.totalorder %v1964_v34, 2  ;;  %vm1986_vm5 = vcmp.lt.s32.totalorder %v1964_v34, 4  ;;  %v1991_v38 = vsel %vm1983_vm13, %v1970_v11, %v1973_v7 }
 0x1c8   : > { %v1999_v59 = vshll.u32 %v1959_v46, 8  ;;  %v1988_v43 = vsel %vm1986_vm5, %v1976_v57, 2102212464  ;;  %v1992_v47 = vsel %vm1986_vm5, %v1979_v62, 920167782  ;;  %v1837_v23 = vand.u32 3, %v1836_v41 }
 0x1c9   : > { %v1913_v26 = vsub.s32 0, %v9461_v35  ;;  %v1993_v51 = vsel %vm1985_vm0, %v1976_v57, %v1992_v47  ;;  %v1996_v48 = vsel %vm1986_vm5, %v1982_v49, 1326507024  ;;  %v9468_v4 = vmul.f32 %v9065_v52, %v233_v20 }
 0x1ca   : > { %v1987_v45 = vsel %vm1983_vm13, %v1967_v30, %v1970_v11  ;;  %v1994_v42 = vsel %vm1984_vm1, %v1991_v38, %v1993_v51  ;;  %v1995_v22 = vsel %vm1983_vm13, %v1973_v7, %v1976_v57  ;;  %v1989_v46 = vsel %vm1985_vm0, %v1973_v7, %v1988_v43 }
 0x1cb   : > { %11841 = vst [vmem:[#allocation54_spill] sm:$0xff] %v9468_v4  ;;  %v7174_v32 = vmin.u32 %v1913_v26, %v9461_v35  ;;  %v1997_v25 = vsel %vm1985_vm0, %v1979_v62, %v1996_v48  ;;  %v9476_v14 = vmul.u32.u64.low %v1999_v59, %v1994_v42  ;;  %v9477_v41 = vmul.u32.u64.high %v1999_v59, %v1994_v42, %v9476_v14 }
 0x1cc   : > { %vm11624_vm3 = vweird.f32 %v9130_v39  ;;  %v169_v58 = vadd.s32 144, %v7918_v1  ;;  %vm1838_vm11 = vcmp.lt.s32.totalorder %v1837_v23, 2  ;;  %vm1849_vm9 = vcmp.lt.s32.totalorder %v9269_v44, 0 }
 0x1cd   : > { %v1915_v47 = vclz %v7174_v32  ;;  %v1998_v11 = vsel %vm1984_vm1, %v1995_v22, %v1997_v25  ;;  %v2058_v20 = vand.u32 2139095040, %v9468_v4  ;;  %v1990_v7 = vsel %vm1984_vm1, %v1987_v45, %v1989_v46 }
 0x1ce   : > { %v9486_v62 = vmul.u32.u64.low %v1999_v59, %v1998_v11  ;;  %v9487_v30 = vmul.u32.u64.high %v1999_v59, %v1998_v11, %v9486_v62  ;;  %vm1839_vm13 = vcmp.eq.s32.totalorder %v1837_v23, 0  ;;  %vm1842_vm0 = vcmp.eq.s32.totalorder %v1837_v23, 2 }
 0x1cf   : > { %v7175_v57 = vadd.s32 4294967294, %v1915_v47  ;;  %v1933_v49 = vsub.s32 4, %v9449_v8  ;;  %v2059_v38 = vshrl.u32 %v2058_v20, 23  ;;  %v1903_v26 = vadd.s32 %v9392_v9, %v9398_v63 }
 0x1d0   : > { %v2009_v43 = vadd.s32 1, %v9477_v41  ;;  %v201_v51 = vcvt.s32.f32 %v169_v58  ;;  %v2006_v34 = vmul.u32 %v1999_v59, %v1990_v7  ;;  %v11614_v45 = vand.u32 2147483647, %v9468_v4 }
 0x1d1   : > { %vm7176_vm5 = vcmp.lt.s32.totalorder %v7175_v57, 0  ;;  %v9493_v48 = vpop.eup %7626  ;;  %v7181_v42 = vadd.s32 4294967169, %v2059_v38  ;;  %v1934_v63 = vsel %vm1849_vm9, %v1933_v49, %v9449_v8  ;;  %vm2008_vm1 = vc.u32 %v9487_v30, %v9476_v14 }
 0x1d2   : > { %11842 = vst [vmem:[#allocation55_spill] sm:$0xff] %v9493_v48  ;;  %v1918_v32 = vsel %vm7176_vm5, 0, %v7175_v57  ;;  %v9496_v22 = vpop.eup %7628  ;;  %v11611_v46 = vxor.u32 2147483648, %v9493_v48  ;;  %v2062_v62 = vand.u32 8388607, %v11614_v45  ;;  %v234_v23 = vadd.f32 %v7920_v2, %v201_v51 }
 0x1d3   : > { %11843 = vst [vmem:[#allocation56_spill] sm:$0xff] %v9496_v22  ;;  %v1919_v25 = vsub.s32 32, %v1918_v32  ;;  %v1920_v47 = vshll.u32 %v9461_v35, %v1918_v32  ;;  %v1923_v11 = vsub.s32 4294967266, %v1918_v32  ;;  %v11612_v9 = vxor.u32 2147483648, %v9496_v22 }
 0x1d4   : > { %v2065_v59 = vadd.s32 1, %v7181_v42  ;;  %v1844_v58 = vsel %vm1842_vm0, %v11611_v46, %v9496_v22  ;;  %v2010_v35 = vsel %vm2008_vm1, %v2009_v43, %v9477_v41  ;;  %v11844_v43 = vand.u32 2147483647, %v9269_v44 }
 0x1d5   : > { %v1921_v20 = vshrl.u32 %v1903_v26, %v1919_v25  ;;  %v1924_v57 = vadd.s32 127, %v1923_v11  ;;  %v1841_v7 = vsel %vm1839_vm13, %v9493_v48, %v11612_v9  ;;  %v2011_v8 = vadd.s32 %v2010_v35, %v2006_v34 }
 0x1d6   : > { %vm2066_vm5 = vcmp.gt.s32.totalorder %v2065_v59, 0  ;;  %v1845_v49 = vsel %vm1838_vm11, %v1841_v7, %v1844_v58  ;;  %vm9523_vm0 = vcmp.le.f32.partialorder %v11844_v43, 0.7853982  ;;  %v2063_v58 = vor.u32 8388608, %v2062_v62 }
 0x1d7   : > { %v1922_v38 = vor.u32 %v1921_v20, %v1920_v47  ;;  %v1925_v32 = vshll.u32 %v1924_v57, 23  ;;  %v2067_v42 = vsel %vm2066_vm5, %v2065_v59, 0  ;;  %v1846_v26 = vsel %vm11624_vm3, nan, %v1845_v49 }
 0x1d8   : > { %v2012_v25 = vadd.s32 536870912, %v2011_v8  ;;  %v2069_v41 = vand.u32 31, %v2067_v42  ;;  %3629 = vst [vmem:[%s8258_s4 + $0x70] sm:$0xff] %v1846_v26  ;;  %v9530_v47 = vsel %vm9523_vm0, 0, %v1934_v63  ;;  %v2068_v7 = vshrl.u32 %v2067_v42, 5 }
 0x1d9   : > { %v1926_v34 = vor.u32 4788187, %v1925_v32  ;;  %v1929_v35 = vcvt.s32.f32 %v1922_v38  ;;  %11847 = vst [vmem:[#allocation57_spill] sm:$0xff] %v9530_v47  ;;  %v170_v5 = vadd.s32 152, %v7918_v1  ;;  %v1940_v39 = vadd.s32 3, %v9530_v47 }
 0x1da   : > { %v9532_v59 = vshrl.u32 %v2012_v25, 30  ;;  %v2070_v20 = vsub.s32 32, %v2069_v41  ;;  %v2072_v49 = vshll.u32 %v11781_v54, %v2069_v41  ;;  %v2075_v26 = vshll.u32 %v11789_v60, %v2069_v41 }
 0x1db   : > { %v1927_v57 = vand.u32 2147483647, %v1926_v34  ;;  %v2078_v51 = vshll.u32 %v11778_v21, %v2069_v41  ;;  %v2081_v32 = vshll.u32 %v11779_v36, %v2069_v41  ;;  %v2084_v46 = vshll.u32 %v11790_v50, %v2069_v41 }
 0x1dc   : > { %v2014_v43 = vshll.u32 %v9532_v59, 30  ;;  %v2073_v38 = vshrl.u32 %v11789_v60, %v2070_v20  ;;  %v2076_v25 = vshrl.u32 %v11778_v21, %v2070_v20  ;;  %v2079_v62 = vshrl.u32 %v11779_v36, %v2070_v20 }
 0x1dd   : > { %v1930_v63 = vmul.f32 %v1929_v35, %v1927_v57  ;;  %v2082_v34 = vshrl.u32 %v11790_v50, %v2070_v20  ;;  %v2085_v9 = vshrl.u32 %v11780_v27, %v2070_v20  ;;  %v9549_v48 = vshll.u32 %v2063_v58, 8 }
 0x1de   : > { %v9543_v42 = vsub.s32 %v2011_v8, %v2014_v43  ;;  %v9552_v35 = vmul.f32 %v9065_v52, %v234_v23  ;;  %v2071_v22 = vshrl.u32 %v11781_v54, %v2070_v20  ;;  %v2074_v8 = vor.u32 %v2073_v38, %v2072_v49 }
 0x1df   : > { %v1931_v45 = vxor.u32 2147483648, %v1930_v63  ;;  %v2077_v43 = vor.u32 %v2076_v25, %v2075_v26  ;;  %v2080_v0 = vor.u32 %v2079_v62, %v2078_v51  ;;  %v2083_v29 = vor.u32 %v2082_v34, %v2081_v32 }
 0x1e0   : > { %11848 = vst [vmem:[#allocation58_spill] sm:$0xff] %v9552_v35  ;;  %v2017_v57 = vsub.s32 0, %v9543_v42  ;;  %vm2087_vm11 = vcmp.lt.s32.totalorder %v2068_v7, 1  ;;  %v2086_v52 = vor.u32 %v2085_v9, %v2084_v46  ;;  %vm2090_vm13 = vcmp.lt.s32.totalorder %v2068_v7, 4 }
 0x1e1   : > { %v1932_v41 = vsel %vm1849_vm9, %v1931_v45, %v1930_v63  ;;  %vm2088_vm1 = vcmp.lt.s32.totalorder %v2068_v7, 2  ;;  %vm2089_vm5 = vcmp.lt.s32.totalorder %v2068_v7, 3  ;;  %v2092_v23 = vsel %vm2090_vm13, %v2080_v0, 2102212464 }
 0x1e2   : > { %v1935_v58 = vsel %vm9523_vm0, %v9269_v44, %v1932_v41  ;;  %v7178_v47 = vmin.u32 %v2017_v57, %v9543_v42  ;;  %v2091_v49 = vsel %vm2087_vm11, %v2071_v22, %v2074_v8  ;;  %v2095_v45 = vsel %vm2087_vm11, %v2074_v8, %v2077_v43 }
 0x1e3   : > { %7630 = vcosq.f32 %v1935_v58  ;;  %v2093_v26 = vsel %vm2089_vm5, %v2077_v43, %v2092_v23  ;;  %v2096_v38 = vsel %vm2090_vm13, %v2083_v29, 920167782  ;;  %v2099_v51 = vsel %vm2087_vm11, %v2077_v43, %v2080_v0 }
 0x1e4   : > { %7632 = vsinq.f32 %v1935_v58  ;;  %v2019_v20 = vclz %v7178_v47  ;;  %v202_v11 = vcvt.s32.f32 %v170_v5  ;;  %v2007_v32 = vadd.s32 %v9476_v14, %v9487_v30 }
 0x1e5   : > { %v2097_v9 = vsel %vm2089_vm5, %v2080_v0, %v2096_v38  ;;  %v2100_v63 = vsel %vm2090_vm13, %v2086_v52, 1326507024  ;;  %v2037_v25 = vsub.s32 4, %v9532_v59  ;;  %v2094_v47 = vsel %vm2088_vm1, %v2091_v49, %v2093_v26 }
 0x1e6   : > { %v7179_v46 = vadd.s32 4294967294, %v2019_v20  ;;  %v2098_v22 = vsel %vm2088_vm1, %v2095_v45, %v2097_v9  ;;  %v2101_v62 = vsel %vm2089_vm5, %v2083_v29, %v2100_v63  ;;  %v2162_v8 = vand.u32 2139095040, %v9552_v35 }
 0x1e7   : > { %v2102_v34 = vsel %vm2088_vm1, %v2099_v51, %v2101_v62  ;;  %v9575_v5 = vmul.u32.u64.low %v9549_v48, %v2098_v22  ;;  %v9576_v57 = vmul.u32.u64.high %v9549_v48, %v2098_v22, %v9575_v5  ;;  %v1941_v43 = vand.u32 3, %v1940_v39 }
 0x1e8   : > { %vm7180_vm9 = vcmp.lt.s32.totalorder %v7179_v46, 0  ;;  %v9580_v0 = vmul.u32.u64.low %v9549_v48, %v2102_v34  ;;  %v9581_v30 = vmul.u32.u64.high %v9549_v48, %v2102_v34, %v9580_v0  ;;  %vm11632_vm0 = vweird.f32 %v9269_v44 }
 0x1e9   : > { %v2022_v14 = vsel %vm7180_vm9, 0, %v7179_v46  ;;  %vm1953_vm11 = vcmp.lt.s32.totalorder %v9325_v13, 0  ;;  %v2110_v7 = vmul.u32 %v9549_v48, %v2094_v47  ;;  %v2163_v52 = vshrl.u32 %v2162_v8, 23 }
 0x1ea   : > { %v2023_v41 = vsub.s32 32, %v2022_v14  ;;  %v2024_v58 = vshll.u32 %v9543_v42, %v2022_v14  ;;  %v2027_v29 = vsub.s32 4294967266, %v2022_v14  ;;  %v2038_v49 = vsel %vm1953_vm11, %v2037_v25, %v9532_v59 }
 0x1eb   : > { %v2113_v45 = vadd.s32 1, %v9576_v57  ;;  %v11849_v39 = vand.u32 2147483647, %v9325_v13  ;;  %vm2112_vm1 = vc.u32 %v9581_v30, %v9575_v5  ;;  %v7185_v26 = vadd.s32 4294967169, %v2163_v52 }
 0x1ec   : > { %v2025_v23 = vshrl.u32 %v2007_v32, %v2023_v41  ;;  %v2028_v20 = vadd.s32 127, %v2027_v29  ;;  %v235_v48 = vadd.f32 %v7920_v2, %v202_v11  ;;  %vm1942_vm5 = vcmp.lt.s32.totalorder %v1941_v43, 2 }
 0x1ed   : > { %vm9594_vm13 = vcmp.le.f32.partialorder %v11849_v39, 0.7853982  ;;  %v2114_v32 = vsel %vm2112_vm1, %v2113_v45, %v9576_v57  ;;  %v11627_v9 = vand.u32 2147483647, %v9552_v35  ;;  %v2169_v63 = vadd.s32 1, %v7185_v26 }
 0x1ee   : > { %v2026_v38 = vor.u32 %v2025_v23, %v2024_v58  ;;  %v2029_v51 = vshll.u32 %v2028_v20, 23  ;;  %v9604_v59 = vsel %vm9594_vm13, 0, %v2038_v49  ;;  %v2115_v46 = vadd.s32 %v2114_v32, %v2110_v7  ;;  %v9612_v57 = vld [vmem:[#allocation2] ss:$0 sm:$0xff] }
 0x1ef   : > { %11852 = vst [vmem:[#allocation59_spill] sm:$0xff] %v9604_v59  ;;  %vm1943_vm9 = vcmp.eq.s32.totalorder %v1941_v43, 0  ;;  %vm1946_vm3 = vcmp.eq.s32.totalorder %v1941_v43, 2  ;;  %vm2170_vm1 = vcmp.gt.s32.totalorder %v2169_v63, 0  ;;  %v9615_v14 = vmul.f32 %v9612_v57, %v235_v48 }
 0x1f0   : > { %v9607_v25 = vpop.eup %7630  ;;  %v2030_v47 = vor.u32 4788187, %v2029_v51  ;;  %v2033_v22 = vcvt.s32.f32 %v2026_v38  ;;  %v2116_v34 = vadd.s32 536870912, %v2115_v46  ;;  %v2044_v41 = vadd.s32 3, %v9604_v59 }
 0x1f1   : > { %11853 = vst [vmem:[#allocation60_spill] sm:$0xff] %v9607_v25  ;;  %v9609_v11 = vpop.eup %7632  ;;  %v11625_v62 = vxor.u32 2147483648, %v9607_v25  ;;  %11855 = vst [vmem:[#allocation62_spill] sm:$0xff] %v9615_v14  ;;  %v2171_v58 = vsel %vm2170_vm1, %v2169_v63, 0  ;;  %v2166_v52 = vand.u32 8388607, %v11627_v9 }
 0x1f2   : > { %11854 = vst [vmem:[#allocation61_spill] sm:$0xff] %v9609_v11  ;;  %v11626_v0 = vxor.u32 2147483648, %v9609_v11  ;;  %v2031_v8 = vand.u32 2147483647, %v2030_v47  ;;  %v9622_v7 = vshrl.u32 %v2116_v34, 30  ;;  %v2173_v23 = vand.u32 31, %v2171_v58 }
 0x1f3   : > { %v1948_v29 = vsel %vm1946_vm3, %v11625_v62, %v9609_v11  ;;  %v9631_v45 = vadd.s32 160, %v7918_v1  ;;  %v2266_v38 = vand.u32 2139095040, %v9615_v14  ;;  %v9638_v63 = vand.u32 3, %v2044_v41 }
 0x1f4   : > { %v1945_v20 = vsel %vm1943_vm9, %v9607_v25, %v11626_v0  ;;  %v2034_v49 = vmul.f32 %v2033_v22, %v2031_v8  ;;  %v2118_v26 = vshll.u32 %v9622_v7, 30  ;;  %v2174_v48 = vsub.s32 32, %v2173_v23 }
 0x1f5   : > { %v1949_v39 = vsel %vm1942_vm5, %v1945_v20, %v1948_v29  ;;  %v2176_v47 = vshll.u32 %v11781_v54, %v2173_v23  ;;  %v2167_v34 = vor.u32 8388608, %v2166_v52  ;;  %v2179_v8 = vshll.u32 %v11789_v60, %v2173_v23 }
 0x1f6   : > { %v1950_v51 = vsel %vm11632_vm0, nan, %v1949_v39  ;;  %v2035_v32 = vxor.u32 2147483648, %v2034_v49  ;;  %v9642_v22 = vsub.s32 %v2115_v46, %v2118_v26  ;;  %v2177_v43 = vshrl.u32 %v11789_v60, %v2174_v48 }
 0x1f7   : > { %3630 = vst [vmem:[%s8258_s4 + $0x78] sm:$0xff] %v1950_v51  ;;  %v2172_v20 = vshrl.u32 %v2171_v58, 5  ;;  %v2180_v62 = vshrl.u32 %v11778_v21, %v2174_v48  ;;  %v2182_v39 = vshll.u32 %v11778_v21, %v2173_v23  ;;  %v2175_v52 = vshrl.u32 %v11781_v54, %v2174_v48 }
 0x1f8   : > { %v2036_v29 = vsel %vm1953_vm11, %v2035_v32, %v2034_v49  ;;  %v2121_v46 = vsub.s32 0, %v9642_v22  ;;  %v2267_v26 = vshrl.u32 %v2266_v38, 23  ;;  %v2178_v51 = vor.u32 %v2177_v43, %v2176_v47 }
 0x1f9   : > { %v2039_v41 = vsel %vm9594_vm13, %v9325_v13, %v2036_v29  ;;  %v2183_v0 = vshrl.u32 %v11779_v36, %v2174_v48  ;;  %v2185_v49 = vshll.u32 %v11779_v36, %v2173_v23  ;;  %v2181_v32 = vor.u32 %v2180_v62, %v2179_v8 }
 0x1fa   : > { %7634 = vcosq.f32 %v2039_v41  ;;  %v7182_v58 = vmin.u32 %v2121_v46, %v9642_v22  ;;  %v2186_v9 = vshrl.u32 %v11790_v50, %v2174_v48  ;;  %v2188_v42 = vshll.u32 %v11790_v50, %v2173_v23 }
 0x1fb   : > { %7636 = vsinq.f32 %v2039_v41  ;;  %v2184_v44 = vor.u32 %v2183_v0, %v2182_v39  ;;  %v2189_v29 = vshrl.u32 %v11780_v27, %v2174_v48  ;;  %vm2191_vm3 = vcmp.lt.s32.totalorder %v2172_v20, 1 }
 0x1fc   : > { %v2111_v38 = vadd.s32 %v9575_v5, %v9581_v30  ;;  %v2123_v47 = vclz %v7182_v58  ;;  %v9663_v43 = vshll.u32 %v2167_v34, 8  ;;  %v7189_v59 = vadd.s32 4294967169, %v2267_v26 }
 0x1fd   : > { %v2187_v25 = vor.u32 %v2186_v9, %v2185_v49  ;;  %v2190_v41 = vor.u32 %v2189_v29, %v2188_v42  ;;  %vm2192_vm11 = vcmp.lt.s32.totalorder %v2172_v20, 2  ;;  %vm2193_vm13 = vcmp.lt.s32.totalorder %v2172_v20, 3 }
 0x1fe   : > { %vm2057_vm5 = vcmp.lt.s32.totalorder %v9468_v4, 0  ;;  %v7183_v62 = vadd.s32 4294967294, %v2123_v47  ;;  %vm2194_vm9 = vcmp.lt.s32.totalorder %v2172_v20, 4  ;;  %v2195_v0 = vsel %vm2191_vm3, %v2175_v52, %v2178_v51 }
 0x1ff   : > { %v2199_v23 = vsel %vm2191_vm3, %v2178_v51, %v2181_v32  ;;  %v2196_v48 = vsel %vm2194_vm9, %v2184_v44, 2102212464  ;;  %v2200_v8 = vsel %vm2194_vm9, %v2187_v25, 920167782  ;;  %v2203_v5 = vsel %vm2191_vm3, %v2181_v32, %v2184_v44 }
 0x200   : > { %v2204_v30 = vsel %vm2194_vm9, %v2190_v41, 1326507024  ;;  %vm7184_vm1 = vcmp.lt.s32.totalorder %v7183_v62, 0  ;;  %v2197_v34 = vsel %vm2193_vm13, %v2181_v32, %v2196_v48  ;;  %v2201_v39 = vsel %vm2193_vm13, %v2184_v44, %v2200_v8 }
 0x201   : > { %v2205_v9 = vsel %vm2193_vm13, %v2187_v25, %v2204_v30  ;;  %vm11643_vm0 = vweird.f32 %v9325_v13  ;;  %v11856_v46 = vand.u32 2147483647, %v9468_v4  ;;  %v2126_v52 = vsel %vm7184_vm1, 0, %v7183_v62 }
 0x202   : > { %v2141_v51 = vsub.s32 4, %v9622_v7  ;;  %v2202_v49 = vsel %vm2192_vm11, %v2199_v23, %v2201_v39  ;;  %v2206_v58 = vsel %vm2192_vm11, %v2203_v5, %v2205_v9  ;;  %v2127_v42 = vsub.s32 32, %v2126_v52 }
 0x203   : > { %vm9672_vm10 = vcmp.le.f32.partialorder %v11856_v46, 0.7853982  ;;  %v2128_v32 = vshll.u32 %v9642_v22, %v2126_v52  ;;  %v2131_v44 = vsub.s32 4294967266, %v2126_v52  ;;  %v2198_v25 = vsel %vm2192_vm11, %v2195_v0, %v2197_v34 }
 0x204   : > { %v9682_v29 = vmul.u32.u64.low %v9663_v43, %v2206_v58  ;;  %v9683_v47 = vmul.u32.u64.high %v9663_v43, %v2206_v58, %v9682_v29  ;;  %v9686_v41 = vmul.u32.u64.low %v9663_v43, %v2202_v49  ;;  %v9687_v48 = vmul.u32.u64.high %v9663_v43, %v2202_v49, %v9686_v41 }
 0x205   : > { %vm2046_vm3 = vcmp.lt.s32.totalorder %v9638_v63, 2  ;;  %v2129_v62 = vshrl.u32 %v2111_v38, %v2127_v42  ;;  %v2132_v23 = vadd.s32 127, %v2131_v44  ;;  %v2273_v8 = vadd.s32 1, %v7189_v59 }
 0x206   : > { %vm2047_vm13 = vcmp.eq.s32.totalorder %v9638_v63, 0  ;;  %vm2050_vm9 = vcmp.eq.s32.totalorder %v9638_v63, 2  ;;  %v11636_v22 = vand.u32 2147483647, %v9615_v14  ;;  %v203_v20 = vcvt.s32.f32 %v9631_v45 }
 0x207   : > { %v9695_v0 = vpop.eup %7634  ;;  %v2130_v5 = vor.u32 %v2129_v62, %v2128_v32  ;;  %v2133_v30 = vshll.u32 %v2132_v23, 23  ;;  %v2214_v34 = vmul.u32 %v9663_v43, %v2198_v25  ;;  %vm2274_vm11 = vcmp.gt.s32.totalorder %v2273_v8, 0 }
 0x208   : > { %11859 = vst [vmem:[#allocation63_spill] sm:$0xff] %v9695_v0  ;;  %v9698_v39 = vpop.eup %7636  ;;  %v11634_v38 = vxor.u32 2147483648, %v9695_v0  ;;  %v2142_v59 = vsel %vm2057_vm5, %v2141_v51, %v9622_v7  ;;  %vm2216_vm1 = vc.u32 %v9683_v47, %v9686_v41  ;;  %v2217_v45 = vadd.s32 1, %v9687_v48 }
 0x209   : > { %11860 = vst [vmem:[#allocation64_spill] sm:$0xff] %v9698_v39  ;;  %v11635_v9 = vxor.u32 2147483648, %v9698_v39  ;;  %v2134_v46 = vor.u32 4788187, %v2133_v30  ;;  %v2137_v52 = vcvt.s32.f32 %v2130_v5  ;;  %v2275_v49 = vsel %vm2274_vm11, %v2273_v8, 0 }
 0x20a   : > { %v2052_v43 = vsel %vm2050_vm9, %v11634_v38, %v9698_v39  ;;  %v2218_v58 = vsel %vm2216_vm1, %v2217_v45, %v9687_v48  ;;  %v2270_v7 = vand.u32 8388607, %v11636_v22  ;;  %v2277_v51 = vand.u32 31, %v2275_v49 }
 0x20b   : > { %v2049_v42 = vsel %vm2047_vm13, %v9695_v0, %v11635_v9  ;;  %v2135_v32 = vand.u32 2147483647, %v2134_v46  ;;  %v9723_v44 = vsel %vm9672_vm10, 0, %v2142_v59  ;;  %v2219_v25 = vadd.s32 %v2218_v58, %v2214_v34 }
 0x20c   : > { %11861 = vst [vmem:[#allocation65_spill] sm:$0xff] %v9723_v44  ;;  %v2053_v29 = vsel %vm2046_vm3, %v2049_v42, %v2052_v43  ;;  %v2276_v48 = vshrl.u32 %v2275_v49, 5  ;;  %v2278_v62 = vsub.s32 32, %v2277_v51  ;;  %v2280_v23 = vshll.u32 %v11781_v54, %v2277_v51 }
 0x20d   : > { %v2054_v8 = vsel %vm11643_vm0, nan, %v2053_v29  ;;  %v2138_v5 = vmul.f32 %v2137_v52, %v2135_v32  ;;  %v2220_v30 = vadd.s32 536870912, %v2219_v25  ;;  %v2283_v45 = vshll.u32 %v11789_v60, %v2277_v51 }
 0x20e   : > { %3631 = vst [vmem:[%s8258_s4 + $0x80] sm:$0xff] %v2054_v8  ;;  %v2281_v46 = vshrl.u32 %v11789_v60, %v2278_v62  ;;  %v2284_v59 = vshrl.u32 %v11778_v21, %v2278_v62  ;;  %v2286_v34 = vshll.u32 %v11778_v21, %v2277_v51  ;;  %v2287_v63 = vshrl.u32 %v11779_v36, %v2278_v62 }
 0x20f   : > { %v2139_v49 = vxor.u32 2147483648, %v2138_v5  ;;  %v2221_v43 = vshrl.u32 %v2220_v30, 30  ;;  %v2289_v58 = vshll.u32 %v11779_v36, %v2277_v51  ;;  %v2290_v42 = vshrl.u32 %v11790_v50, %v2278_v62 }
 0x210   : > { %v2148_v52 = vadd.s32 3, %v9723_v44  ;;  %v2271_v32 = vor.u32 8388608, %v2270_v7  ;;  %v2292_v29 = vshll.u32 %v11790_v50, %v2277_v51  ;;  %v236_v8 = vadd.f32 %v7920_v2, %v203_v20 }
 0x211   : > { %v2140_v38 = vsel %vm2057_vm5, %v2139_v49, %v2138_v5  ;;  %v2222_v9 = vshll.u32 %v2221_v43, 30  ;;  %v2279_v22 = vshrl.u32 %v11781_v54, %v2278_v62  ;;  %v2282_v13 = vor.u32 %v2281_v46, %v2280_v23 }
 0x212   : > { %v2143_v30 = vsel %vm9672_vm10, %v9468_v4, %v2140_v38  ;;  %v2285_v0 = vor.u32 %v2284_v59, %v2283_v45  ;;  %v2291_v39 = vor.u32 %v2290_v42, %v2289_v58  ;;  %v2293_v44 = vshrl.u32 %v11780_v27, %v2278_v62 }
 0x213   : > { %7638 = vcosq.f32 %v2143_v30  ;;  %v9748_v7 = vsub.s32 %v2219_v25, %v2222_v9  ;;  %v2288_v51 = vor.u32 %v2287_v63, %v2286_v34  ;;  %vm2295_vm3 = vcmp.lt.s32.totalorder %v2276_v48, 1 }
 0x214   : > { %7640 = vsinq.f32 %v2143_v30  ;;  %v2294_v20 = vor.u32 %v2293_v44, %v2292_v29  ;;  %vm2297_vm5 = vcmp.lt.s32.totalorder %v2276_v48, 3  ;;  %vm2298_vm13 = vcmp.lt.s32.totalorder %v2276_v48, 4 }
 0x215   : > { %v2225_v5 = vsub.s32 0, %v9748_v7  ;;  %vm2296_vm9 = vcmp.lt.s32.totalorder %v2276_v48, 2  ;;  %v2300_v23 = vsel %vm2298_vm13, %v2288_v51, 2102212464  ;;  %v9751_v46 = vand.u32 3, %v2148_v52 }
 0x216   : > { %v2303_v26 = vsel %vm2295_vm3, %v2282_v13, %v2285_v0  ;;  %v2304_v38 = vsel %vm2298_vm13, %v2291_v39, 920167782  ;;  %v2311_v45 = vshll.u32 %v2271_v32, 8  ;;  %v2299_v9 = vsel %vm2295_vm3, %v2279_v22, %v2282_v13 }
 0x217   : > { %v7186_v62 = vmin.u32 %v2225_v5, %v9748_v7  ;;  %v2305_v25 = vsel %vm2297_vm5, %v2288_v51, %v2304_v38  ;;  %v9758_v44 = vmul.f32 %v9612_v57, %v236_v8  ;;  %v2301_v59 = vsel %vm2297_vm5, %v2285_v0, %v2300_v23 }
 0x218   : > { %v2306_v34 = vsel %vm2296_vm9, %v2303_v26, %v2305_v25  ;;  %v2307_v63 = vsel %vm2295_vm3, %v2285_v0, %v2288_v51  ;;  %v2308_v49 = vsel %vm2298_vm13, %v2294_v20, 1326507024  ;;  %v2245_v42 = vsub.s32 4, %v2221_v43 }
 0x219   : > { %11862 = vst [vmem:[#allocation66_spill] sm:$0xff] %v9758_v44  ;;  %v2227_v58 = vclz %v7186_v62  ;;  %v172_v52 = vadd.s32 168, %v7918_v1  ;;  %vm2161_vm10 = vcmp.lt.s32.totalorder %v9552_v35, 0  ;;  %v2309_v13 = vsel %vm2297_vm5, %v2291_v39, %v2308_v49 }
 0x21a   : > { %v9766_v22 = vmul.u32.u64.low %v2311_v45, %v2306_v34  ;;  %v9767_v32 = vmul.u32.u64.high %v2311_v45, %v2306_v34, %v9766_v22  ;;  %vm11652_vm11 = vweird.f32 %v9468_v4  ;;  %v2302_v8 = vsel %vm2296_vm9, %v2299_v9, %v2301_v59 }
 0x21b   : > { %v7187_v29 = vadd.s32 4294967294, %v2227_v58  ;;  %v2310_v30 = vsel %vm2296_vm9, %v2307_v63, %v2309_v13  ;;  %v2370_v0 = vand.u32 2139095040, %v9758_v44  ;;  %vm2150_vm1 = vcmp.lt.s32.totalorder %v9751_v46, 2 }
 0x21c   : > { %v11863_v51 = vand.u32 2147483647, %v9552_v35  ;;  %v9780_v39 = vmul.u32.u64.low %v2311_v45, %v2310_v30  ;;  %v9781_v5 = vmul.u32.u64.high %v2311_v45, %v2310_v30, %v9780_v39  ;;  %v2215_v23 = vadd.s32 %v9686_v41, %v9683_v47 }
 0x21d   : > { %vm7188_vm5 = vcmp.lt.s32.totalorder %v7187_v29, 0  ;;  %v2246_v48 = vsel %vm2161_vm10, %v2245_v42, %v2221_v43  ;;  %v2371_v26 = vshrl.u32 %v2370_v0, 23  ;;  %vm2151_vm13 = vcmp.eq.s32.totalorder %v9751_v46, 0 }
 0x21e   : > { %vm9776_vm3 = vcmp.le.f32.partialorder %v11863_v51, 0.7853982  ;;  %v2230_v38 = vsel %vm7188_vm5, 0, %v7187_v29  ;;  %v2318_v62 = vmul.u32 %v2311_v45, %v2302_v8  ;;  %v2321_v9 = vadd.s32 1, %v9767_v32 }
 0x21f   : > { %v2231_v25 = vsub.s32 32, %v2230_v38  ;;  %v2232_v59 = vshll.u32 %v9748_v7, %v2230_v38  ;;  %v2235_v34 = vsub.s32 4294967266, %v2230_v38  ;;  %v7193_v63 = vadd.s32 4294967169, %v2371_v26 }
 0x220   : > { %v9790_v49 = vpop.eup %7638  ;;  %vm2154_vm9 = vcmp.eq.s32.totalorder %v9751_v46, 2  ;;  %v9795_v47 = vsel %vm9776_vm3, 0, %v2246_v48  ;;  %vm2320_vm0 = vc.u32 %v9781_v5, %v9766_v22  ;;  %v11646_v41 = vand.u32 2147483647, %v9758_v44 }
 0x221   : > { %11866 = vst [vmem:[#allocation67_spill] sm:$0xff] %v9790_v49  ;;  %11867 = vst [vmem:[#allocation68_spill] sm:$0xff] %v9795_v47  ;;  %v9799_v43 = vpop.eup %7640  ;;  %v11644_v45 = vxor.u32 2147483648, %v9790_v49  ;;  %v2233_v58 = vshrl.u32 %v2215_v23, %v2231_v25  ;;  %v2236_v7 = vadd.s32 127, %v2235_v34  ;;  %v2322_v42 = vsel %vm2320_vm0, %v2321_v9, %v9767_v32 }
 0x222   : > { %11868 = vst [vmem:[#allocation69_spill] sm:$0xff] %v9799_v43  ;;  %v11645_v13 = vxor.u32 2147483648, %v9799_v43  ;;  %v2323_v29 = vadd.s32 %v2322_v42, %v2318_v62  ;;  %v2377_v8 = vadd.s32 1, %v7193_v63  ;;  %v204_v30 = vcvt.s32.f32 %v172_v52 }
 0x223   : > { %v2156_v0 = vsel %vm2154_vm9, %v11644_v45, %v9799_v43  ;;  %v2234_v51 = vor.u32 %v2233_v58, %v2232_v59  ;;  %v2237_v39 = vshll.u32 %v2236_v7, 23  ;;  %v2252_v48 = vadd.s32 3, %v9795_v47 }
 0x224   : > { %v2153_v32 = vsel %vm2151_vm13, %v9790_v49, %v11645_v13  ;;  %v2324_v23 = vadd.s32 536870912, %v2323_v29  ;;  %v2374_v26 = vand.u32 8388607, %v11646_v41  ;;  %vm2378_vm0 = vcmp.gt.s32.totalorder %v2377_v8, 0 }
 0x225   : > { %v2157_v52 = vsel %vm2150_vm1, %v2153_v32, %v2156_v0  ;;  %v2238_v38 = vor.u32 4788187, %v2237_v39  ;;  %v2241_v62 = vcvt.s32.f32 %v2234_v51  ;;  %v2379_v9 = vsel %vm2378_vm0, %v2377_v8, 0 }
 0x226   : > { %v2158_v25 = vsel %vm11652_vm11, nan, %v2157_v52  ;;  %v9819_v59 = vshrl.u32 %v2324_v23, 30  ;;  %v2381_v34 = vand.u32 31, %v2379_v9  ;;  %v9822_v58 = vand.u32 3, %v2252_v48 }
 0x227   : > { %3632 = vst [vmem:[%s8258_s4 + $0x88] sm:$0xff] %v2158_v25  ;;  %v2239_v63 = vand.u32 2147483647, %v2238_v38  ;;  %v2375_v42 = vor.u32 8388608, %v2374_v26  ;;  %v237_v46 = vadd.f32 %v7920_v2, %v204_v30  ;;  %v2319_v51 = vadd.s32 %v9766_v22, %v9781_v5 }
 0x228   : > { %v2326_v7 = vshll.u32 %v9819_v59, 30  ;;  %v2382_v45 = vsub.s32 32, %v2381_v34  ;;  %v2380_v8 = vshrl.u32 %v2379_v9, 5  ;;  %v2384_v39 = vshll.u32 %v11781_v54, %v2381_v34 }
 0x229   : > { %v2242_v0 = vmul.f32 %v2241_v62, %v2239_v63  ;;  %v2387_v52 = vshll.u32 %v11789_v60, %v2381_v34  ;;  %v2390_v48 = vshll.u32 %v11778_v21, %v2381_v34  ;;  %v2393_v30 = vshll.u32 %v11779_v36, %v2381_v34 }
 0x22a   : > { %v9828_v32 = vsub.s32 %v2323_v29, %v2326_v7  ;;  %v2385_v23 = vshrl.u32 %v11789_v60, %v2382_v45  ;;  %v2388_v26 = vshrl.u32 %v11778_v21, %v2382_v45  ;;  %v2391_v25 = vshrl.u32 %v11779_v36, %v2382_v45 }
 0x22b   : > { %v2243_v38 = vxor.u32 2147483648, %v2242_v0  ;;  %v2394_v5 = vshrl.u32 %v11790_v50, %v2382_v45  ;;  %v9838_v62 = vshll.u32 %v2375_v42, 8  ;;  %v9841_v29 = vmul.f32 %v9612_v57, %v237_v46 }
 0x22c   : > { %v2329_v22 = vsub.s32 0, %v9828_v32  ;;  %v2383_v63 = vshrl.u32 %v11781_v54, %v2382_v45  ;;  %v2386_v7 = vor.u32 %v2385_v23, %v2384_v39  ;;  %v2396_v13 = vshll.u32 %v11790_v50, %v2381_v34 }
 0x22d   : > { %11869 = vst [vmem:[#allocation70_spill] sm:$0xff] %v9841_v29  ;;  %v2244_v9 = vsel %vm2161_vm10, %v2243_v38, %v2242_v0  ;;  %v2389_v49 = vor.u32 %v2388_v26, %v2387_v52  ;;  %v2392_v42 = vor.u32 %v2391_v25, %v2390_v48  ;;  %v2395_v43 = vor.u32 %v2394_v5, %v2393_v30 }
 0x22e   : > { %v2247_v41 = vsel %vm9776_vm3, %v9552_v35, %v2244_v9  ;;  %v7190_v4 = vmin.u32 %v2329_v22, %v9828_v32  ;;  %v2397_v46 = vshrl.u32 %v11780_v27, %v2382_v45  ;;  %vm2399_vm1 = vcmp.lt.s32.totalorder %v2380_v8, 1 }
 0x22f   : > { %7642 = vcosq.f32 %v2247_v41  ;;  %vm2265_vm10 = vcmp.lt.s32.totalorder %v9615_v14, 0  ;;  %v11654_v39 = vand.u32 2147483647, %v9841_v29  ;;  %v2474_v34 = vand.u32 2139095040, %v9841_v29 }
 0x230   : > { %7644 = vsinq.f32 %v2247_v41  ;;  %v2331_v0 = vclz %v7190_v4  ;;  %v2398_v23 = vor.u32 %v2397_v46, %v2396_v13  ;;  %vm2400_vm5 = vcmp.lt.s32.totalorder %v2380_v8, 2 }
 0x231   : > { %vm2401_vm3 = vcmp.lt.s32.totalorder %v2380_v8, 3  ;;  %vm2402_vm13 = vcmp.lt.s32.totalorder %v2380_v8, 4  ;;  %v2403_v52 = vsel %vm2399_vm1, %v2383_v63, %v2386_v7  ;;  %v2407_v38 = vsel %vm2399_vm1, %v2386_v7, %v2389_v49 }
 0x232   : > { %v7191_v20 = vadd.s32 4294967294, %v2331_v0  ;;  %v2404_v48 = vsel %vm2402_vm13, %v2392_v42, 2102212464  ;;  %v2408_v26 = vsel %vm2402_vm13, %v2395_v43, 920167782  ;;  %v2411_v41 = vsel %vm2399_vm1, %v2389_v49, %v2392_v42 }
 0x233   : > { %v2405_v45 = vsel %vm2401_vm3, %v2389_v49, %v2404_v48  ;;  %v2412_v25 = vsel %vm2402_vm13, %v2398_v23, 1326507024  ;;  %v2349_v4 = vsub.s32 4, %v9819_v59  ;;  %v2409_v30 = vsel %vm2401_vm3, %v2392_v42, %v2408_v26 }
 0x234   : > { %vm7192_vm9 = vcmp.lt.s32.totalorder %v7191_v20, 0  ;;  %v2413_v22 = vsel %vm2401_vm3, %v2395_v43, %v2412_v25  ;;  %v2406_v5 = vsel %vm2400_vm5, %v2403_v52, %v2405_v45  ;;  %v2410_v9 = vsel %vm2400_vm5, %v2407_v38, %v2409_v30 }
 0x235   : > { %v2334_v13 = vsel %vm7192_vm9, 0, %v7191_v20  ;;  %v2414_v63 = vsel %vm2400_vm5, %v2411_v41, %v2413_v22  ;;  %v2475_v48 = vshrl.u32 %v2474_v34, 23  ;;  %vm11663_vm0 = vweird.f32 %v9552_v35 }
 0x236   : > { %v2335_v46 = vsub.s32 32, %v2334_v13  ;;  %v2336_v7 = vshll.u32 %v9828_v32, %v2334_v13  ;;  %v2339_v0 = vsub.s32 4294967266, %v2334_v13  ;;  %v11870_v20 = vand.u32 2147483647, %v9615_v14 }
 0x237   : > { %v9865_v49 = vmul.u32.u64.low %v9838_v62, %v2414_v63  ;;  %v9866_v23 = vmul.u32.u64.high %v9838_v62, %v2414_v63, %v9865_v49  ;;  %v9869_v43 = vmul.u32.u64.low %v9838_v62, %v2410_v9  ;;  %v9870_v42 = vmul.u32.u64.high %v9838_v62, %v2410_v9, %v9869_v43 }
 0x238   : > { %vm9875_vm1 = vcmp.le.f32.partialorder %v11870_v20, 0.7853982  ;;  %v2337_v32 = vshrl.u32 %v2319_v51, %v2335_v46  ;;  %v2340_v52 = vadd.s32 127, %v2339_v0  ;;  %v7197_v34 = vadd.s32 4294967169, %v2475_v48 }
 0x239   : > { %vm2254_vm5 = vcmp.lt.s32.totalorder %v9822_v58, 2  ;;  %v2350_v38 = vsel %vm2265_vm10, %v2349_v4, %v9819_v59  ;;  %v173_v45 = vadd.s32 176, %v7918_v1  ;;  %v9885_v26 = vadd.s32 184, %v7918_v1 }
 0x23a   : > { %v2338_v41 = vor.u32 %v2337_v32, %v2336_v7  ;;  %v2341_v25 = vshll.u32 %v2340_v52, 23  ;;  %v2422_v30 = vmul.u32 %v9838_v62, %v2406_v5  ;;  %v2481_v22 = vadd.s32 1, %v7197_v34 }
 0x23b   : > { %vm2258_vm3 = vcmp.eq.s32.totalorder %v9822_v58, 2  ;;  %vm2424_vm13 = vc.u32 %v9866_v23, %v9869_v43  ;;  %v2425_v51 = vadd.s32 1, %v9870_v42  ;;  %v2478_v59 = vand.u32 8388607, %v11654_v39 }
 0x23c   : > { %v9894_v4 = vpop.eup %7642  ;;  %v2342_v13 = vor.u32 4788187, %v2341_v25  ;;  %v2345_v9 = vcvt.s32.f32 %v2338_v41  ;;  %v9898_v63 = vsel %vm9875_vm1, 0, %v2350_v38  ;;  %vm2482_vm9 = vcmp.gt.s32.totalorder %v2481_v22, 0 }
 0x23d   : > { %11873 = vst [vmem:[#allocation71_spill] sm:$0xff] %v9894_v4  ;;  %11874 = vst [vmem:[#allocation72_spill] sm:$0xff] %v9898_v63  ;;  %v9900_v62 = vpop.eup %7644  ;;  %vm2255_vm11 = vcmp.eq.s32.totalorder %v9822_v58, 0  ;;  %v11653_v5 = vxor.u32 2147483648, %v9894_v4  ;;  %v2426_v46 = vsel %vm2424_vm13, %v2425_v51, %v9870_v42  ;;  %v2483_v7 = vsel %vm2482_vm9, %v2481_v22, 0 }
 0x23e   : > { %11875 = vst [vmem:[#allocation73_spill] sm:$0xff] %v9900_v62  ;;  %v11655_v0 = vxor.u32 2147483648, %v9900_v62  ;;  %v2343_v48 = vand.u32 2147483647, %v2342_v13  ;;  %v2427_v49 = vadd.s32 %v2426_v46, %v2422_v30  ;;  %v205_v20 = vcvt.s32.f32 %v173_v45 }
 0x23f   : > { %v2260_v32 = vsel %vm2258_vm3, %v11653_v5, %v9900_v62  ;;  %v2356_v52 = vadd.s32 3, %v9898_v63  ;;  %v2485_v34 = vand.u32 31, %v2483_v7  ;;  %v206_v38 = vcvt.s32.f32 %v9885_v26 }
 0x240   : > { %v2257_v42 = vsel %vm2255_vm11, %v9894_v4, %v11655_v0  ;;  %v2346_v41 = vmul.f32 %v2345_v9, %v2343_v48  ;;  %v2428_v25 = vadd.s32 536870912, %v2427_v49  ;;  %v2479_v30 = vor.u32 8388608, %v2478_v59 }
 0x241   : > { %v2261_v45 = vsel %vm2254_vm5, %v2257_v42, %v2260_v32  ;;  %v2484_v22 = vshrl.u32 %v2483_v7, 5  ;;  %v2486_v51 = vsub.s32 32, %v2485_v34  ;;  %v2488_v13 = vshll.u32 %v11781_v54, %v2485_v34 }
 0x242   : > { %v2262_v46 = vsel %vm11663_vm0, nan, %v2261_v45  ;;  %v2347_v5 = vxor.u32 2147483648, %v2346_v41  ;;  %v2429_v39 = vshrl.u32 %v2428_v25, 30  ;;  %v2491_v26 = vshll.u32 %v11789_v60, %v2485_v34 }
 0x243   : > { %3633 = vst [vmem:[%s8258_s4 + $0x90] sm:$0xff] %v2262_v46  ;;  %v2489_v0 = vshrl.u32 %v11789_v60, %v2486_v51  ;;  %v2492_v9 = vshrl.u32 %v11778_v21, %v2486_v51  ;;  %v2494_v59 = vshll.u32 %v11778_v21, %v2485_v34  ;;  %v2495_v58 = vshrl.u32 %v11779_v36, %v2486_v51 }
 0x244   : > { %v2348_v7 = vsel %vm2265_vm10, %v2347_v5, %v2346_v41  ;;  %v2430_v48 = vshll.u32 %v2429_v39, 30  ;;  %v2497_v32 = vshll.u32 %v11779_v36, %v2485_v34  ;;  %v238_v42 = vadd.f32 %v7920_v2, %v205_v20 }
 0x245   : > { %v2351_v25 = vsel %vm9875_vm1, %v9615_v14, %v2348_v7  ;;  %v2487_v45 = vshrl.u32 %v11781_v54, %v2486_v51  ;;  %v2490_v46 = vor.u32 %v2489_v0, %v2488_v13  ;;  %vm2503_vm11 = vcmp.lt.s32.totalorder %v2484_v22, 1 }
 0x246   : > { %7646 = vcosq.f32 %v2351_v25  ;;  %v9935_v35 = vsub.s32 %v2427_v49, %v2430_v48  ;;  %v2493_v4 = vor.u32 %v2492_v9, %v2491_v26  ;;  %v2498_v62 = vshrl.u32 %v11790_v50, %v2486_v51 }
 0x247   : > { %7648 = vsinq.f32 %v2351_v25  ;;  %v2496_v5 = vor.u32 %v2495_v58, %v2494_v59  ;;  %v2500_v41 = vshll.u32 %v11790_v50, %v2485_v34  ;;  %v2501_v20 = vshrl.u32 %v11780_v27, %v2486_v51 }
 0x248   : > { %v2433_v63 = vsub.s32 0, %v9935_v35  ;;  %v2499_v8 = vor.u32 %v2498_v62, %v2497_v32  ;;  %v2519_v7 = vshll.u32 %v2479_v30, 8  ;;  %v9942_v47 = vmul.f32 %v9612_v57, %v238_v42 }
 0x249   : > { %v2502_v0 = vor.u32 %v2501_v20, %v2500_v41  ;;  %vm2504_vm10 = vcmp.lt.s32.totalorder %v2484_v22, 2  ;;  %vm2505_vm1 = vcmp.lt.s32.totalorder %v2484_v22, 3  ;;  %vm2506_vm5 = vcmp.lt.s32.totalorder %v2484_v22, 4 }
 0x24a   : > { %11876 = vst [vmem:[#allocation74_spill] sm:$0xff] %v9942_v47  ;;  %v11877_v49 = vand.u32 2147483647, %v9758_v44  ;;  %v7194_v34 = vmin.u32 %v2433_v63, %v9935_v35  ;;  %v2507_v51 = vsel %vm2503_vm11, %v2487_v45, %v2490_v46  ;;  %v2508_v26 = vsel %vm2506_vm5, %v2496_v5, 2102212464 }
 0x24b   : > { %v2511_v62 = vsel %vm2503_vm11, %v2490_v46, %v2493_v4  ;;  %v2509_v30 = vsel %vm2505_vm1, %v2493_v4, %v2508_v26  ;;  %v2512_v9 = vsel %vm2506_vm5, %v2499_v8, 920167782  ;;  %v2515_v59 = vsel %vm2503_vm11, %v2493_v4, %v2496_v5 }
 0x24c   : > { %vm9946_vm3 = vcmp.le.f32.partialorder %v11877_v49, 0.7853982  ;;  %v2516_v58 = vsel %vm2506_vm5, %v2502_v0, 1326507024  ;;  %v2357_v48 = vand.u32 3, %v2356_v52  ;;  %vm2369_vm13 = vcmp.lt.s32.totalorder %v9758_v44, 0 }
 0x24d   : > { %v2435_v32 = vclz %v7194_v34  ;;  %v2453_v42 = vsub.s32 4, %v2429_v39  ;;  %v2513_v25 = vsel %vm2505_vm1, %v2496_v5, %v2512_v9  ;;  %v2517_v63 = vsel %vm2505_vm1, %v2499_v8, %v2516_v58 }
 0x24e   : > { %v2578_v45 = vand.u32 2139095040, %v9942_v47  ;;  %v239_v41 = vadd.f32 %v7920_v2, %v206_v38  ;;  %vm11673_vm9 = vweird.f32 %v9615_v14  ;;  %v2510_v20 = vsel %vm2504_vm10, %v2507_v51, %v2509_v30 }
 0x24f   : > { %v7195_v46 = vadd.s32 4294967294, %v2435_v32  ;;  %v2514_v4 = vsel %vm2504_vm10, %v2511_v62, %v2513_v25  ;;  %v2518_v52 = vsel %vm2504_vm10, %v2515_v59, %v2517_v63  ;;  %v2423_v8 = vadd.s32 %v9869_v43, %v9866_v23 }
 0x250   : > { %v9964_v0 = vmul.u32.u64.low %v2519_v7, %v2518_v52  ;;  %v9965_v49 = vmul.u32.u64.high %v2519_v7, %v2518_v52, %v9964_v0  ;;  %v9967_v34 = vmul.u32.u64.low %v2519_v7, %v2514_v4  ;;  %v9968_v5 = vmul.u32.u64.high %v2519_v7, %v2514_v4, %v9967_v34 }
 0x251   : > { %vm7196_vm11 = vcmp.lt.s32.totalorder %v7195_v46, 0  ;;  %v2454_v38 = vsel %vm2369_vm13, %v2453_v42, %v2429_v39  ;;  %v2579_v26 = vshrl.u32 %v2578_v45, 23  ;;  %vm2359_vm1 = vcmp.eq.s32.totalorder %v2357_v48, 0 }
 0x252   : > { %vm2362_vm5 = vcmp.eq.s32.totalorder %v2357_v48, 2  ;;  %v2438_v51 = vsel %vm7196_vm11, 0, %v7195_v46  ;;  %v2526_v62 = vmul.u32 %v2519_v7, %v2510_v20  ;;  %v9979_v32 = vsel %vm9946_vm3, 0, %v2454_v38 }
 0x253   : > { %v2439_v22 = vsub.s32 32, %v2438_v51  ;;  %v2440_v30 = vshll.u32 %v9935_v35, %v2438_v51  ;;  %v2443_v9 = vsub.s32 4294967266, %v2438_v51  ;;  %v7201_v59 = vadd.s32 4294967169, %v2579_v26  ;;  %v9975_v58 = vpop.eup %7646  ;;  %11881 = vst [vmem:[#allocation76_spill] sm:$0xff] %v9979_v32 }
 0x254   : > { %11880 = vst [vmem:[#allocation75_spill] sm:$0xff] %v9975_v58  ;;  %vm2528_vm10 = vc.u32 %v9965_v49, %v9967_v34  ;;  %v2529_v39 = vadd.s32 1, %v9968_v5  ;;  %v9984_v23 = vmul.f32 %v9612_v57, %v239_v41  ;;  %v9986_v43 = vpop.eup %7648  ;;  %v11664_v7 = vxor.u32 2147483648, %v9975_v58 }
 0x255   : > { %11883 = vst [vmem:[#allocation78_spill] sm:$0xff] %v9986_v43  ;;  %v2441_v35 = vshrl.u32 %v2423_v8, %v2439_v22  ;;  %v2444_v42 = vadd.s32 127, %v2443_v9  ;;  %v2585_v25 = vadd.s32 1, %v7201_v59  ;;  %vm2358_vm11 = vcmp.lt.s32.totalorder %v2357_v48, 2 }
 0x256   : > { %11882 = vst [vmem:[#allocation77_spill] sm:$0xff] %v9984_v23  ;;  %v11665_v63 = vxor.u32 2147483648, %v9986_v43  ;;  %v2530_v45 = vsel %vm2528_vm10, %v2529_v39, %v9968_v5  ;;  %v11666_v46 = vand.u32 2147483647, %v9942_v47  ;;  %v2364_v57 = vsel %vm2362_vm5, %v11664_v7, %v9986_v43 }
 0x257   : > { %v2442_v41 = vor.u32 %v2441_v35, %v2440_v30  ;;  %v2445_v20 = vshll.u32 %v2444_v42, 23  ;;  %v2531_v4 = vadd.s32 %v2530_v45, %v2526_v62  ;;  %v2460_v0 = vadd.s32 3, %v9979_v32 }
 0x258   : > { %v2361_v52 = vsel %vm2359_vm1, %v9975_v58, %v11665_v63  ;;  %vm2586_vm0 = vcmp.gt.s32.totalorder %v2585_v25, 0  ;;  %v2682_v5 = vand.u32 2139095040, %v9984_v23  ;;  %v2582_v62 = vand.u32 8388607, %v11666_v46 }
 0x259   : > { %v2365_v8 = vsel %vm2358_vm11, %v2361_v52, %v2364_v57  ;;  %v2446_v38 = vor.u32 4788187, %v2445_v20  ;;  %v2449_v26 = vcvt.s32.f32 %v2442_v41  ;;  %v2532_v51 = vadd.s32 536870912, %v2531_v4 }
 0x25a   : > { %v2366_v22 = vsel %vm11673_vm9, nan, %v2365_v8  ;;  %v2587_v30 = vsel %vm2586_vm0, %v2585_v25, 0  ;;  %v10009_v39 = vand.u32 3, %v2460_v0  ;;  %v10013_v42 = vadd.s32 192, %v7918_v1 }
 0x25b   : > { %3634 = vst [vmem:[%s8258_s4 + $0x98] sm:$0xff] %v2366_v22  ;;  %v2447_v9 = vand.u32 2147483647, %v2446_v38  ;;  %v10007_v48 = vshrl.u32 %v2532_v51, 30  ;;  %v2589_v59 = vand.u32 31, %v2587_v30  ;;  %v2683_v20 = vshrl.u32 %v2682_v5, 23 }
 0x25c   : > { %v2527_v52 = vadd.s32 %v9967_v34, %v9965_v49  ;;  %v2583_v25 = vor.u32 8388608, %v2582_v62  ;;  %v2588_v63 = vshrl.u32 %v2587_v30, 5  ;;  %vm11698_vm9 = vweird.f32 %v9758_v44 }
 0x25d   : > { %v2450_v45 = vmul.f32 %v2449_v26, %v2447_v9  ;;  %v2534_v57 = vshll.u32 %v10007_v48, 30  ;;  %v2590_v41 = vsub.s32 32, %v2589_v59  ;;  %v2592_v8 = vshll.u32 %v11781_v54, %v2589_v59 }
 0x25e   : > { %v2595_v38 = vshll.u32 %v11789_v60, %v2589_v59  ;;  %v2598_v22 = vshll.u32 %v11778_v21, %v2589_v59  ;;  %v2601_v7 = vshll.u32 %v11779_v36, %v2589_v59  ;;  %vm2607_vm0 = vcmp.lt.s32.totalorder %v2588_v63, 1 }
 0x25f   : > { %v2451_v51 = vxor.u32 2147483648, %v2450_v45  ;;  %v10019_v0 = vsub.s32 %v2531_v4, %v2534_v57  ;;  %v2593_v26 = vshrl.u32 %v11789_v60, %v2590_v41  ;;  %v2596_v9 = vshrl.u32 %v11778_v21, %v2590_v41 }
 0x260   : > { %v2599_v5 = vshrl.u32 %v11779_v36, %v2590_v41  ;;  %v2602_v62 = vshrl.u32 %v11790_v50, %v2590_v41  ;;  %v7205_v4 = vadd.s32 4294967169, %v2683_v20  ;;  %v2591_v30 = vshrl.u32 %v11781_v54, %v2590_v41 }
 0x261   : > { %v2452_v49 = vsel %vm2369_vm13, %v2451_v51, %v2450_v45  ;;  %v2537_v34 = vsub.s32 0, %v10019_v0  ;;  %v2594_v46 = vor.u32 %v2593_v26, %v2592_v8  ;;  %v2597_v35 = vor.u32 %v2596_v9, %v2595_v38 }
 0x262   : > { %v2455_v57 = vsel %vm9946_vm3, %v9758_v44, %v2452_v49  ;;  %v2600_v58 = vor.u32 %v2599_v5, %v2598_v22  ;;  %v2603_v43 = vor.u32 %v2602_v62, %v2601_v7  ;;  %v2604_v45 = vshll.u32 %v11790_v50, %v2589_v59 }
 0x263   : > { %7650 = vcosq.f32 %v2455_v57  ;;  %v7198_v14 = vmin.u32 %v2537_v34, %v10019_v0  ;;  %v2605_v51 = vshrl.u32 %v11780_v27, %v2590_v41  ;;  %vm2473_vm13 = vcmp.lt.s32.totalorder %v9841_v29, 0 }
 0x264   : > { %7652 = vsinq.f32 %v2455_v57  ;;  %v2623_v13 = vshll.u32 %v2583_v25, 8  ;;  %v11884_v49 = vand.u32 2147483647, %v9984_v23  ;;  %v2689_v8 = vadd.s32 1, %v7205_v4 }
 0x265   : > { %v2539_v20 = vclz %v7198_v14  ;;  %v2606_v38 = vor.u32 %v2605_v51, %v2604_v45  ;;  %vm2608_vm3 = vcmp.lt.s32.totalorder %v2588_v63, 2  ;;  %vm2609_vm1 = vcmp.lt.s32.totalorder %v2588_v63, 3 }
 0x266   : > { %v10040_v32 = vand.u32 8388607, %v11884_v49  ;;  %vm2610_vm5 = vcmp.lt.s32.totalorder %v2588_v63, 4  ;;  %v2611_v22 = vsel %vm2607_vm0, %v2591_v30, %v2594_v46  ;;  %v2615_v41 = vsel %vm2607_vm0, %v2594_v46, %v2597_v35 }
 0x267   : > { %v7199_v7 = vadd.s32 4294967294, %v2539_v20  ;;  %v2612_v59 = vsel %vm2610_vm5, %v2600_v58, 2102212464  ;;  %v11885_v26 = vand.u32 2147483647, %v9841_v29  ;;  %v2619_v5 = vsel %vm2607_vm0, %v2597_v35, %v2600_v58 }
 0x268   : > { %v2613_v25 = vsel %vm2609_vm1, %v2597_v35, %v2612_v59  ;;  %v2616_v9 = vsel %vm2610_vm5, %v2603_v43, 920167782  ;;  %v2620_v34 = vsel %vm2610_vm5, %v2606_v38, 1326507024  ;;  %v2557_v62 = vsub.s32 4, %v10007_v48 }
 0x269   : > { %vm10046_vm10 = vcmp.le.f32.partialorder %v11885_v26, 0.7853982  ;;  %vm7200_vm11 = vcmp.lt.s32.totalorder %v7199_v7, 0  ;;  %v2617_v4 = vsel %vm2609_vm1, %v2600_v58, %v2616_v9  ;;  %v2621_v57 = vsel %vm2609_vm1, %v2603_v43, %v2620_v34 }
 0x26a   : > { %v2542_v30 = vsel %vm7200_vm11, 0, %v7199_v7  ;;  %v2614_v45 = vsel %vm2608_vm3, %v2611_v22, %v2613_v25  ;;  %v2618_v46 = vsel %vm2608_vm3, %v2615_v41, %v2617_v4  ;;  %v2622_v51 = vsel %vm2608_vm3, %v2619_v5, %v2621_v57 }
 0x26b   : > { %v2543_v20 = vsub.s32 32, %v2542_v30  ;;  %v2544_v49 = vshll.u32 %v10019_v0, %v2542_v30  ;;  %v2547_v59 = vsub.s32 4294967266, %v2542_v30  ;;  %vm2690_vm0 = vcmp.gt.s32.totalorder %v2689_v8, 0 }
 0x26c   : > { %v10057_v35 = vmul.u32.u64.low %v2623_v13, %v2622_v51  ;;  %v10058_v38 = vmul.u32.u64.high %v2623_v13, %v2622_v51, %v10057_v35  ;;  %v10060_v26 = vmul.u32.u64.low %v2623_v13, %v2618_v46  ;;  %v10061_v58 = vmul.u32.u64.high %v2623_v13, %v2618_v46, %v10060_v26 }
 0x26d   : > { %vm2462_vm1 = vcmp.lt.s32.totalorder %v10009_v39, 2  ;;  %v2545_v43 = vshrl.u32 %v2527_v52, %v2543_v20  ;;  %v2548_v7 = vadd.s32 127, %v2547_v59  ;;  %v2691_v63 = vsel %vm2690_vm0, %v2689_v8, 0 }
 0x26e   : > { %vm2463_vm3 = vcmp.eq.s32.totalorder %v10009_v39, 0  ;;  %vm2466_vm5 = vcmp.eq.s32.totalorder %v10009_v39, 2  ;;  %v2558_v0 = vsel %vm2473_vm13, %v2557_v62, %v10007_v48  ;;  %v2693_v22 = vand.u32 31, %v2691_v63 }
 0x26f   : > { %v2546_v41 = vor.u32 %v2545_v43, %v2544_v49  ;;  %v2549_v25 = vshll.u32 %v2548_v7, 23  ;;  %v2630_v9 = vmul.u32 %v2623_v13, %v2614_v45  ;;  %v2687_v5 = vor.u32 8388608, %v10040_v32 }
 0x270   : > { %v10071_v34 = vpop.eup %7650  ;;  %vm2632_vm11 = vc.u32 %v10058_v38, %v10060_v26  ;;  %v2633_v52 = vadd.s32 1, %v10061_v58  ;;  %v2694_v8 = vsub.s32 32, %v2693_v22  ;;  %v207_v4 = vcvt.s32.f32 %v10013_v42 }
 0x271   : > { %11888 = vst [vmem:[#allocation79_spill] sm:$0xff] %v10071_v34  ;;  %v10077_v57 = vpop.eup %7652  ;;  %v11674_v48 = vxor.u32 2147483648, %v10071_v34  ;;  %v2550_v62 = vor.u32 4788187, %v2549_v25  ;;  %v2553_v30 = vcvt.s32.f32 %v2546_v41  ;;  %v10082_v13 = vsel %vm10046_vm10, 0, %v2558_v0 }
 0x272   : > { %11889 = vst [vmem:[#allocation80_spill] sm:$0xff] %v10077_v57  ;;  %11890 = vst [vmem:[#allocation81_spill] sm:$0xff] %v10082_v13  ;;  %v11675_v32 = vxor.u32 2147483648, %v10077_v57  ;;  %v2634_v45 = vsel %vm2632_vm11, %v2633_v52, %v10061_v58  ;;  %v10086_v46 = vshrl.u32 %v2691_v63, 5  ;;  %v2696_v51 = vshll.u32 %v11781_v54, %v2693_v22 }
 0x273   : > { %v2468_v42 = vsel %vm2466_vm5, %v11674_v48, %v10077_v57  ;;  %v2551_v20 = vand.u32 2147483647, %v2550_v62  ;;  %v2635_v49 = vadd.s32 %v2634_v45, %v2630_v9  ;;  %v2697_v59 = vshrl.u32 %v11789_v60, %v2694_v8 }
 0x274   : > { %v2465_v35 = vsel %vm2463_vm3, %v10071_v34, %v11675_v32  ;;  %v2699_v58 = vshll.u32 %v11789_v60, %v2693_v22  ;;  %v2700_v43 = vshrl.u32 %v11778_v21, %v2694_v8  ;;  %v2702_v7 = vshll.u32 %v11778_v21, %v2693_v22 }
 0x275   : > { %v2469_v63 = vsel %vm2462_vm1, %v2465_v35, %v2468_v42  ;;  %v2554_v0 = vmul.f32 %v2553_v30, %v2551_v20  ;;  %v2636_v41 = vadd.s32 536870912, %v2635_v49  ;;  %v2703_v25 = vshrl.u32 %v11779_v36, %v2694_v8 }
 0x276   : > { %v2470_v9 = vsel %vm11698_vm9, nan, %v2469_v63  ;;  %v2705_v52 = vshll.u32 %v11779_v36, %v2693_v22  ;;  %v2706_v62 = vshrl.u32 %v11790_v50, %v2694_v8  ;;  %v240_v45 = vadd.f32 %v7920_v2, %v207_v4 }
 0x277   : > { %3635 = vst [vmem:[%s8258_s4 + $0xa0] sm:$0xff] %v2470_v9  ;;  %v2555_v48 = vxor.u32 2147483648, %v2554_v0  ;;  %v2637_v32 = vshrl.u32 %v2636_v41, 30  ;;  %v2695_v34 = vshrl.u32 %v11781_v54, %v2694_v8  ;;  %v2708_v39 = vshll.u32 %v11790_v50, %v2693_v22 }
 0x278   : > { %v2698_v30 = vor.u32 %v2697_v59, %v2696_v51  ;;  %v2701_v42 = vor.u32 %v2700_v43, %v2699_v58  ;;  %v2704_v20 = vor.u32 %v2703_v25, %v2702_v7  ;;  %v2709_v35 = vshrl.u32 %v11780_v27, %v2694_v8 }
 0x279   : > { %v2556_v63 = vsel %vm2473_vm13, %v2555_v48, %v2554_v0  ;;  %v2638_v44 = vshll.u32 %v2637_v32, 30  ;;  %v2707_v57 = vor.u32 %v2706_v62, %v2705_v52  ;;  %vm2711_vm0 = vcmp.lt.s32.totalorder %v10086_v46, 1 }
 0x27a   : > { %v2559_v4 = vsel %vm10046_vm10, %v9841_v29, %v2556_v63  ;;  %v2710_v41 = vor.u32 %v2709_v35, %v2708_v39  ;;  %vm2714_vm1 = vcmp.lt.s32.totalorder %v10086_v46, 4  ;;  %v2727_v22 = vshll.u32 %v2687_v5, 8 }
 0x27b   : > { %7654 = vcosq.f32 %v2559_v4  ;;  %v10122_v51 = vsub.s32 %v2635_v49, %v2638_v44  ;;  %vm2713_vm3 = vcmp.lt.s32.totalorder %v10086_v46, 3  ;;  %v2716_v8 = vsel %vm2714_vm1, %v2704_v20, 2102212464  ;;  %v10136_v49 = vld [vmem:[#allocation2] ss:$0 sm:$0xff] }
 0x27c   : > { %7656 = vsinq.f32 %v2559_v4  ;;  %v2564_v48 = vadd.s32 3, %v10082_v13  ;;  %vm2712_vm13 = vcmp.lt.s32.totalorder %v10086_v46, 2  ;;  %v2719_v14 = vsel %vm2711_vm0, %v2698_v30, %v2701_v42 }
 0x27d   : > { %v2641_v59 = vsub.s32 0, %v10122_v51  ;;  %v2715_v5 = vsel %vm2711_vm0, %v2695_v34, %v2698_v30  ;;  %v2720_v44 = vsel %vm2714_vm1, %v2707_v57, 920167782  ;;  %v10139_v58 = vmul.f32 %v10136_v49, %v240_v45 }
 0x27e   : > { %v2717_v43 = vsel %vm2713_vm3, %v2701_v42, %v2716_v8  ;;  %v2721_v7 = vsel %vm2713_vm3, %v2704_v20, %v2720_v44  ;;  %v2723_v0 = vsel %vm2711_vm0, %v2701_v42, %v2704_v20  ;;  %v2724_v34 = vsel %vm2714_vm1, %v2710_v41, 1326507024 }
 0x27f   : > { %11891 = vst [vmem:[#allocation82_spill] sm:$0xff] %v10139_v58  ;;  %v7202_v25 = vmin.u32 %v2641_v59, %v10122_v51  ;;  %v2661_v9 = vsub.s32 4, %v2637_v32  ;;  %v2722_v52 = vsel %vm2712_vm13, %v2719_v14, %v2721_v7  ;;  %v2725_v62 = vsel %vm2713_vm3, %v2707_v57, %v2724_v34 }
 0x280   : > { %v2726_v45 = vsel %vm2712_vm13, %v2723_v0, %v2725_v62  ;;  %v10156_v39 = vmul.u32.u64.low %v2727_v22, %v2722_v52  ;;  %v10157_v30 = vmul.u32.u64.high %v2727_v22, %v2722_v52, %v10156_v39  ;;  %v176_v42 = vadd.s32 200, %v7918_v1 }
 0x281   : > { %v2565_v20 = vand.u32 3, %v2564_v48  ;;  %v2643_v35 = vclz %v7202_v25  ;;  %v2718_v63 = vsel %vm2712_vm13, %v2715_v5, %v2717_v43  ;;  %vm2577_vm10 = vcmp.lt.s32.totalorder %v9942_v47, 0 }
 0x282   : > { %v10164_v4 = vmul.u32.u64.low %v2727_v22, %v2726_v45  ;;  %v10165_v41 = vmul.u32.u64.high %v2727_v22, %v2726_v45, %v10164_v4  ;;  %v11684_v57 = vand.u32 2147483647, %v10139_v58  ;;  %vm11697_vm5 = vweird.f32 %v9841_v29 }
 0x283   : > { %v7203_v8 = vadd.s32 4294967294, %v2643_v35  ;;  %v2662_v14 = vsel %vm2577_vm10, %v2661_v9, %v2637_v32  ;;  %v2786_v59 = vand.u32 2139095040, %v10139_v58  ;;  %v11892_v48 = vand.u32 2147483647, %v9942_v47 }
 0x284   : > { %v2734_v5 = vmul.u32 %v2727_v22, %v2718_v63  ;;  %v2737_v44 = vadd.s32 1, %v10157_v30  ;;  %v208_v43 = vcvt.s32.f32 %v176_v42  ;;  %vm2566_vm0 = vcmp.lt.s32.totalorder %v2565_v20, 2 }
 0x285   : > { %vm10174_vm11 = vcmp.le.f32.partialorder %v11892_v48, 0.7853982  ;;  %v2631_v7 = vadd.s32 %v10060_v26, %v10058_v38  ;;  %vm7204_vm1 = vcmp.lt.s32.totalorder %v7203_v8, 0  ;;  %v2787_v0 = vshrl.u32 %v2786_v59, 23 }
 0x286   : > { %v2646_v34 = vsel %vm7204_vm1, 0, %v7203_v8  ;;  %v10183_v32 = vsel %vm10174_vm11, 0, %v2662_v14  ;;  %vm2736_vm3 = vc.u32 %v10165_v41, %v10156_v39  ;;  %v2790_v22 = vand.u32 8388607, %v11684_v57 }
 0x287   : > { %11895 = vst [vmem:[#allocation83_spill] sm:$0xff] %v10183_v32  ;;  %v2647_v25 = vsub.s32 32, %v2646_v34  ;;  %v2648_v9 = vshll.u32 %v10122_v51, %v2646_v34  ;;  %v2651_v52 = vsub.s32 4294967266, %v2646_v34  ;;  %v2738_v62 = vsel %vm2736_vm3, %v2737_v44, %v10157_v30 }
 0x288   : > { %v10191_v38 = vpop.eup %7654  ;;  %vm2570_vm13 = vcmp.eq.s32.totalorder %v2565_v20, 2  ;;  %v2739_v26 = vadd.s32 %v2738_v62, %v2734_v5  ;;  %v7209_v45 = vadd.s32 4294967169, %v2787_v0  ;;  %v241_v42 = vadd.f32 %v7920_v2, %v208_v43 }
 0x289   : > { %11896 = vst [vmem:[#allocation84_spill] sm:$0xff] %v10191_v38  ;;  %v10194_v35 = vpop.eup %7656  ;;  %vm2567_vm1 = vcmp.eq.s32.totalorder %v2565_v20, 0  ;;  %v11681_v63 = vxor.u32 2147483648, %v10191_v38  ;;  %v2649_v4 = vshrl.u32 %v2631_v7, %v2647_v25  ;;  %v2652_v8 = vadd.s32 127, %v2651_v52 }
 0x28a   : > { %11897 = vst [vmem:[#allocation85_spill] sm:$0xff] %v10194_v35  ;;  %v11682_v14 = vxor.u32 2147483648, %v10194_v35  ;;  %v2668_v51 = vadd.s32 3, %v10183_v32  ;;  %v2740_v59 = vadd.s32 536870912, %v2739_v26  ;;  %v2793_v30 = vadd.s32 1, %v7209_v45 }
 0x28b   : > { %v2572_v48 = vsel %vm2570_vm13, %v11681_v63, %v10194_v35  ;;  %v2650_v5 = vor.u32 %v2649_v4, %v2648_v9  ;;  %v2653_v44 = vshll.u32 %v2652_v8, 23  ;;  %v2791_v43 = vor.u32 8388608, %v2790_v22 }
 0x28c   : > { %v2569_v0 = vsel %vm2567_vm1, %v10191_v38, %v11682_v14  ;;  %v10205_v7 = vshrl.u32 %v2740_v59, 30  ;;  %vm2794_vm3 = vcmp.gt.s32.totalorder %v2793_v30, 0  ;;  %v10208_v34 = vmul.f32 %v10136_v49, %v241_v42 }
 0x28d   : > { %v2573_v25 = vsel %vm2566_vm0, %v2569_v0, %v2572_v48  ;;  %v2654_v52 = vor.u32 4788187, %v2653_v44  ;;  %v2657_v62 = vcvt.s32.f32 %v2650_v5  ;;  %v2795_v45 = vsel %vm2794_vm3, %v2793_v30, 0 }
 0x28e   : > { %11898 = vst [vmem:[#allocation86_spill] sm:$0xff] %v10208_v34  ;;  %v2574_v9 = vsel %vm11697_vm5, nan, %v2573_v25  ;;  %v2742_v22 = vshll.u32 %v10205_v7, 30  ;;  %v11683_v4 = vand.u32 2147483647, %v10208_v34  ;;  %v2797_v59 = vand.u32 31, %v2795_v45 }
 0x28f   : > { %3636 = vst [vmem:[%s8258_s4 + $0xa8] sm:$0xff] %v2574_v9  ;;  %v2655_v8 = vand.u32 2147483647, %v2654_v52  ;;  %v10217_v63 = vadd.s32 208, %v7918_v1  ;;  %v10219_v42 = vand.u32 3, %v2668_v51  ;;  %v2735_v20 = vadd.s32 %v10156_v39, %v10165_v41 }
 0x290   : > { %v10223_v48 = vsub.s32 %v2739_v26, %v2742_v22  ;;  %v10225_v30 = vshll.u32 %v2791_v43, 8  ;;  %v2798_v44 = vsub.s32 32, %v2797_v59  ;;  %v2800_v0 = vshll.u32 %v11781_v54, %v2797_v59 }
 0x291   : > { %v2658_v5 = vmul.f32 %v2657_v62, %v2655_v8  ;;  %v2890_v25 = vand.u32 2139095040, %v10208_v34  ;;  %v2796_v9 = vshrl.u32 %v2795_v45, 5  ;;  %v2803_v14 = vshll.u32 %v11789_v60, %v2797_v59 }
 0x292   : > { %v2745_v52 = vsub.s32 0, %v10223_v48  ;;  %v10233_v51 = vand.u32 8388607, %v11683_v4  ;;  %v2801_v41 = vshrl.u32 %v11789_v60, %v2798_v44  ;;  %v2804_v26 = vshrl.u32 %v11778_v21, %v2798_v44 }
 0x293   : > { %v2659_v39 = vxor.u32 2147483648, %v2658_v5  ;;  %v2806_v43 = vshll.u32 %v11778_v21, %v2797_v59  ;;  %vm2681_vm0 = vcmp.lt.s32.totalorder %v9984_v23, 0  ;;  %v2765_v22 = vsub.s32 4, %v10205_v7 }
 0x294   : > { %v7206_v62 = vmin.u32 %v2745_v52, %v10223_v48  ;;  %v2807_v45 = vshrl.u32 %v11779_v36, %v2798_v44  ;;  %v2809_v8 = vshll.u32 %v11779_v36, %v2797_v59  ;;  %v2802_v57 = vor.u32 %v2801_v41, %v2800_v0 }
 0x295   : > { %v2660_v4 = vsel %vm2577_vm10, %v2659_v39, %v2658_v5  ;;  %v2805_v29 = vor.u32 %v2804_v26, %v2803_v14  ;;  %v2810_v38 = vshrl.u32 %v11790_v50, %v2798_v44  ;;  %vm2815_vm13 = vcmp.lt.s32.totalorder %v2796_v9, 1 }
 0x296   : > { %v2663_v35 = vsel %vm10174_vm11, %v9942_v47, %v2660_v4  ;;  %v2747_v32 = vclz %v7206_v62  ;;  %v2891_v52 = vshrl.u32 %v2890_v25, 23  ;;  %v2799_v13 = vshrl.u32 %v11781_v54, %v2798_v44 }
 0x297   : > { %7658 = vcosq.f32 %v2663_v35  ;;  %v2808_v11 = vor.u32 %v2807_v45, %v2806_v43  ;;  %v2811_v53 = vor.u32 %v2810_v38, %v2809_v8  ;;  %v2812_v5 = vshll.u32 %v11790_v50, %v2797_v59 }
 0x298   : > { %7660 = vsinq.f32 %v2663_v35  ;;  %v7207_v3 = vadd.s32 4294967294, %v2747_v32  ;;  %v2813_v14 = vshrl.u32 %v11780_v27, %v2798_v44  ;;  %vm2816_vm10 = vcmp.lt.s32.totalorder %v2796_v9, 2 }
 0x299   : > { %vm2817_vm1 = vcmp.lt.s32.totalorder %v2796_v9, 3  ;;  %vm2818_vm3 = vcmp.lt.s32.totalorder %v2796_v9, 4  ;;  %v2823_v46 = vsel %vm2815_vm13, %v2802_v57, %v2805_v29  ;;  %v11899_v4 = vand.u32 2147483647, %v9984_v23 }
 0x29a   : > { %vm7208_vm5 = vcmp.lt.s32.totalorder %v7207_v3, 0  ;;  %v2814_v25 = vor.u32 %v2813_v14, %v2812_v5  ;;  %v2820_v38 = vsel %vm2818_vm3, %v2808_v11, 2102212464  ;;  %v2824_v32 = vsel %vm2818_vm3, %v2811_v53, 920167782 }
 0x29b   : > { %vm10255_vm11 = vcmp.le.f32.partialorder %v11899_v4, 0.7853982  ;;  %v2750_v35 = vsel %vm7208_vm5, 0, %v7207_v3  ;;  %v2819_v59 = vsel %vm2815_vm13, %v2799_v13, %v2802_v57  ;;  %v2821_v44 = vsel %vm2817_vm1, %v2805_v29, %v2820_v38 }
 0x29c   : > { %v2825_v39 = vsel %vm2817_vm1, %v2808_v11, %v2824_v32  ;;  %v2751_v41 = vsub.s32 32, %v2750_v35  ;;  %v2752_v26 = vshll.u32 %v10223_v48, %v2750_v35  ;;  %v2755_v43 = vsub.s32 4294967266, %v2750_v35 }
 0x29d   : > { %v2827_v62 = vsel %vm2815_vm13, %v2805_v29, %v2808_v11  ;;  %v2766_v45 = vsel %vm2681_vm0, %v2765_v22, %v10205_v7  ;;  %v2826_v8 = vsel %vm2816_vm10, %v2823_v46, %v2825_v39  ;;  %v2828_v3 = vsel %vm2818_vm3, %v2814_v25, 1326507024 }
 0x29e   : > { %v7213_v5 = vadd.s32 4294967169, %v2891_v52  ;;  %v2753_v13 = vshrl.u32 %v2735_v20, %v2751_v41  ;;  %v2756_v57 = vadd.s32 127, %v2755_v43  ;;  %v2822_v14 = vsel %vm2816_vm10, %v2819_v59, %v2821_v44 }
 0x29f   : > { %v2829_v4 = vsel %vm2817_vm1, %v2811_v53, %v2828_v3  ;;  %vm11715_vm5 = vweird.f32 %v9942_v47  ;;  %v10276_v11 = vmul.u32.u64.low %v10225_v30, %v2826_v8  ;;  %v10277_v29 = vmul.u32.u64.high %v10225_v30, %v2826_v8, %v10276_v11 }
 0x2a0   : > { %v2830_v48 = vsel %vm2816_vm10, %v2827_v62, %v2829_v4  ;;  %v2897_v7 = vadd.s32 1, %v7213_v5  ;;  %v2754_v22 = vor.u32 %v2753_v13, %v2752_v26  ;;  %v2757_v46 = vshll.u32 %v2756_v57, 23 }
 0x2a1   : > { %v10281_v52 = vmul.u32.u64.low %v10225_v30, %v2830_v48  ;;  %v10282_v20 = vmul.u32.u64.high %v10225_v30, %v2830_v48, %v10281_v52  ;;  %vm2670_vm13 = vcmp.lt.s32.totalorder %v10219_v42, 2  ;;  %vm2671_vm1 = vcmp.eq.s32.totalorder %v10219_v42, 0 }
 0x2a2   : > { %vm2898_vm3 = vcmp.gt.s32.totalorder %v2897_v7, 0  ;;  %v10287_v53 = vadd.s32 216, %v7918_v1  ;;  %v2758_v9 = vor.u32 4788187, %v2757_v46  ;;  %v2761_v25 = vcvt.s32.f32 %v2754_v22 }
 0x2a3   : > { %v2838_v38 = vmul.u32 %v10225_v30, %v2822_v14  ;;  %v2899_v32 = vsel %vm2898_vm3, %v2897_v7, 0  ;;  %vm2674_vm10 = vcmp.eq.s32.totalorder %v10219_v42, 2  ;;  %v10293_v35 = vsel %vm10255_vm11, 0, %v2766_v45 }
 0x2a4   : > { %11902 = vst [vmem:[#allocation87_spill] sm:$0xff] %v10293_v35  ;;  %v2841_v59 = vadd.s32 1, %v10277_v29  ;;  %v2901_v44 = vand.u32 31, %v2899_v32  ;;  %v10296_v39 = vpop.eup %7658  ;;  %v2759_v41 = vand.u32 2147483647, %v2758_v9  ;;  %vm2840_vm9 = vc.u32 %v10282_v20, %v10276_v11 }
 0x2a5   : > { %11903 = vst [vmem:[#allocation88_spill] sm:$0xff] %v10296_v39  ;;  %v2895_v26 = vor.u32 8388608, %v10233_v51  ;;  %v209_v30 = vcvt.s32.f32 %v10217_v63  ;;  %v10302_v43 = vpop.eup %7660  ;;  %v11699_v62 = vxor.u32 2147483648, %v10296_v39  ;;  %v2772_v57 = vadd.s32 3, %v10293_v35 }
 0x2a6   : > { %v2842_v45 = vsel %vm2840_vm9, %v2841_v59, %v10277_v29  ;;  %v2902_v8 = vsub.s32 32, %v2901_v44  ;;  %v2904_v3 = vshll.u32 %v11781_v54, %v2901_v44  ;;  %v11700_v5 = vxor.u32 2147483648, %v10302_v43 }
 0x2a7   : > { %v2762_v13 = vmul.f32 %v2761_v25, %v2759_v41  ;;  %v2843_v14 = vadd.s32 %v2842_v45, %v2838_v38  ;;  %v2676_v63 = vsel %vm2674_vm10, %v11699_v62, %v10302_v43  ;;  %v2907_v4 = vshll.u32 %v11789_v60, %v2901_v44 }
 0x2a8   : > { %v2905_v51 = vshrl.u32 %v11789_v60, %v2902_v8  ;;  %v2908_v48 = vshrl.u32 %v11778_v21, %v2902_v8  ;;  %v2673_v29 = vsel %vm2671_vm1, %v10296_v39, %v11700_v5  ;;  %v2900_v46 = vshrl.u32 %v2899_v32, 5 }
 0x2a9   : > { %v2763_v7 = vxor.u32 2147483648, %v2762_v13  ;;  %v2844_v22 = vadd.s32 536870912, %v2843_v14  ;;  %v2677_v52 = vsel %vm2670_vm13, %v2673_v29, %v2676_v63  ;;  %v2910_v25 = vshll.u32 %v11778_v21, %v2901_v44 }
 0x2aa   : > { %v2906_v9 = vor.u32 %v2905_v51, %v2904_v3  ;;  %v2911_v38 = vshrl.u32 %v11779_v36, %v2902_v8  ;;  %v2678_v59 = vsel %vm11715_vm5, nan, %v2677_v52  ;;  %v2913_v62 = vshll.u32 %v11779_v36, %v2901_v44 }
 0x2ab   : > { %v2764_v41 = vsel %vm2681_vm0, %v2763_v7, %v2762_v13  ;;  %v10330_v45 = vshrl.u32 %v2844_v22, 30  ;;  %3637 = vst [vmem:[%s8258_s4 + $0xb0] sm:$0xff] %v2678_v59  ;;  %v2909_v32 = vor.u32 %v2908_v48, %v2907_v4  ;;  %v2914_v3 = vshrl.u32 %v11790_v50, %v2902_v8 }
 0x2ac   : > { %v2767_v42 = vsel %vm10255_vm11, %v9984_v23, %v2764_v41  ;;  %v2916_v63 = vshll.u32 %v11790_v50, %v2901_v44  ;;  %v2917_v29 = vshrl.u32 %v11780_v27, %v2902_v8  ;;  %v242_v13 = vadd.f32 %v7920_v2, %v209_v30 }
 0x2ad   : > { %7662 = vcosq.f32 %v2767_v42  ;;  %v2846_v51 = vshll.u32 %v10330_v45, 30  ;;  %v2912_v7 = vor.u32 %v2911_v38, %v2910_v25  ;;  %v2915_v22 = vor.u32 %v2914_v3, %v2913_v62 }
 0x2ae   : > { %7664 = vsinq.f32 %v2767_v42  ;;  %vm2919_vm9 = vcmp.lt.s32.totalorder %v2900_v46, 1  ;;  %v2903_v0 = vshrl.u32 %v11781_v54, %v2902_v8  ;;  %v2918_v4 = vor.u32 %v2917_v29, %v2916_v63 }
 0x2af   : > { %v10342_v52 = vsub.s32 %v2843_v14, %v2846_v51  ;;  %vm2921_vm0 = vcmp.lt.s32.totalorder %v2900_v46, 3  ;;  %vm2920_vm11 = vcmp.lt.s32.totalorder %v2900_v46, 2  ;;  %vm2922_vm13 = vcmp.lt.s32.totalorder %v2900_v46, 4 }
 0x2b0   : > { %v2927_v44 = vsel %vm2919_vm9, %v2906_v9, %v2909_v32  ;;  %v2935_v48 = vshll.u32 %v2895_v26, 8  ;;  %v2924_v41 = vsel %vm2922_vm13, %v2912_v7, 2102212464  ;;  %v2928_v5 = vsel %vm2922_vm13, %v2915_v22, 920167782 }
 0x2b1   : > { %v2849_v59 = vsub.s32 0, %v10342_v52  ;;  %v210_v30 = vcvt.s32.f32 %v10287_v53  ;;  %v2773_v25 = vand.u32 3, %v2772_v57  ;;  %v2929_v62 = vsel %vm2921_vm0, %v2912_v7, %v2928_v5 }
 0x2b2   : > { %v2932_v14 = vsel %vm2922_vm13, %v2918_v4, 1326507024  ;;  %v10350_v38 = vmul.f32 %v10136_v49, %v242_v13  ;;  %v2923_v42 = vsel %vm2919_vm9, %v2903_v0, %v2906_v9  ;;  %v2930_v3 = vsel %vm2920_vm11, %v2927_v44, %v2929_v62 }
 0x2b3   : > { %v7210_v8 = vmin.u32 %v2849_v59, %v10342_v52  ;;  %v2931_v26 = vsel %vm2919_vm9, %v2909_v32, %v2912_v7  ;;  %v2925_v63 = vsel %vm2921_vm0, %v2909_v32, %v2924_v41  ;;  %v2933_v51 = vsel %vm2921_vm0, %v2915_v22, %v2932_v14 }
 0x2b4   : > { %11904 = vst [vmem:[#allocation89_spill] sm:$0xff] %v10350_v38  ;;  %v10358_v53 = vmul.u32.u64.low %v2935_v48, %v2930_v3  ;;  %v10359_v57 = vmul.u32.u64.high %v2935_v48, %v2930_v3, %v10358_v53  ;;  %vm11714_vm1 = vweird.f32 %v9984_v23  ;;  %v243_v29 = vadd.f32 %v7920_v2, %v210_v30 }
 0x2b5   : > { %v2851_v5 = vclz %v7210_v8  ;;  %vm2774_vm3 = vcmp.lt.s32.totalorder %v2773_v25, 2  ;;  %vm2785_vm10 = vcmp.lt.s32.totalorder %v10139_v58, 0  ;;  %v2934_v9 = vsel %vm2920_vm11, %v2931_v26, %v2933_v51 }
 0x2b6   : > { %v2994_v13 = vand.u32 2139095040, %v10350_v38  ;;  %v2926_v32 = vsel %vm2920_vm11, %v2923_v42, %v2925_v63  ;;  %v10368_v22 = vmul.u32.u64.low %v2935_v48, %v2934_v9  ;;  %v10369_v0 = vmul.u32.u64.high %v2935_v48, %v2934_v9, %v10368_v22 }
 0x2b7   : > { %v7211_v7 = vadd.s32 4294967294, %v2851_v5  ;;  %vm2775_vm9 = vcmp.eq.s32.totalorder %v2773_v25, 0  ;;  %vm2778_vm0 = vcmp.eq.s32.totalorder %v2773_v25, 2  ;;  %v2869_v4 = vsub.s32 4, %v10330_v45 }
 0x2b8   : > { %v2995_v44 = vshrl.u32 %v2994_v13, 23  ;;  %v2839_v59 = vadd.s32 %v10276_v11, %v10282_v20  ;;  %v2945_v41 = vadd.s32 1, %v10359_v57  ;;  %v10376_v30 = vmul.f32 %v10136_v49, %v243_v29 }
 0x2b9   : > { %vm7212_vm13 = vcmp.lt.s32.totalorder %v7211_v7, 0  ;;  %v2942_v14 = vmul.u32 %v2935_v48, %v2926_v32  ;;  %v11703_v8 = vand.u32 2147483647, %v10350_v38  ;;  %v2870_v5 = vsel %vm2785_vm10, %v2869_v4, %v10330_v45 }
 0x2ba   : > { %v10378_v62 = vpop.eup %7662  ;;  %v2854_v46 = vsel %vm7212_vm13, 0, %v7211_v7  ;;  %v7217_v42 = vadd.s32 4294967169, %v2995_v44  ;;  %vm2944_vm11 = vc.u32 %v10369_v0, %v10358_v53 }
 0x2bb   : > { %11905 = vst [vmem:[#allocation90_spill] sm:$0xff] %v10378_v62  ;;  %v10381_v3 = vpop.eup %7664  ;;  %v11701_v26 = vxor.u32 2147483648, %v10378_v62  ;;  %v2855_v63 = vsub.s32 32, %v2854_v46  ;;  %v2856_v11 = vshll.u32 %v10342_v52, %v2854_v46  ;;  %v2859_v20 = vsub.s32 4294967266, %v2854_v46 }
 0x2bc   : > { %11906 = vst [vmem:[#allocation91_spill] sm:$0xff] %v10381_v3  ;;  %v11702_v51 = vxor.u32 2147483648, %v10381_v3  ;;  %v3001_v48 = vadd.s32 1, %v7217_v42  ;;  %v2946_v52 = vsel %vm2944_vm11, %v2945_v41, %v10359_v57  ;;  %v2998_v32 = vand.u32 8388607, %v11703_v8 }
 0x2bd   : > { %v2780_v29 = vsel %vm2778_vm0, %v11701_v26, %v10381_v3  ;;  %v2857_v9 = vshrl.u32 %v2839_v59, %v2855_v63  ;;  %v2860_v13 = vadd.s32 127, %v2859_v20  ;;  %v2947_v45 = vadd.s32 %v2946_v52, %v2942_v14 }
 0x2be   : > { %v2777_v7 = vsel %vm2775_vm9, %v10378_v62, %v11702_v51  ;;  %vm3002_vm13 = vcmp.gt.s32.totalorder %v3001_v48, 0  ;;  %v11907_v57 = vand.u32 2147483647, %v10139_v58 }
 0x2bf   : > { %v2781_v22 = vsel %vm2774_vm3, %v2777_v7, %v2780_v29  ;;  %v2858_v4 = vor.u32 %v2857_v9, %v2856_v11  ;;  %v2861_v44 = vshll.u32 %v2860_v13, 23  ;;  %v3003_v46 = vsel %vm3002_vm13, %v3001_v48, 0 }
 0x2c0   : > { %v2782_v59 = vsel %vm11714_vm1, nan, %v2781_v22  ;;  %vm10407_vm0 = vcmp.le.f32.partialorder %v11907_v57, 0.7853982  ;;  %v2948_v42 = vadd.s32 536870912, %v2947_v45  ;;  %v3005_v14 = vand.u32 31, %v3003_v46 }
 0x2c1   : > { %3638 = vst [vmem:[%s8258_s4 + $0xb8] sm:$0xff] %v2782_v59  ;;  %v2862_v63 = vor.u32 4788187, %v2861_v44  ;;  %v2865_v20 = vcvt.s32.f32 %v2858_v4  ;;  %v10414_v25 = vsel %vm10407_vm0, 0, %v2870_v5  ;;  %v10417_v11 = vadd.s32 224, %v7918_v1 }
 0x2c2   : > { %11910 = vst [vmem:[#allocation92_spill] sm:$0xff] %v10414_v25  ;;  %v2949_v48 = vshrl.u32 %v2948_v42, 30  ;;  %v2999_v29 = vor.u32 8388608, %v2998_v32  ;;  %v3006_v9 = vsub.s32 32, %v3005_v14  ;;  %v3098_v13 = vand.u32 2139095040, %v10376_v30 }
 0x2c3   : > { %v2863_v52 = vand.u32 2147483647, %v2862_v63  ;;  %v3004_v7 = vshrl.u32 %v3003_v46, 5  ;;  %v3008_v22 = vshll.u32 %v11781_v54, %v3005_v14  ;;  %v3011_v59 = vshll.u32 %v11789_v60, %v3005_v14 }
 0x2c4   : > { %v2950_v44 = vshll.u32 %v2949_v48, 30  ;;  %v3009_v4 = vshrl.u32 %v11789_v60, %v3006_v9  ;;  %v3014_v5 = vshll.u32 %v11778_v21, %v3005_v14  ;;  %v3017_v57 = vshll.u32 %v11779_v36, %v3005_v14 }
 0x2c5   : > { %v2866_v26 = vmul.f32 %v2865_v20, %v2863_v52  ;;  %v3012_v42 = vshrl.u32 %v11778_v21, %v3006_v9  ;;  %v3015_v32 = vshrl.u32 %v11779_v36, %v3006_v9  ;;  %v3018_v51 = vshrl.u32 %v11790_v50, %v3006_v9 }
 0x2c6   : > { %v2876_v46 = vadd.s32 3, %v10414_v25  ;;  %v10429_v63 = vsub.s32 %v2947_v45, %v2950_v44  ;;  %v3020_v8 = vshll.u32 %v11790_v50, %v3005_v14  ;;  %v3021_v23 = vshrl.u32 %v11780_v27, %v3006_v9 }
 0x2c7   : > { %v2867_v62 = vxor.u32 2147483648, %v2866_v26  ;;  %v10433_v3 = vshll.u32 %v2999_v29, 8  ;;  %v3099_v20 = vshrl.u32 %v3098_v13, 23  ;;  %vm2889_vm3 = vcmp.lt.s32.totalorder %v10208_v34, 0 }
 0x2c8   : > { %v2953_v52 = vsub.s32 0, %v10429_v63  ;;  %v3007_v35 = vshrl.u32 %v11781_v54, %v3006_v9  ;;  %v3010_v39 = vor.u32 %v3009_v4, %v3008_v22  ;;  %v3013_v25 = vor.u32 %v3012_v42, %v3011_v59 }
 0x2c9   : > { %v2868_v45 = vsel %vm2785_vm10, %v2867_v62, %v2866_v26  ;;  %v3016_v14 = vor.u32 %v3015_v32, %v3014_v5  ;;  %v3019_v44 = vor.u32 %v3018_v51, %v3017_v57  ;;  %vm3023_vm9 = vcmp.lt.s32.totalorder %v3004_v7, 1 }
 0x2ca   : > { %v2871_v29 = vsel %vm10407_vm0, %v10139_v58, %v2868_v45  ;;  %v7214_v13 = vmin.u32 %v2953_v52, %v10429_v63  ;;  %v3022_v47 = vor.u32 %v3021_v23, %v3020_v8  ;;  %vm3026_vm11 = vcmp.lt.s32.totalorder %v3004_v7, 4 }
 0x2cb   : > { %7666 = vcosq.f32 %v2871_v29  ;;  %vm3024_vm13 = vcmp.lt.s32.totalorder %v3004_v7, 2  ;;  %vm3025_vm1 = vcmp.lt.s32.totalorder %v3004_v7, 3  ;;  %v3028_v9 = vsel %vm3026_vm11, %v3016_v14, 2102212464 }
 0x2cc   : > { %7668 = vsinq.f32 %v2871_v29  ;;  %v2955_v22 = vclz %v7214_v13  ;;  %v3027_v62 = vsel %vm3023_vm9, %v3007_v35, %v3010_v39  ;;  %v3031_v26 = vsel %vm3023_vm9, %v3010_v39, %v3013_v25 }
 0x2cd   : > { %v2973_v51 = vsub.s32 4, %v2949_v48  ;;  %v3029_v59 = vsel %vm3025_vm1, %v3013_v25, %v3028_v9  ;;  %v3032_v41 = vsel %vm3026_vm11, %v3019_v44, 920167782  ;;  %v3035_v4 = vsel %vm3023_vm9, %v3013_v25, %v3016_v14 }
 0x2ce   : > { %v2943_v23 = vadd.s32 %v10358_v53, %v10369_v0  ;;  %v7215_v8 = vadd.s32 4294967294, %v2955_v22  ;;  %v3033_v5 = vsel %vm3025_vm1, %v3016_v14, %v3032_v41  ;;  %v3036_v57 = vsel %vm3026_vm11, %v3022_v47, 1326507024 }
 0x2cf   : > { %v3030_v42 = vsel %vm3024_vm13, %v3027_v62, %v3029_v59  ;;  %v3034_v35 = vsel %vm3024_vm13, %v3031_v26, %v3033_v5  ;;  %v3037_v39 = vsel %vm3025_vm1, %v3019_v44, %v3036_v57  ;;  %v7221_v32 = vadd.s32 4294967169, %v3099_v20 }
 0x2d0   : > { %vm7216_vm10 = vcmp.lt.s32.totalorder %v7215_v8, 0  ;;  %v3038_v52 = vsel %vm3024_vm13, %v3035_v4, %v3037_v39  ;;  %v10460_v25 = vmul.u32.u64.low %v10433_v3, %v3034_v35  ;;  %v10461_v45 = vmul.u32.u64.high %v10433_v3, %v3034_v35, %v10460_v25 }
 0x2d1   : > { %v2958_v53 = vsel %vm7216_vm10, 0, %v7215_v8  ;;  %v2974_v0 = vsel %vm2889_vm3, %v2973_v51, %v2949_v48  ;;  %v10467_v47 = vmul.u32.u64.low %v10433_v3, %v3038_v52  ;;  %v10468_v14 = vmul.u32.u64.high %v10433_v3, %v3038_v52, %v10467_v47 }
 0x2d2   : > { %v2959_v29 = vsub.s32 32, %v2958_v53  ;;  %v2960_v44 = vshll.u32 %v10429_v63, %v2958_v53  ;;  %v2963_v20 = vsub.s32 4294967266, %v2958_v53  ;;  %v3105_v13 = vadd.s32 1, %v7221_v32 }
 0x2d3   : > { %vm11732_vm1 = vweird.f32 %v10139_v58  ;;  %v2877_v7 = vand.u32 3, %v2876_v46  ;;  %v11911_v9 = vand.u32 2147483647, %v10208_v34  ;;  %v3046_v48 = vmul.u32 %v10433_v3, %v3030_v42 }
 0x2d4   : > { %v2961_v62 = vshrl.u32 %v2943_v23, %v2959_v29  ;;  %v2964_v26 = vadd.s32 127, %v2963_v20  ;;  %v3049_v51 = vadd.s32 1, %v10461_v45  ;;  %vm3106_vm9 = vcmp.gt.s32.totalorder %v3105_v13, 0 }
 0x2d5   : > { %vm10474_vm0 = vcmp.le.f32.partialorder %v11911_v9, 0.7853982  ;;  %vm3048_vm11 = vc.u32 %v10468_v14, %v10460_v25  ;;  %v11914_v46 = vand.u32 2147483647, %v10376_v30  ;;  %v3107_v41 = vsel %vm3106_vm9, %v3105_v13, 0 }
 0x2d6   : > { %v10482_v63 = vsel %vm10474_vm0, 0, %v2974_v0  ;;  %v2962_v4 = vor.u32 %v2961_v62, %v2960_v44  ;;  %v2965_v8 = vshll.u32 %v2964_v26, 23  ;;  %v3050_v3 = vsel %vm3048_vm11, %v3049_v51, %v10461_v45 }
 0x2d7   : > { %v3102_v59 = vand.u32 8388607, %v11914_v46  ;;  %v211_v23 = vcvt.s32.f32 %v10417_v11  ;;  %vm2878_vm13 = vcmp.lt.s32.totalorder %v2877_v7, 2  ;;  %vm2879_vm10 = vcmp.eq.s32.totalorder %v2877_v7, 0 }
 0x2d8   : > { %v3051_v5 = vadd.s32 %v3050_v3, %v3046_v48  ;;  %v3109_v57 = vand.u32 31, %v3107_v41  ;;  %v10490_v42 = vpop.eup %7666  ;;  %vm2882_vm5 = vcmp.eq.s32.totalorder %v2877_v7, 2  ;;  %v2966_v35 = vor.u32 4788187, %v2965_v8 }
 0x2d9   : > { %11915 = vst [vmem:[#allocation93_spill] sm:$0xff] %v10490_v42  ;;  %v2969_v39 = vcvt.s32.f32 %v2962_v4  ;;  %v2980_v32 = vadd.s32 3, %v10482_v63  ;;  %v10493_v52 = vpop.eup %7668  ;;  %v11716_v53 = vxor.u32 2147483648, %v10490_v42  ;;  %v3103_v47 = vor.u32 8388608, %v3102_v59 }
 0x2da   : > { %11916 = vst [vmem:[#allocation94_spill] sm:$0xff] %v10493_v52  ;;  %v3052_v0 = vadd.s32 536870912, %v3051_v5  ;;  %v3110_v45 = vsub.s32 32, %v3109_v57  ;;  %v11717_v11 = vxor.u32 2147483648, %v10493_v52  ;;  %v2967_v29 = vand.u32 2147483647, %v2966_v35 }
 0x2db   : > { %v3108_v44 = vshrl.u32 %v3107_v41, 5  ;;  %v244_v20 = vadd.f32 %v7920_v2, %v211_v23  ;;  %v2884_v13 = vsel %vm2882_vm5, %v11716_v53, %v10493_v52  ;;  %v3112_v48 = vshll.u32 %v11781_v54, %v3109_v57 }
 0x2dc   : > { %v3053_v9 = vshrl.u32 %v3052_v0, 30  ;;  %v3113_v62 = vshrl.u32 %v11789_v60, %v3110_v45  ;;  %v2881_v26 = vsel %vm2879_vm10, %v10490_v42, %v11717_v11  ;;  %v2970_v51 = vmul.f32 %v2969_v39, %v2967_v29 }
 0x2dd   : > { %v3115_v46 = vshll.u32 %v11789_v60, %v3109_v57  ;;  %v3116_v59 = vshrl.u32 %v11778_v21, %v3110_v45  ;;  %v2885_v41 = vsel %vm2878_vm13, %v2881_v26, %v2884_v13  ;;  %v3118_v8 = vshll.u32 %v11778_v21, %v3109_v57 }
 0x2de   : > { %v3054_v4 = vshll.u32 %v3053_v9, 30  ;;  %v3119_v3 = vshrl.u32 %v11779_v36, %v3110_v45  ;;  %v2886_v23 = vsel %vm11732_vm1, nan, %v2885_v41  ;;  %v2971_v35 = vxor.u32 2147483648, %v2970_v51 }
 0x2df   : > { %v3111_v0 = vshrl.u32 %v11781_v54, %v3110_v45  ;;  %vm3127_vm5 = vcmp.lt.s32.totalorder %v3108_v44, 1  ;;  %3639 = vst [vmem:[%s8258_s4 + $0xc0] sm:$0xff] %v2886_v23  ;;  %v3114_v29 = vor.u32 %v3113_v62, %v3112_v48  ;;  %v3121_v53 = vshll.u32 %v11779_v36, %v3109_v57 }
 0x2e0   : > { %v10516_v39 = vsub.s32 %v3051_v5, %v3054_v4  ;;  %v3122_v7 = vshrl.u32 %v11790_v50, %v3110_v45  ;;  %v2972_v13 = vsel %vm2889_vm3, %v2971_v35, %v2970_v51  ;;  %v3117_v26 = vor.u32 %v3116_v59, %v3115_v46 }
 0x2e1   : > { %v3124_v11 = vshll.u32 %v11790_v50, %v3109_v57  ;;  %v3125_v41 = vshrl.u32 %v11780_v27, %v3110_v45  ;;  %v2975_v58 = vsel %vm10474_vm0, %v10208_v34, %v2972_v13  ;;  %vm2993_vm9 = vcmp.lt.s32.totalorder %v10350_v38, 0 }
 0x2e2   : > { %v3057_v5 = vsub.s32 0, %v10516_v39  ;;  %v3120_v48 = vor.u32 %v3119_v3, %v3118_v8  ;;  %v3123_v62 = vor.u32 %v3122_v7, %v3121_v53  ;;  %7670 = vcosq.f32 %v2975_v58 }
 0x2e3   : > { %v10529_v4 = vand.u32 3, %v2980_v32  ;;  %v3126_v23 = vor.u32 %v3125_v41, %v3124_v11  ;;  %vm3130_vm3 = vcmp.lt.s32.totalorder %v3108_v44, 4  ;;  %7672 = vsinq.f32 %v2975_v58 }
 0x2e4   : > { %v7218_v57 = vmin.u32 %v3057_v5, %v10516_v39  ;;  %vm3129_vm11 = vcmp.lt.s32.totalorder %v3108_v44, 3  ;;  %v3143_v45 = vshll.u32 %v3103_v47, 8  ;;  %v11917_v51 = vand.u32 2147483647, %v10350_v38 }
 0x2e5   : > { %vm3128_vm0 = vcmp.lt.s32.totalorder %v3108_v44, 2  ;;  %v3132_v46 = vsel %vm3130_vm3, %v3120_v48, 2102212464  ;;  %v3135_v53 = vsel %vm3127_vm5, %v3114_v29, %v3117_v26  ;;  %v3136_v32 = vsel %vm3130_vm3, %v3123_v62, 920167782 }
 0x2e6   : > { %vm10534_vm13 = vcmp.le.f32.partialorder %v11917_v51, 0.7853982  ;;  %v3059_v11 = vclz %v7218_v57  ;;  %v3131_v58 = vsel %vm3127_vm5, %v3111_v0, %v3114_v29  ;;  %v3139_v59 = vsel %vm3127_vm5, %v3117_v26, %v3120_v48 }
 0x2e7   : > { %v10544_v47 = vmul.f32 %v10136_v49, %v244_v20  ;;  %v3077_v8 = vsub.s32 4, %v3053_v9  ;;  %v3133_v3 = vsel %vm3129_vm11, %v3117_v26, %v3132_v46  ;;  %v3137_v35 = vsel %vm3129_vm11, %v3120_v48, %v3136_v32 }
 0x2e8   : > { %v3140_v7 = vsel %vm3130_vm3, %v3126_v23, 1326507024  ;;  %v7219_v13 = vadd.s32 4294967294, %v3059_v11  ;;  %v3138_v41 = vsel %vm3128_vm0, %v3135_v53, %v3137_v35  ;;  %v180_v57 = vadd.s32 232, %v7918_v1 }
 0x2e9   : > { %v3141_v5 = vsel %vm3129_vm11, %v3123_v62, %v3140_v7  ;;  %v3134_v0 = vsel %vm3128_vm0, %v3131_v58, %v3133_v3  ;;  %v10554_v20 = vmul.u32.u64.low %v3143_v45, %v3138_v41  ;;  %v10555_v51 = vmul.u32.u64.high %v3143_v45, %v3138_v41, %v10554_v20 }
 0x2ea   : > { %v3142_v29 = vsel %vm3128_vm0, %v3139_v59, %v3141_v5  ;;  %v3047_v26 = vadd.s32 %v10460_v25, %v10468_v14  ;;  %vm7220_vm10 = vcmp.lt.s32.totalorder %v7219_v13, 0  ;;  %v3078_v62 = vsel %vm2993_vm9, %v3077_v8, %v3053_v9 }
 0x2eb   : > { %v10559_v48 = vmul.u32.u64.low %v3143_v45, %v3142_v29  ;;  %v10560_v23 = vmul.u32.u64.high %v3143_v45, %v3142_v29, %v10559_v48  ;;  %v3062_v46 = vsel %vm7220_vm10, 0, %v7219_v13  ;;  %v11721_v53 = vand.u32 2147483647, %v10544_v47 }
 0x2ec   : > { %v3202_v32 = vand.u32 2139095040, %v10544_v47  ;;  %v3063_v44 = vsub.s32 32, %v3062_v46  ;;  %v3064_v11 = vshll.u32 %v10516_v39, %v3062_v46  ;;  %v3067_v58 = vsub.s32 4294967266, %v3062_v46 }
 0x2ed   : > { %v3150_v59 = vmul.u32 %v3143_v45, %v3134_v0  ;;  %vm2982_vm5 = vcmp.lt.s32.totalorder %v10529_v4, 2  ;;  %v3153_v25 = vadd.s32 1, %v10555_v51  ;;  %v212_v3 = vcvt.s32.f32 %v180_v57 }
 0x2ee   : > { %v3203_v14 = vshrl.u32 %v3202_v32, 23  ;;  %v3065_v35 = vshrl.u32 %v3047_v26, %v3063_v44  ;;  %v3068_v7 = vadd.s32 127, %v3067_v58  ;;  %v10571_v9 = vsel %vm10534_vm13, 0, %v3078_v62 }
 0x2ef   : > { %vm3152_vm3 = vc.u32 %v10560_v23, %v10554_v20  ;;  %vm2983_vm11 = vcmp.eq.s32.totalorder %v10529_v4, 0  ;;  %v3206_v45 = vand.u32 8388607, %v11721_v53  ;;  %v10578_v13 = vpop.eup %7670  ;;  %vm2986_vm0 = vcmp.eq.s32.totalorder %v10529_v4, 2 }
 0x2f0   : > { %v3154_v39 = vsel %vm3152_vm3, %v3153_v25, %v10555_v51  ;;  %v7225_v8 = vadd.s32 4294967169, %v3203_v14  ;;  %11920 = vst [vmem:[#allocation95_spill] sm:$0xff] %v10578_v13  ;;  %v3066_v41 = vor.u32 %v3065_v35, %v3064_v11  ;;  %v3069_v5 = vshll.u32 %v3068_v7, 23  ;;  %v10581_v0 = vpop.eup %7672 }
 0x2f1   : > { %v3155_v57 = vadd.s32 %v3154_v39, %v3150_v59  ;;  %11921 = vst [vmem:[#allocation96_spill] sm:$0xff] %v10581_v0  ;;  %v11719_v29 = vxor.u32 2147483648, %v10578_v13  ;;  %v3084_v26 = vadd.s32 3, %v10571_v9  ;;  %v245_v51 = vadd.f32 %v7920_v2, %v212_v3 }
 0x2f2   : > { %v3209_v48 = vadd.s32 1, %v7225_v8  ;;  %v11720_v46 = vxor.u32 2147483648, %v10581_v0  ;;  %v3070_v62 = vor.u32 4788187, %v3069_v5  ;;  %v3073_v32 = vcvt.s32.f32 %v3066_v41 }
 0x2f3   : > { %v3156_v44 = vadd.s32 536870912, %v3155_v57  ;;  %vm11729_vm10 = vweird.f32 %v10208_v34  ;;  %v2988_v11 = vsel %vm2986_vm0, %v11719_v29, %v10581_v0  ;;  %v3207_v58 = vor.u32 8388608, %v3206_v45 }
 0x2f4   : > { %vm3210_vm3 = vcmp.gt.s32.totalorder %v3209_v48, 0  ;;  %v2985_v59 = vsel %vm2983_vm11, %v10578_v13, %v11720_v46  ;;  %v3071_v25 = vand.u32 2147483647, %v3070_v62  ;;  %v10601_v39 = vmul.f32 %v10136_v49, %v245_v51 }
 0x2f5   : > { %v10596_v14 = vshrl.u32 %v3156_v44, 30  ;;  %v3211_v3 = vsel %vm3210_vm3, %v3209_v48, 0  ;;  %v2989_v35 = vsel %vm2982_vm5, %v2985_v59, %v2988_v11  ;;  %v10604_v8 = vadd.s32 240, %v7918_v1 }
 0x2f6   : > { %v3213_v7 = vand.u32 31, %v3211_v3  ;;  %v2990_v45 = vsel %vm11729_vm10, nan, %v2989_v35  ;;  %v3074_v41 = vmul.f32 %v3073_v32, %v3071_v25  ;;  %v10608_v5 = vand.u32 3, %v3084_v26 }
 0x2f7   : > { %v3158_v62 = vshll.u32 %v10596_v14, 30  ;;  %3640 = vst [vmem:[%s8258_s4 + $0xc8] sm:$0xff] %v2990_v45  ;;  %v3151_v48 = vadd.s32 %v10554_v20, %v10560_v23  ;;  %v10614_v11 = vshll.u32 %v3207_v58, 8  ;;  %v3306_v20 = vand.u32 2139095040, %v10601_v39 }
 0x2f8   : > { %v3214_v4 = vsub.s32 32, %v3213_v7  ;;  %v3216_v44 = vshll.u32 %v11781_v54, %v3213_v7  ;;  %v3075_v49 = vxor.u32 2147483648, %v3074_v41  ;;  %v3219_v59 = vshll.u32 %v11789_v60, %v3213_v7 }
 0x2f9   : > { %v10616_v51 = vsub.s32 %v3155_v57, %v3158_v62  ;;  %v3222_v35 = vshll.u32 %v11778_v21, %v3213_v7  ;;  %v3225_v25 = vshll.u32 %v11779_v36, %v3213_v7  ;;  %vm3097_vm5 = vcmp.lt.s32.totalorder %v10376_v30, 0 }
 0x2fa   : > { %v3217_v26 = vshrl.u32 %v11789_v60, %v3214_v4  ;;  %v3220_v32 = vshrl.u32 %v11778_v21, %v3214_v4  ;;  %v3076_v23 = vsel %vm2993_vm9, %v3075_v49, %v3074_v41  ;;  %v3212_v58 = vshrl.u32 %v3211_v3, 5 }
 0x2fb   : > { %v3161_v57 = vsub.s32 0, %v10616_v51  ;;  %v3223_v45 = vshrl.u32 %v11779_v36, %v3214_v4  ;;  %v3079_v62 = vsel %vm10534_vm13, %v10350_v38, %v3076_v23  ;;  %v3215_v29 = vshrl.u32 %v11781_v54, %v3214_v4 }
 0x2fc   : > { %v3218_v46 = vor.u32 %v3217_v26, %v3216_v44  ;;  %v3226_v53 = vshrl.u32 %v11790_v50, %v3214_v4  ;;  %7674 = vcosq.f32 %v3079_v62  ;;  %v3221_v41 = vor.u32 %v3220_v32, %v3219_v59 }
 0x2fd   : > { %v7222_v34 = vmin.u32 %v3161_v57, %v10616_v51  ;;  %v3224_v49 = vor.u32 %v3223_v45, %v3222_v35  ;;  %7676 = vsinq.f32 %v3079_v62  ;;  %v11922_v13 = vand.u32 2147483647, %v10376_v30 }
 0x2fe   : > { %v3227_v0 = vor.u32 %v3226_v53, %v3225_v25  ;;  %v3228_v22 = vshll.u32 %v11790_v50, %v3213_v7  ;;  %v3229_v23 = vshrl.u32 %v11780_v27, %v3214_v4  ;;  %v3181_v26 = vsub.s32 4, %v10596_v14 }
 0x2ff   : > { %vm10637_vm9 = vcmp.le.f32.partialorder %v11922_v13, 0.7853982  ;;  %v3163_v44 = vclz %v7222_v34  ;;  %v3307_v57 = vshrl.u32 %v3306_v20, 23  ;;  %vm3231_vm13 = vcmp.lt.s32.totalorder %v3212_v58, 1 }
 0x300   : > { %v3230_v59 = vor.u32 %v3229_v23, %v3228_v22  ;;  %vm3232_vm11 = vcmp.lt.s32.totalorder %v3212_v58, 2  ;;  %vm3233_vm0 = vcmp.lt.s32.totalorder %v3212_v58, 3  ;;  %vm3234_vm3 = vcmp.lt.s32.totalorder %v3212_v58, 4 }
 0x301   : > { %v7223_v35 = vadd.s32 4294967294, %v3163_v44  ;;  %v3235_v13 = vsel %vm3231_vm13, %v3215_v29, %v3218_v46  ;;  %v3239_v32 = vsel %vm3231_vm13, %v3218_v46, %v3221_v41  ;;  %v3236_v45 = vsel %vm3234_vm3, %v3224_v49, 2102212464 }
 0x302   : > { %v3240_v53 = vsel %vm3234_vm3, %v3227_v0, 920167782  ;;  %v3243_v25 = vsel %vm3231_vm13, %v3221_v41, %v3224_v49  ;;  %v3244_v7 = vsel %vm3234_vm3, %v3230_v59, 1326507024  ;;  %v3237_v4 = vsel %vm3233_vm0, %v3221_v41, %v3236_v45 }
 0x303   : > { %vm7224_vm10 = vcmp.lt.s32.totalorder %v7223_v35, 0  ;;  %v3241_v34 = vsel %vm3233_vm0, %v3224_v49, %v3240_v53  ;;  %v3245_v62 = vsel %vm3233_vm0, %v3227_v0, %v3244_v7  ;;  %v3182_v20 = vsel %vm3097_vm5, %v3181_v26, %v10596_v14 }
 0x304   : > { %v3166_v52 = vsel %vm7224_vm10, 0, %v7223_v35  ;;  %v3242_v22 = vsel %vm3232_vm11, %v3239_v32, %v3241_v34  ;;  %v3246_v23 = vsel %vm3232_vm11, %v3243_v25, %v3245_v62  ;;  %v3238_v42 = vsel %vm3232_vm11, %v3235_v13, %v3237_v4 }
 0x305   : > { %v3167_v44 = vsub.s32 32, %v3166_v52  ;;  %v3168_v29 = vshll.u32 %v10616_v51, %v3166_v52  ;;  %v3171_v46 = vsub.s32 4294967266, %v3166_v52  ;;  %v10663_v35 = vsel %vm10637_vm9, 0, %v3182_v20 }
 0x306   : > { %v10653_v59 = vmul.u32.u64.low %v10614_v11, %v3246_v23  ;;  %v10654_v41 = vmul.u32.u64.high %v10614_v11, %v3246_v23, %v10653_v59  ;;  %v10657_v0 = vmul.u32.u64.low %v10614_v11, %v3242_v22  ;;  %v10658_v49 = vmul.u32.u64.high %v10614_v11, %v3242_v22, %v10657_v0  ;;  %11925 = vst [vmem:[#allocation97_spill] sm:$0xff] %v10663_v35 }
 0x307   : > { %v3169_v14 = vshrl.u32 %v3151_v48, %v3167_v44  ;;  %v3172_v26 = vadd.s32 127, %v3171_v46  ;;  %v7229_v32 = vadd.s32 4294967169, %v3307_v57  ;;  %vm3087_vm10 = vcmp.eq.s32.totalorder %v10608_v5, 0 }
 0x308   : > { %vm3090_vm13 = vcmp.eq.s32.totalorder %v10608_v5, 2  ;;  %v213_v52 = vcvt.s32.f32 %v10604_v8  ;;  %v3254_v13 = vmul.u32 %v10614_v11, %v3238_v42  ;;  %v3188_v48 = vadd.s32 3, %v10663_v35 }
 0x309   : > { %v3170_v51 = vor.u32 %v3169_v14, %v3168_v29  ;;  %v3173_v58 = vshll.u32 %v3172_v26, 23  ;;  %v3313_v45 = vadd.s32 1, %v7229_v32  ;;  %v10669_v53 = vpop.eup %7674  ;;  %vm3256_vm11 = vc.u32 %v10654_v41, %v10657_v0 }
 0x30a   : > { %11926 = vst [vmem:[#allocation98_spill] sm:$0xff] %v10669_v53  ;;  %v3257_v57 = vadd.s32 1, %v10658_v49  ;;  %v11927_v25 = vand.u32 2147483647, %v10601_v39  ;;  %v10677_v4 = vpop.eup %7676  ;;  %v11733_v8 = vxor.u32 2147483648, %v10669_v53  ;;  %vm3086_vm3 = vcmp.lt.s32.totalorder %v10608_v5, 2 }
 0x30b   : > { %11928 = vst [vmem:[#allocation99_spill] sm:$0xff] %v10677_v4  ;;  %v3174_v34 = vor.u32 4788187, %v3173_v58  ;;  %v3177_v62 = vcvt.s32.f32 %v3170_v51  ;;  %vm3314_vm0 = vcmp.gt.s32.totalorder %v3313_v45, 0  ;;  %v11734_v42 = vxor.u32 2147483648, %v10677_v4 }
 0x30c   : > { %v3310_v7 = vand.u32 8388607, %v11927_v25  ;;  %v3258_v11 = vsel %vm3256_vm11, %v3257_v57, %v10658_v49  ;;  %v3315_v20 = vsel %vm3314_vm0, %v3313_v45, 0  ;;  %vm11741_vm1 = vweird.f32 %v10350_v38 }
 0x30d   : > { %v3092_v22 = vsel %vm3090_vm13, %v11733_v8, %v10677_v4  ;;  %v3175_v23 = vand.u32 2147483647, %v3174_v34  ;;  %v3259_v44 = vadd.s32 %v3258_v11, %v3254_v13  ;;  %v3089_v29 = vsel %vm3087_vm10, %v10669_v53, %v11734_v42 }
 0x30e   : > { %v10694_v46 = vand.u32 3, %v3188_v48  ;;  %v3317_v59 = vand.u32 31, %v3315_v20  ;;  %v246_v49 = vadd.f32 %v7920_v2, %v213_v52  ;;  %v3093_v14 = vsel %vm3086_vm3, %v3089_v29, %v3092_v22  ;;  %v10710_v29 = vld [vmem:[#allocation2] ss:$0 sm:$0xff] }
 0x30f   : > { %v3178_v26 = vmul.f32 %v3177_v62, %v3175_v23  ;;  %v3260_v32 = vadd.s32 536870912, %v3259_v44  ;;  %v3311_v51 = vor.u32 8388608, %v3310_v7  ;;  %v3094_v58 = vsel %vm11741_vm1, nan, %v3093_v14 }
 0x310   : > { %v3316_v45 = vshrl.u32 %v3315_v20, 5  ;;  %v3318_v13 = vsub.s32 32, %v3317_v59  ;;  %v3320_v57 = vshll.u32 %v11781_v54, %v3317_v59  ;;  %3641 = vst [vmem:[%s8258_s4 + $0xd0] sm:$0xff] %v3094_v58  ;;  %v3323_v48 = vshll.u32 %v11789_v60, %v3317_v59 }
 0x311   : > { %v3179_v25 = vxor.u32 2147483648, %v3178_v26  ;;  %v3261_v5 = vshrl.u32 %v3260_v32, 30  ;;  %v3329_v34 = vshll.u32 %v11779_v36, %v3317_v59  ;;  %v3326_v7 = vshll.u32 %v11778_v21, %v3317_v59 }
 0x312   : > { %v3321_v52 = vshrl.u32 %v11789_v60, %v3318_v13  ;;  %v3324_v62 = vshrl.u32 %v11778_v21, %v3318_v13  ;;  %v3327_v11 = vshrl.u32 %v11779_v36, %v3318_v13  ;;  %v3330_v23 = vshrl.u32 %v11790_v50, %v3318_v13 }
 0x313   : > { %v3180_v20 = vsel %vm3097_vm5, %v3179_v25, %v3178_v26  ;;  %v3262_v22 = vshll.u32 %v3261_v5, 30  ;;  %v10713_v14 = vmul.f32 %v10710_v29, %v246_v49  ;;  %v3319_v58 = vshrl.u32 %v11781_v54, %v3318_v13 }
 0x314   : > { %v3183_v32 = vsel %vm10637_vm9, %v10376_v30, %v3180_v20  ;;  %v3322_v8 = vor.u32 %v3321_v52, %v3320_v57  ;;  %vm3335_vm10 = vcmp.lt.s32.totalorder %v3316_v45, 1  ;;  %v3325_v26 = vor.u32 %v3324_v62, %v3323_v48 }
 0x315   : > { %7678 = vcosq.f32 %v3183_v32  ;;  %v10719_v42 = vsub.s32 %v3259_v44, %v3262_v22  ;;  %v3331_v25 = vor.u32 %v3330_v23, %v3329_v34  ;;  %v3328_v38 = vor.u32 %v3327_v11, %v3326_v7 }
 0x316   : > { %7680 = vsinq.f32 %v3183_v32  ;;  %v3332_v35 = vshll.u32 %v11790_v50, %v3317_v59  ;;  %v3333_v49 = vshrl.u32 %v11780_v27, %v3318_v13  ;;  %v3285_v4 = vsub.s32 4, %v3261_v5 }
 0x317   : > { %v3265_v53 = vsub.s32 0, %v10719_v42  ;;  %vm3337_vm5 = vcmp.lt.s32.totalorder %v3316_v45, 3  ;;  %v3351_v3 = vshll.u32 %v3311_v51, 8  ;;  %vm3336_vm9 = vcmp.lt.s32.totalorder %v3316_v45, 2 }
 0x318   : > { %v3334_v20 = vor.u32 %v3333_v49, %v3332_v35  ;;  %vm3338_vm13 = vcmp.lt.s32.totalorder %v3316_v45, 4  ;;  %v3339_v57 = vsel %vm3335_vm10, %v3319_v58, %v3322_v8  ;;  %v3343_v34 = vsel %vm3335_vm10, %v3322_v8, %v3325_v26 }
 0x319   : > { %v7226_v44 = vmin.u32 %v3265_v53, %v10719_v42  ;;  %v3340_v48 = vsel %vm3338_vm13, %v3328_v38, 2102212464  ;;  %v3344_v52 = vsel %vm3338_vm13, %v3331_v25, 920167782  ;;  %v3347_v62 = vsel %vm3335_vm10, %v3325_v26, %v3328_v38 }
 0x31a   : > { %v3341_v59 = vsel %vm3337_vm5, %v3325_v26, %v3340_v48  ;;  %v3345_v13 = vsel %vm3337_vm5, %v3328_v38, %v3344_v52  ;;  %v3348_v7 = vsel %vm3338_vm13, %v3334_v20, 1326507024  ;;  %v11929_v51 = vand.u32 2147483647, %v10544_v47 }
 0x31b   : > { %vm3201_vm0 = vcmp.lt.s32.totalorder %v10544_v47, 0  ;;  %v3267_v53 = vclz %v7226_v44  ;;  %v3342_v11 = vsel %vm3336_vm9, %v3339_v57, %v3341_v59  ;;  %v3346_v22 = vsel %vm3336_vm9, %v3343_v34, %v3345_v13 }
 0x31c   : > { %vm10732_vm11 = vcmp.le.f32.partialorder %v11929_v51, 0.7853982  ;;  %v3286_v8 = vsel %vm3201_vm0, %v3285_v4, %v3261_v5  ;;  %v3349_v23 = vsel %vm3337_vm5, %v3331_v25, %v3348_v7  ;;  %vm11745_vm3 = vweird.f32 %v10376_v30 }
 0x31d   : > { %v7227_v38 = vadd.s32 4294967294, %v3267_v53  ;;  %v3350_v32 = vsel %vm3336_vm9, %v3347_v62, %v3349_v23  ;;  %v10744_v58 = vmul.u32.u64.low %v3351_v3, %v3346_v22  ;;  %v10745_v26 = vmul.u32.u64.high %v3351_v3, %v3346_v22, %v10744_v58 }
 0x31e   : > { %vm3190_vm10 = vcmp.lt.s32.totalorder %v10694_v46, 2  ;;  %v10748_v49 = vmul.u32.u64.low %v3351_v3, %v3350_v32  ;;  %v10749_v20 = vmul.u32.u64.high %v3351_v3, %v3350_v32, %v10748_v49  ;;  %v3410_v4 = vand.u32 2139095040, %v10713_v14 }
 0x31f   : > { %vm3191_vm13 = vcmp.eq.s32.totalorder %v10694_v46, 0  ;;  %v3255_v5 = vadd.s32 %v10657_v0, %v10654_v41  ;;  %vm7228_vm5 = vcmp.lt.s32.totalorder %v7227_v38, 0  ;;  %v11744_v25 = vand.u32 2147483647, %v10713_v14 }
 0x320   : > { %v3270_v45 = vsel %vm7228_vm5, 0, %v7227_v38  ;;  %v10758_v57 = vsel %vm10732_vm11, 0, %v3286_v8  ;;  %v3358_v44 = vmul.u32 %v3351_v3, %v3342_v11  ;;  %v3411_v48 = vshrl.u32 %v3410_v4, 23 }
 0x321   : > { %v3271_v34 = vsub.s32 32, %v3270_v45  ;;  %v3272_v52 = vshll.u32 %v10719_v42, %v3270_v45  ;;  %v3275_v59 = vsub.s32 4294967266, %v3270_v45  ;;  %v3361_v13 = vadd.s32 1, %v10745_v26 }
 0x322   : > { %v10762_v62 = vpop.eup %7678  ;;  %vm3194_vm9 = vcmp.eq.s32.totalorder %v10694_v46, 2  ;;  %vm3360_vm1 = vc.u32 %v10749_v20, %v10744_v58  ;;  %v7233_v41 = vadd.s32 4294967169, %v3411_v48  ;;  %v182_v0 = vadd.s32 248, %v7918_v1 }
 0x323   : > { %v10767_v7 = vpop.eup %7680  ;;  %v11742_v3 = vxor.u32 2147483648, %v10762_v62  ;;  %v3273_v51 = vshrl.u32 %v3255_v5, %v3271_v34  ;;  %v3276_v53 = vadd.s32 127, %v3275_v59  ;;  %v3362_v42 = vsel %vm3360_vm1, %v3361_v13, %v10745_v26 }
 0x324   : > { %v11743_v8 = vxor.u32 2147483648, %v10767_v7  ;;  %v3292_v11 = vadd.s32 3, %v10758_v57  ;;  %v3363_v22 = vadd.s32 %v3362_v42, %v3358_v44  ;;  %v3417_v23 = vadd.s32 1, %v7233_v41 }
 0x325   : > { %v3196_v38 = vsel %vm3194_vm9, %v11742_v3, %v10767_v7  ;;  %v3274_v1 = vor.u32 %v3273_v51, %v3272_v52  ;;  %v3277_v32 = vshll.u32 %v3276_v53, 23  ;;  %v3414_v49 = vand.u32 8388607, %v11744_v25 }
 0x326   : > { %v3193_v26 = vsel %vm3191_vm13, %v10762_v62, %v11743_v8  ;;  %v3364_v4 = vadd.s32 536870912, %v3363_v22  ;;  %vm3418_vm1 = vcmp.gt.s32.totalorder %v3417_v23, 0  ;;  %v214_v5 = vcvt.s32.f32 %v182_v0 }
 0x327   : > { %v3197_v45 = vsel %vm3190_vm10, %v3193_v26, %v3196_v38  ;;  %v3278_v44 = vor.u32 4788187, %v3277_v32  ;;  %v3281_v48 = vcvt.s32.f32 %v3274_v1  ;;  %v3419_v34 = vsel %vm3418_vm1, %v3417_v23, 0 }
 0x328   : > { %v3198_v52 = vsel %vm11745_vm3, nan, %v3197_v45  ;;  %v10787_v59 = vshrl.u32 %v3364_v4, 30  ;;  %v3421_v13 = vand.u32 31, %v3419_v34  ;;  %v10790_v51 = vand.u32 3, %v3292_v11 }
 0x329   : > { %3642 = vst [vmem:[%s8258_s4 + $0xd8] sm:$0xff] %v3198_v52  ;;  %v3279_v41 = vand.u32 2147483647, %v3278_v44  ;;  %v10793_v53 = vand.u32 3, %v8121_v12  ;;  %v3415_v46 = vor.u32 8388608, %v3414_v49  ;;  %v247_v38 = vadd.f32 %v7920_v2, %v214_v5 }
 0x32a   : > { %v3366_v0 = vshll.u32 %v10787_v59, 30  ;;  %v3422_v42 = vsub.s32 32, %v3421_v13  ;;  %v10798_v1 = vadd.s32 %v10744_v58, %v10749_v20  ;;  %v3420_v32 = vshrl.u32 %v3419_v34, 5 }
 0x32b   : > { %v3282_v23 = vmul.f32 %v3281_v48, %v3279_v41  ;;  %v3424_v26 = vshll.u32 %v11781_v54, %v3421_v13  ;;  %v3427_v12 = vshll.u32 %v11789_v60, %v3421_v13  ;;  %v3430_v45 = vshll.u32 %v11778_v21, %v3421_v13 }
 0x32c   : > { %v10801_v4 = vsub.s32 %v3363_v22, %v3366_v0  ;;  %v3425_v11 = vshrl.u32 %v11789_v60, %v3422_v42  ;;  %v3428_v49 = vshrl.u32 %v11778_v21, %v3422_v42  ;;  %v3431_v2 = vshrl.u32 %v11779_v36, %v3422_v42 }
 0x32d   : > { %v3283_v44 = vxor.u32 2147483648, %v3282_v23  ;;  %v3433_v5 = vshll.u32 %v11779_v36, %v3421_v13  ;;  %vm3305_vm10 = vcmp.lt.s32.totalorder %v10601_v39, 0  ;;  %v3434_v20 = vshrl.u32 %v11790_v50, %v3422_v42 }
 0x32e   : > { %v3369_v58 = vsub.s32 0, %v10801_v4  ;;  %v10812_v22 = vshll.u32 %v3415_v46, 8  ;;  %v10815_v48 = vmul.f32 %v10710_v29, %v247_v38  ;;  %v3423_v52 = vshrl.u32 %v11781_v54, %v3422_v42 }
 0x32f   : > { %v3284_v34 = vsel %vm3201_vm0, %v3283_v44, %v3282_v23  ;;  %v3426_v41 = vor.u32 %v3425_v11, %v3424_v26  ;;  %v3436_v0 = vshll.u32 %v11790_v50, %v3421_v13  ;;  %v3429_v25 = vor.u32 %v3428_v49, %v3427_v12 }
 0x330   : > { %v3287_v3 = vsel %vm10732_vm11, %v10544_v47, %v3284_v34  ;;  %v7230_v8 = vmin.u32 %v3369_v58, %v10801_v4  ;;  %v3432_v46 = vor.u32 %v3431_v2, %v3430_v45  ;;  %v11932_v29 = vand.u32 2147483647, %v10601_v39 }
 0x331   : > { %7682 = vcosq.f32 %v3287_v3  ;;  %v3435_v23 = vor.u32 %v3434_v20, %v3433_v5  ;;  %v3437_v26 = vshrl.u32 %v11780_v27, %v3422_v42  ;;  %vm3439_vm0 = vcmp.lt.s32.totalorder %v3420_v32, 1 }
 0x332   : > { %vm10827_vm13 = vcmp.le.f32.partialorder %v11932_v29, 0.7853982  ;;  %7684 = vsinq.f32 %v3287_v3  ;;  %v3371_v13 = vclz %v7230_v8  ;;  %v3389_v35 = vsub.s32 4, %v10787_v59 }
 0x333   : > { %vm3742_vm11 = vcmp.eq.s32.totalorder %v10793_v53, 0  ;;  %v3438_v11 = vor.u32 %v3437_v26, %v3436_v0  ;;  %vm3440_vm5 = vcmp.lt.s32.totalorder %v3420_v32, 2  ;;  %vm3441_vm9 = vcmp.lt.s32.totalorder %v3420_v32, 3 }
 0x334   : > { %vm3442_vm1 = vcmp.lt.s32.totalorder %v3420_v32, 4  ;;  %v7231_v12 = vadd.s32 4294967294, %v3371_v13  ;;  %v3443_v45 = vsel %vm3439_vm0, %v3423_v52, %v3426_v41  ;;  %v3447_v49 = vsel %vm3439_vm0, %v3426_v41, %v3429_v25 }
 0x335   : > { %v3444_v44 = vsel %vm3442_vm1, %v3432_v46, 2102212464  ;;  %v3448_v58 = vsel %vm3442_vm1, %v3435_v23, 920167782  ;;  %v3451_v5 = vsel %vm3439_vm0, %v3429_v25, %v3432_v46  ;;  %v3452_v20 = vsel %vm3442_vm1, %v3438_v11, 1326507024 }
 0x336   : > { %v3445_v2 = vsel %vm3441_vm9, %v3429_v25, %v3444_v44  ;;  %vm3298_vm3 = vcmp.eq.s32.totalorder %v10790_v51, 2  ;;  %vm7232_vm14 = vcmp.lt.s32.totalorder %v7231_v12, 0  ;;  %v3449_v3 = vsel %vm3441_vm9, %v3432_v46, %v3448_v58 }
 0x337   : > { %v3453_v8 = vsel %vm3441_vm9, %v3435_v23, %v3452_v20  ;;  %vm3745_vm7 = vcmp.eq.s32.totalorder %v10793_v53, 2  ;;  %vm3295_vm4 = vcmp.eq.s32.totalorder %v10790_v51, 0  ;;  %v3374_v42 = vsel %vm7232_vm14, 0, %v7231_v12 }
 0x338   : > { %v3390_v34 = vsel %vm3305_vm10, %v3389_v35, %v10787_v59  ;;  %v3450_v52 = vsel %vm3440_vm5, %v3447_v49, %v3449_v3  ;;  %v3454_v41 = vsel %vm3440_vm5, %v3451_v5, %v3453_v8  ;;  %vm3294_vm0 = vcmp.lt.s32.totalorder %v10790_v51, 2 }
 0x339   : > { %v3375_v25 = vsub.s32 32, %v3374_v42  ;;  %v3376_v0 = vshll.u32 %v10801_v4, %v3374_v42  ;;  %v3379_v46 = vsub.s32 4294967266, %v3374_v42  ;;  %v3446_v29 = vsel %vm3440_vm5, %v3443_v45, %v3445_v2 }
 0x33a   : > { %vm3291_vm9 = vweird.f32 %v10544_v47  ;;  %v10847_v23 = vmul.u32.u64.low %v10812_v22, %v3454_v41  ;;  %v10848_v26 = vmul.u32.u64.high %v10812_v22, %v3454_v41, %v10847_v23  ;;  %v10857_v12 = vsel %vm10827_vm13, 0, %v3390_v34 }
 0x33b   : > { %v10851_v59 = vmul.u32.u64.low %v10812_v22, %v3450_v52  ;;  %v10852_v13 = vmul.u32.u64.high %v10812_v22, %v3450_v52, %v10851_v59  ;;  %v3377_v35 = vshrl.u32 %v10798_v1, %v3375_v25  ;;  %v3380_v11 = vadd.s32 127, %v3379_v46 }
 0x33c   : > { %v3511_v32 = vand.u32 2147483647, %v10815_v48  ;;  %v3514_v4 = vand.u32 2139095040, %v10815_v48  ;;  %vm3741_vm14 = vcmp.lt.s32.totalorder %v10793_v53, 2  ;;  %v11935_v45 = vxor.u32 2147483648, %v8220_v28 }
 0x33d   : > { %v3843_v49 = vand.u32 3, %v8125_v18  ;;  %v3378_v1 = vor.u32 %v3377_v35, %v3376_v0  ;;  %v3381_v2 = vshll.u32 %v3380_v11, 23  ;;  %v3462_v58 = vmul.u32 %v10812_v22, %v3446_v29 }
 0x33e   : > { %v3744_v44 = vsel %vm3742_vm11, %v8214_v19, %v11935_v45  ;;  %v11936_v5 = vxor.u32 2147483648, %v8214_v19  ;;  %v3396_v3 = vadd.s32 3, %v10857_v12  ;;  %vm3464_vm5 = vc.u32 %v10848_v26, %v10851_v59  ;;  %v10877_v34 = vpop.eup %7682 }
 0x33f   : > { %v3465_v8 = vadd.s32 1, %v10852_v13  ;;  %v3515_v42 = vshrl.u32 %v3514_v4, 23  ;;  %v3382_v18 = vor.u32 4788187, %v3381_v2  ;;  %v3385_v52 = vcvt.s32.f32 %v3378_v1  ;;  %v10883_v41 = vpop.eup %7684 }
 0x340   : > { %v3747_v20 = vsel %vm3745_vm7, %v11936_v5, %v8220_v28  ;;  %v10881_v22 = vand.u32 8388607, %v3511_v32  ;;  %v3299_v28 = vxor.u32 2147483648, %v10877_v34  ;;  %vm3409_vm7 = vcmp.lt.s32.totalorder %v10713_v14, 0 }
 0x341   : > { %v3748_v19 = vsel %vm3741_vm14, %v3744_v44, %v3747_v20  ;;  %v3466_v53 = vsel %vm3464_vm5, %v3465_v8, %v10852_v13  ;;  %v7237_v25 = vadd.s32 4294967169, %v3515_v42  ;;  %v3296_v46 = vxor.u32 2147483648, %v10883_v41 }
 0x342   : > { %v3749_v0 = vsel %vm379_vm12, nan, %v3748_v19  ;;  %v3383_v29 = vand.u32 2147483647, %v3382_v18  ;;  %v3467_v23 = vadd.s32 %v3466_v53, %v3462_v58  ;;  %vm3844_vm11 = vcmp.lt.s32.totalorder %v3843_v49, 2 }
 0x343   : > { %6943 = vst [vmem:[%s10893_s5] sm:$0xff] %v3749_v0  ;;  %v3300_v13 = vsel %vm3298_vm3, %v3299_v28, %v10883_v41  ;;  %v11937_v35 = vand.u32 2147483647, %v10713_v14  ;;  %v3521_v11 = vadd.s32 1, %v7237_v25  ;;  %vm3845_vm12 = vcmp.eq.s32.totalorder %v3843_v49, 0 }
 0x344   : > { %vm3848_vm14 = vcmp.eq.s32.totalorder %v3843_v49, 2  ;;  %v3297_v4 = vsel %vm3295_vm4, %v10877_v34, %v3296_v46  ;;  %v3386_v45 = vmul.f32 %v3385_v52, %v3383_v29  ;;  %v3468_v44 = vadd.s32 536870912, %v3467_v23 }
 0x345   : > { %vm10903_vm1 = vcmp.le.f32.partialorder %v11937_v35, 0.7853982  ;;  %v11940_v1 = vxor.u32 2147483648, %v8285_v24  ;;  %v3301_v58 = vsel %vm3294_vm0, %v3297_v4, %v3300_v13  ;;  %v10917_v5 = vand.u32 3, %v3396_v3 }
 0x346   : > { %vm3522_vm3 = vcmp.gt.s32.totalorder %v3521_v11, 0  ;;  %v11941_v20 = vxor.u32 2147483648, %v8282_v56  ;;  %v3302_v42 = vsel %vm3291_vm9, nan, %v3301_v58  ;;  %v3387_v18 = vxor.u32 2147483648, %v3386_v45 }
 0x347   : > { %v3847_v2 = vsel %vm3845_vm12, %v8282_v56, %v11940_v1  ;;  %v3469_v52 = vshrl.u32 %v3468_v44, 30  ;;  %v3523_v19 = vsel %vm3522_vm3, %v3521_v11, 0  ;;  %3643 = vst [vmem:[%s8258_s4 + $0xe0] sm:$0xff] %v3302_v42  ;;  %v10926_v53 = vadd.s32 %v10851_v59, %v10848_v26 }
 0x348   : > { %v3850_v8 = vsel %vm3848_vm14, %v11941_v20, %v8285_v24  ;;  %v3519_v51 = vor.u32 8388608, %v10881_v22  ;;  %v3525_v3 = vand.u32 31, %v3523_v19  ;;  %v3388_v56 = vsel %vm3305_vm10, %v3387_v18, %v3386_v45 }
 0x349   : > { %v3851_v25 = vsel %vm3844_vm11, %v3847_v2, %v3850_v8  ;;  %v3470_v24 = vshll.u32 %v3469_v52, 30  ;;  %v3493_v0 = vsub.s32 4, %v3469_v52  ;;  %v3391_v13 = vsel %vm10827_vm13, %v10601_v39, %v3388_v56 }
 0x34a   : > { %v3852_v29 = vsel %vm483_vm6, nan, %v3851_v25  ;;  %v3526_v35 = vsub.s32 32, %v3525_v3  ;;  %v3528_v26 = vshll.u32 %v11781_v54, %v3525_v3  ;;  %v10940_v59 = vand.u32 3, %v8277_v31 }
 0x34b   : > { %6944 = vst [vmem:[%s10893_s5 + $0x8] sm:$0xff] %v3852_v29  ;;  %7686 = vcosq.f32 %v3391_v13  ;;  %v10942_v49 = vsub.s32 %v3467_v23, %v3470_v24  ;;  %v3494_v22 = vsel %vm3409_vm7, %v3493_v0, %v3469_v52  ;;  %v3531_v15 = vshll.u32 %v11789_v60, %v3525_v3 }
 0x34c   : > { %7688 = vsinq.f32 %v3391_v13  ;;  %v3524_v11 = vshrl.u32 %v3523_v19, 5  ;;  %v3529_v38 = vshrl.u32 %v11789_v60, %v3526_v35  ;;  %v3534_v4 = vshll.u32 %v11778_v21, %v3525_v3 }
 0x34d   : > { %v3473_v45 = vsub.s32 0, %v10942_v49  ;;  %v10952_v31 = vsel %vm10903_vm1, 0, %v3494_v22  ;;  %v3532_v23 = vshrl.u32 %v11778_v21, %v3526_v35  ;;  %v3535_v44 = vshrl.u32 %v11779_v36, %v3526_v35 }
 0x34e   : > { %v3527_v1 = vshrl.u32 %v11781_v54, %v3526_v35  ;;  %v3537_v2 = vshll.u32 %v11779_v36, %v3525_v3  ;;  %v3538_v58 = vshrl.u32 %v11790_v50, %v3526_v35  ;;  %v3540_v60 = vshll.u32 %v11790_v50, %v3525_v3 }
 0x34f   : > { %v7234_v20 = vmin.u32 %v3473_v45, %v10942_v49  ;;  %v3530_v8 = vor.u32 %v3529_v38, %v3528_v26  ;;  %v3533_v42 = vor.u32 %v3532_v23, %v3531_v15  ;;  %v10961_v18 = vshll.u32 %v3519_v51, 8 }
 0x350   : > { %vm3402_vm6 = vcmp.eq.s32.totalorder %v10917_v5, 2  ;;  %v3536_v52 = vor.u32 %v3535_v44, %v3534_v4  ;;  %v3539_v21 = vor.u32 %v3538_v58, %v3537_v2  ;;  %v3541_v19 = vshrl.u32 %v11780_v27, %v3526_v35 }
 0x351   : > { %vm3543_vm4 = vcmp.lt.s32.totalorder %v3524_v11, 1  ;;  %vm3399_vm10 = vcmp.eq.s32.totalorder %v10917_v5, 0  ;;  %v3475_v36 = vclz %v7234_v20  ;;  %v3500_v54 = vadd.s32 3, %v10952_v31 }
 0x352   : > { %vm3544_vm13 = vcmp.lt.s32.totalorder %v3524_v11, 2  ;;  %vm3947_vm0 = vcmp.lt.s32.totalorder %v10940_v59, 2  ;;  %vm3398_vm5 = vcmp.lt.s32.totalorder %v10917_v5, 2  ;;  %v3542_v50 = vor.u32 %v3541_v19, %v3540_v60 }
 0x353   : > { %vm3545_vm11 = vcmp.lt.s32.totalorder %v3524_v11, 3  ;;  %vm3546_vm12 = vcmp.lt.s32.totalorder %v3524_v11, 4  ;;  %v3547_v51 = vsel %vm3543_vm4, %v3527_v1, %v3530_v8  ;;  %vm11749_vm14 = vweird.f32 %v10601_v39 }
 0x354   : > { %v7235_v3 = vadd.s32 4294967294, %v3475_v36  ;;  %v3548_v27 = vsel %vm3546_vm12, %v3536_v52, 2102212464  ;;  %v3551_v25 = vsel %vm3543_vm4, %v3530_v8, %v3533_v42  ;;  %v3552_v56 = vsel %vm3546_vm12, %v3539_v21, 920167782 }
 0x355   : > { %v3549_v24 = vsel %vm3545_vm11, %v3533_v42, %v3548_v27  ;;  %v3553_v0 = vsel %vm3545_vm11, %v3536_v52, %v3552_v56  ;;  %v3555_v29 = vsel %vm3543_vm4, %v3533_v42, %v3536_v52  ;;  %v3556_v13 = vsel %vm3546_vm12, %v3542_v50, 1326507024 }
 0x356   : > { %vm7236_vm3 = vcmp.lt.s32.totalorder %v7235_v3, 0  ;;  %v3550_v35 = vsel %vm3544_vm13, %v3547_v51, %v3549_v24  ;;  %v3554_v26 = vsel %vm3544_vm13, %v3551_v25, %v3553_v0  ;;  %v3557_v22 = vsel %vm3545_vm11, %v3539_v21, %v3556_v13 }
 0x357   : > { %v3478_v15 = vsel %vm7236_vm3, 0, %v7235_v3  ;;  %v3558_v38 = vsel %vm3544_vm13, %v3555_v29, %v3557_v22  ;;  %v10977_v4 = vmul.u32.u64.low %v10961_v18, %v3554_v26  ;;  %v10978_v45 = vmul.u32.u64.high %v10961_v18, %v3554_v26, %v10977_v4 }
 0x358   : > { %v3479_v23 = vsub.s32 32, %v3478_v15  ;;  %v3480_v44 = vshll.u32 %v10942_v49, %v3478_v15  ;;  %v3483_v1 = vsub.s32 4294967266, %v3478_v15  ;;  %v3566_v2 = vmul.u32 %v10961_v18, %v3550_v35  ;;  %v10983_v58 = vpop.eup %7686 }
 0x359   : > { %v10986_v60 = vmul.u32.u64.low %v10961_v18, %v3558_v38  ;;  %v10987_v20 = vmul.u32.u64.high %v10961_v18, %v3558_v38, %v10986_v60  ;;  %vm3948_vm4 = vcmp.eq.s32.totalorder %v10940_v59, 0  ;;  %vm3951_vm13 = vcmp.eq.s32.totalorder %v10940_v59, 2  ;;  %v10991_v11 = vpop.eup %7688 }
 0x35a   : > { %v3403_v8 = vxor.u32 2147483648, %v10983_v58  ;;  %v3481_v42 = vshrl.u32 %v10926_v53, %v3479_v23  ;;  %v3484_v49 = vadd.s32 127, %v3483_v1  ;;  %v11942_v52 = vxor.u32 2147483648, %v8376_v61 }
 0x35b   : > { %v3400_v19 = vxor.u32 2147483648, %v10991_v11  ;;  %v3569_v18 = vadd.s32 1, %v10978_v45  ;;  %v11943_v36 = vxor.u32 2147483648, %v8372_v17  ;;  %v4049_v51 = vand.u32 3, %v8350_v37 }
 0x35c   : > { %v3950_v21 = vsel %vm3948_vm4, %v8372_v17, %v11942_v52  ;;  %v3404_v53 = vsel %vm3402_vm6, %v3403_v8, %v10991_v11  ;;  %v3482_v3 = vor.u32 %v3481_v42, %v3480_v44  ;;  %v3485_v27 = vshll.u32 %v3484_v49, 23  ;;  %v11950_v49 = vld [vmem:[#allocation17_spill] sm:$0xff] }
 0x35d   : > { %v3953_v50 = vsel %vm3951_vm13, %v11943_v36, %v8376_v61  ;;  %v3401_v17 = vsel %vm3399_vm10, %v10983_v58, %v3400_v19  ;;  %v11016_v61 = vand.u32 3, %v3500_v54  ;;  %vm3568_vm11 = vc.u32 %v10987_v20, %v10977_v4 }
 0x35e   : > { %v3954_v25 = vsel %vm3947_vm0, %v3950_v21, %v3953_v50  ;;  %v3405_v56 = vsel %vm3398_vm5, %v3401_v17, %v3404_v53  ;;  %v3486_v59 = vor.u32 4788187, %v3485_v27  ;;  %v3489_v24 = vcvt.s32.f32 %v3482_v3  ;;  %v11956_v3 = vld [vmem:[#allocation20_spill] sm:$0xff] }
 0x35f   : > { %v3955_v37 = vsel %vm587_vm8, nan, %v3954_v25  ;;  %vm3513_vm6 = vcmp.lt.s32.totalorder %v10815_v48, 0  ;;  %v3570_v0 = vsel %vm3568_vm11, %v3569_v18, %v10978_v45  ;;  %v3406_v54 = vsel %vm11749_vm14, nan, %v3405_v56  ;;  %v11948_v45 = vld [vmem:[#allocation19_spill] sm:$0xff] }
 0x360   : > { %6945 = vst [vmem:[%s10893_s5 + $0x10] sm:$0xff] %v3955_v37  ;;  %vm11031_vm10 = vcmp.le.f32.partialorder %v3511_v32, 0.7853982  ;;  %v3571_v16 = vadd.s32 %v3570_v0, %v3566_v2  ;;  %vm4050_vm8 = vcmp.lt.s32.totalorder %v4049_v51, 2  ;;  %vm4051_vm0 = vcmp.eq.s32.totalorder %v4049_v51, 0  ;;  %3644 = vst [vmem:[%s8258_s4 + $0xe8] sm:$0xff] %v3406_v54 }
 0x361   : > { %v3487_v5 = vand.u32 2147483647, %v3486_v59  ;;  %v11946_v13 = vxor.u32 2147483648, %v8460_v55  ;;  %vm4054_vm5 = vcmp.eq.s32.totalorder %v4049_v51, 2  ;;  %v4152_v26 = vand.u32 3, %v8458_v6  ;;  %v11952_v6 = vld [vmem:[#allocation16_spill] sm:$0xff] }
 0x362   : > { %v3572_v22 = vadd.s32 536870912, %v3571_v16  ;;  %v11947_v32 = vxor.u32 2147483648, %v8454_v33  ;;  %v4255_v38 = vand.u32 3, %v8544_v40  ;;  %v4358_v23 = vand.u32 3, %v11948_v45  ;;  %v11954_v51 = vld [vmem:[#allocation21_spill] sm:$0xff] }
 0x363   : > { %v4053_v35 = vsel %vm4051_vm0, %v8454_v33, %v11946_v13  ;;  %v3490_v44 = vmul.f32 %v3489_v24, %v3487_v5  ;;  %vm4153_vm12 = vcmp.lt.s32.totalorder %v4152_v26, 2  ;;  %vm4154_vm3 = vcmp.eq.s32.totalorder %v4152_v26, 0 }
 0x364   : > { %v4056_v15 = vsel %vm4054_vm5, %v11947_v32, %v8460_v55  ;;  %v3573_v2 = vshrl.u32 %v3572_v22, 30  ;;  %v11951_v52 = vxor.u32 2147483648, %v11950_v49  ;;  %vm4157_vm4 = vcmp.eq.s32.totalorder %v4152_v26, 2  ;;  %v11961_v22 = vld [vmem:[#allocation25_spill] sm:$0xff] }
 0x365   : > { %v4057_v1 = vsel %vm4050_vm8, %v4053_v35, %v4056_v15  ;;  %v3491_v18 = vxor.u32 2147483648, %v3490_v44  ;;  %v11953_v33 = vxor.u32 2147483648, %v11952_v6  ;;  %vm4256_vm13 = vcmp.lt.s32.totalorder %v4255_v38, 2  ;;  %v11959_v35 = vld [vmem:[#allocation13_spill] sm:$0xff]  ;;  %v11963_v15 = vld [vmem:[#allocation23_spill] sm:$0xff] }
 0x366   : > { %v4058_v42 = vsel %vm691_vm2, nan, %v4057_v1  ;;  %v4156_v21 = vsel %vm4154_vm3, %v11952_v6, %v11951_v52  ;;  %vm4257_vm11 = vcmp.eq.s32.totalorder %v4255_v38, 0  ;;  %v3574_v40 = vshll.u32 %v3573_v2, 30  ;;  %v11967_v52 = vld [vmem:[#allocation33_spill] sm:$0xff] }
 0x367   : > { %6946 = vst [vmem:[%s10893_s5 + $0x18] sm:$0xff] %v4058_v42  ;;  %v4159_v55 = vsel %vm4157_vm4, %v11953_v33, %v11950_v49  ;;  %v3597_v36 = vsub.s32 4, %v3573_v2  ;;  %v11955_v53 = vxor.u32 2147483648, %v11954_v51  ;;  %v3492_v25 = vsel %vm3409_vm7, %v3491_v18, %v3490_v44  ;;  %v11964_v44 = vld [vmem:[#allocation24_spill] sm:$0xff] }
 0x368   : > { %v4160_v50 = vsel %vm4153_vm12, %v4156_v21, %v4159_v55  ;;  %vm4260_vm2 = vcmp.eq.s32.totalorder %v4255_v38, 2  ;;  %vm4359_vm8 = vcmp.lt.s32.totalorder %v4358_v23, 2  ;;  %v3495_v56 = vsel %vm10903_vm1, %v10713_v14, %v3492_v25  ;;  %v11974_v25 = vld [vmem:[#allocation15_spill] sm:$0xff] }
 0x369   : > { %v4259_v27 = vsel %vm4257_vm11, %v11956_v3, %v11955_v53  ;;  %v4161_v37 = vsel %vm795_vm15, nan, %v4160_v50  ;;  %v11064_v59 = vsub.s32 %v3571_v16, %v3574_v40  ;;  %v3598_v24 = vsel %vm3513_vm6, %v3597_v36, %v3573_v2  ;;  %v11965_v2 = vld [vmem:[#allocation28_spill] sm:$0xff]  ;;  %v11968_v40 = vld [vmem:[#allocation14_spill] sm:$0xff]  ;;  %v11970_v50 = vld [vmem:[#allocation29_spill] sm:$0xff] }
 0x36a   : > { %6947 = vst [vmem:[%s10893_s5 + $0x20] sm:$0xff] %v4161_v37  ;;  %v11958_v0 = vxor.u32 2147483648, %v11956_v3  ;;  %7690 = vcosq.f32 %v3495_v56  ;;  %v11074_v5 = vsel %vm11031_vm10, 0, %v3598_v24  ;;  %vm4360_vm15 = vcmp.eq.s32.totalorder %v4358_v23, 0  ;;  %v11976_v37 = vld [vmem:[#allocation32_spill] sm:$0xff]  ;;  %v11978_v24 = vld [vmem:[#allocation31_spill] sm:$0xff] }
 0x36b   : > { %7692 = vsinq.f32 %v3495_v56  ;;  %v3577_v10 = vsub.s32 0, %v11064_v59  ;;  %v3604_v16 = vadd.s32 3, %v11074_v5  ;;  %vm11960_vm7 = vweird.f32 %v11959_v35  ;;  %v11980_v35 = vld [vmem:[#allocation18_spill] sm:$0xff] }
 0x36c   : > { %v4262_v54 = vsel %vm4260_vm2, %v11958_v0, %v11954_v51  ;;  %v11962_v32 = vxor.u32 2147483648, %v11961_v22  ;;  %vm4363_vm1 = vcmp.eq.s32.totalorder %v4358_v23, 2  ;;  %v4461_v1 = vand.u32 3, %v11964_v44  ;;  %v11972_v51 = vld [vmem:[#allocation27_spill] sm:$0xff] }
 0x36d   : > { %v4263_v13 = vsel %vm4256_vm13, %v4259_v27, %v4262_v54  ;;  %v4564_v38 = vand.u32 3, %v11965_v2  ;;  %v7238_v60 = vmin.u32 %v3577_v10, %v11064_v59  ;;  %v11966_v42 = vxor.u32 2147483648, %v11963_v15 }
 0x36e   : > { %v4264_v26 = vsel %vm11960_vm7, nan, %v4263_v13  ;;  %v4362_v45 = vsel %vm4360_vm15, %v11963_v15, %v11962_v32  ;;  %v4667_v6 = vand.u32 3, %v11967_v52  ;;  %vm4462_vm0 = vcmp.lt.s32.totalorder %v4461_v1, 2  ;;  %v11984_v15 = vld [vmem:[#allocation35_spill] sm:$0xff] }
 0x36f   : > { %6948 = vst [vmem:[%s10893_s5 + $0x28] sm:$0xff] %v4264_v26  ;;  %v4365_v49 = vsel %vm4363_vm1, %v11966_v42, %v11961_v22  ;;  %vm4463_vm5 = vcmp.eq.s32.totalorder %v4461_v1, 0  ;;  %vm4466_vm12 = vcmp.eq.s32.totalorder %v4461_v1, 2  ;;  %vm3506_vm3 = vcmp.eq.s32.totalorder %v11016_v61, 2  ;;  %v11982_v22 = vld [vmem:[#allocation36_spill] sm:$0xff] }
 0x370   : > { %v4366_v21 = vsel %vm4359_vm8, %v4362_v45, %v4365_v49  ;;  %v3567_v18 = vadd.s32 %v10977_v4, %v10987_v20  ;;  %v3579_v33 = vclz %v7238_v60  ;;  %v11096_v55 = vand.u32 3, %v3604_v16  ;;  %v11986_v49 = vld [vmem:[#allocation22_spill] sm:$0xff] }
 0x371   : > { %vm3503_vm4 = vcmp.eq.s32.totalorder %v11016_v61, 0  ;;  %vm11969_vm13 = vweird.f32 %v11968_v40  ;;  %v11971_v23 = vxor.u32 2147483648, %v11970_v50  ;;  %v11973_v3 = vxor.u32 2147483648, %v11972_v51 }
 0x372   : > { %v4367_v36 = vsel %vm11969_vm13, nan, %v4366_v21  ;;  %vm4565_vm11 = vcmp.lt.s32.totalorder %v4564_v38, 2  ;;  %vm3502_vm2 = vcmp.lt.s32.totalorder %v11016_v61, 2  ;;  %v7239_v4 = vadd.s32 4294967294, %v3579_v33  ;;  %v11989_v33 = vld [vmem:[#allocation39_spill] sm:$0xff] }
 0x373   : > { %v4465_v53 = vsel %vm4463_vm5, %v11972_v51, %v11971_v23  ;;  %v4468_v27 = vsel %vm4466_vm12, %v11973_v3, %v11970_v50  ;;  %6949 = vst [vmem:[%s10893_s5 + $0x30] sm:$0xff] %v4367_v36  ;;  %vm4566_vm8 = vcmp.eq.s32.totalorder %v4564_v38, 0  ;;  %vm4569_vm15 = vcmp.eq.s32.totalorder %v4564_v38, 2  ;;  %v11990_v36 = vld [vmem:[#allocation43_spill] sm:$0xff] }
 0x374   : > { %v4469_v20 = vsel %vm4462_vm0, %v4465_v53, %v4468_v27  ;;  %vm3499_vm7 = vweird.f32 %v10713_v14  ;;  %vm11975_vm1 = vweird.f32 %v11974_v25  ;;  %v11977_v56 = vxor.u32 2147483648, %v11976_v37  ;;  %v11991_v3 = vld [vmem:[#allocation47_spill] sm:$0xff] }
 0x375   : > { %v4470_v17 = vsel %vm11975_vm1, nan, %v4469_v20  ;;  %v11979_v54 = vxor.u32 2147483648, %v11978_v24  ;;  %vm4668_vm5 = vcmp.lt.s32.totalorder %v4667_v6, 2  ;;  %vm7240_vm12 = vcmp.lt.s32.totalorder %v7239_v4, 0 }
 0x376   : > { %v4568_v0 = vsel %vm4566_vm8, %v11978_v24, %v11977_v56  ;;  %6950 = vst [vmem:[%s10893_s5 + $0x38] sm:$0xff] %v4470_v17  ;;  %vm4669_vm0 = vcmp.eq.s32.totalorder %v4667_v6, 0  ;;  %vm4672_vm13 = vcmp.eq.s32.totalorder %v4667_v6, 2  ;;  %v3582_v16 = vsel %vm7240_vm12, 0, %v7239_v4  ;;  %v11988_v6 = vld [vmem:[#allocation37_spill] sm:$0xff] }
 0x377   : > { %v4571_v13 = vsel %vm4569_vm15, %v11979_v54, %v11976_v37  ;;  %vm11981_vm14 = vweird.f32 %v11980_v35  ;;  %v11983_v32 = vxor.u32 2147483648, %v11982_v22  ;;  %v11985_v44 = vxor.u32 2147483648, %v11984_v15  ;;  %v11134_v23 = vpop.eup %7690  ;;  %v11993_v24 = vld [vmem:[#allocation41_spill] sm:$0xff] }
 0x378   : > { %v4572_v10 = vsel %vm4565_vm11, %v4568_v0, %v4571_v13  ;;  %v3583_v2 = vsub.s32 32, %v3582_v16  ;;  %v3584_v38 = vshll.u32 %v11064_v59, %v3582_v16  ;;  %v3587_v60 = vsub.s32 4294967266, %v3582_v16  ;;  %v11992_v59 = vld [vmem:[#allocation51_spill] sm:$0xff]  ;;  %v11139_v20 = vpop.eup %7692 }
 0x379   : > { %v4573_v26 = vsel %vm11981_vm14, nan, %v4572_v10  ;;  %v4671_v45 = vsel %vm4669_vm0, %v11984_v15, %v11983_v32  ;;  %v4674_v1 = vsel %vm4672_vm13, %v11985_v44, %v11982_v22  ;;  %vm11987_vm11 = vweird.f32 %v11986_v49 }
 0x37a   : > { %6951 = vst [vmem:[%s10893_s5 + $0x40] sm:$0xff] %v4573_v26  ;;  %v4675_v42 = vsel %vm4668_vm5, %v4671_v45, %v4674_v1  ;;  %v4770_v21 = vand.u32 3, %v11988_v6  ;;  %v4873_v40 = vand.u32 3, %v11989_v33  ;;  %v4976_v50 = vand.u32 3, %v11990_v36  ;;  %v11997_v45 = vld [vmem:[#allocation26_spill] sm:$0xff]  ;;  %v11999_v1 = vld [vmem:[#allocation45_spill] sm:$0xff] }
 0x37b   : > { %v4676_v52 = vsel %vm11987_vm11, nan, %v4675_v42  ;;  %v3585_v51 = vshrl.u32 %v3567_v18, %v3583_v2  ;;  %v3588_v53 = vadd.s32 127, %v3587_v60  ;;  %v5079_v27 = vand.u32 3, %v11991_v3  ;;  %v11995_v18 = vld [vmem:[#allocation40_spill] sm:$0xff]  ;;  %v12003_v33 = vld [vmem:[#allocation30_spill] sm:$0xff] }
 0x37c   : > { %6952 = vst [vmem:[%s10893_s5 + $0x48] sm:$0xff] %v4676_v52  ;;  %v5182_v4 = vand.u32 3, %v11992_v59  ;;  %v3507_v25 = vxor.u32 2147483648, %v11134_v23  ;;  %vm4771_vm14 = vcmp.lt.s32.totalorder %v4770_v21, 2  ;;  %vm4772_vm8 = vcmp.eq.s32.totalorder %v4770_v21, 0  ;;  %v12007_v3 = vld [vmem:[#allocation48_spill] sm:$0xff] }
 0x37d   : > { %vm4775_vm15 = vcmp.eq.s32.totalorder %v4770_v21, 2  ;;  %v3504_v17 = vxor.u32 2147483648, %v11139_v20  ;;  %v3586_v37 = vor.u32 %v3585_v51, %v3584_v38  ;;  %v3589_v56 = vshll.u32 %v3588_v53, 23  ;;  %v12001_v38 = vld [vmem:[#allocation44_spill] sm:$0xff]  ;;  %v12005_v51 = vld [vmem:[#allocation49_spill] sm:$0xff] }
 0x37e   : > { %v11994_v0 = vxor.u32 2147483648, %v11993_v24  ;;  %v3508_v13 = vsel %vm3506_vm3, %v3507_v25, %v11139_v20  ;;  %v11996_v10 = vxor.u32 2147483648, %v11995_v18  ;;  %vm4874_vm1 = vcmp.lt.s32.totalorder %v4873_v40, 2 }
 0x37f   : > { %vm4875_vm5 = vcmp.eq.s32.totalorder %v4873_v40, 0  ;;  %v3505_v35 = vsel %vm3503_vm4, %v11134_v23, %v3504_v17  ;;  %v3590_v26 = vor.u32 4788187, %v3589_v56  ;;  %v3593_v22 = vcvt.s32.f32 %v3586_v37 }
 0x380   : > { %v4774_v54 = vsel %vm4772_vm8, %v11995_v18, %v11994_v0  ;;  %v4777_v16 = vsel %vm4775_vm15, %v11996_v10, %v11993_v24  ;;  %v3509_v15 = vsel %vm3502_vm2, %v3505_v35, %v3508_v13  ;;  %vm11998_vm3 = vweird.f32 %v11997_v45  ;;  %v12011_v18 = vld [vmem:[#allocation53_spill] sm:$0xff]  ;;  %v12013_v13 = vld [vmem:[#allocation52_spill] sm:$0xff] }
 0x381   : > { %v4778_v32 = vsel %vm4771_vm14, %v4774_v54, %v4777_v16  ;;  %v12000_v2 = vxor.u32 2147483648, %v11999_v1  ;;  %vm4878_vm12 = vcmp.eq.s32.totalorder %v4873_v40, 2  ;;  %v3510_v42 = vsel %vm3499_vm7, nan, %v3509_v15  ;;  %v12016_v15 = vld [vmem:[#allocation38_spill] sm:$0xff] }
 0x382   : > { %v4779_v44 = vsel %vm11998_vm3, nan, %v4778_v32  ;;  %v3591_v49 = vand.u32 2147483647, %v3590_v26  ;;  %v12002_v52 = vxor.u32 2147483648, %v12001_v38  ;;  %vm4977_vm4 = vcmp.lt.s32.totalorder %v4976_v50, 2  ;;  %3645 = vst [vmem:[%s8258_s4 + $0xf0] sm:$0xff] %v3510_v42 }
 0x383   : > { %v4877_v60 = vsel %vm4875_vm5, %v12001_v38, %v12000_v2  ;;  %6953 = vst [vmem:[%s10893_s5 + $0x50] sm:$0xff] %v4779_v44  ;;  %vm4978_vm2 = vcmp.eq.s32.totalorder %v4976_v50, 0  ;;  %vm4981_vm0 = vcmp.eq.s32.totalorder %v4976_v50, 2  ;;  %vm5080_vm13 = vcmp.lt.s32.totalorder %v5079_v27, 2  ;;  %v12009_v50 = vld [vmem:[#allocation34_spill] sm:$0xff]  ;;  %v12018_v44 = vld [vmem:[#allocation56_spill] sm:$0xff] }
 0x384   : > { %v4880_v6 = vsel %vm4878_vm12, %v12002_v52, %v11999_v1  ;;  %v3594_v21 = vmul.f32 %v3593_v22, %v3591_v49  ;;  %vm12004_vm11 = vweird.f32 %v12003_v33  ;;  %v12006_v53 = vxor.u32 2147483648, %v12005_v51  ;;  %v12015_v22 = vld [vmem:[#allocation57_spill] sm:$0xff]  ;;  %v12020_v2 = vld [vmem:[#allocation55_spill] sm:$0xff] }
 0x385   : > { %v4881_v61 = vsel %vm4874_vm1, %v4877_v60, %v4880_v6  ;;  %v12008_v37 = vxor.u32 2147483648, %v12007_v3  ;;  %vm5081_vm14 = vcmp.eq.s32.totalorder %v5079_v27, 0  ;;  %vm5084_vm8 = vcmp.eq.s32.totalorder %v5079_v27, 2  ;;  %v12022_v6 = vld [vmem:[#allocation42_spill] sm:$0xff] }
 0x386   : > { %v4882_v36 = vsel %vm12004_vm11, nan, %v4881_v61  ;;  %v4980_v59 = vsel %vm4978_vm2, %v12007_v3, %v12006_v53  ;;  %vm5183_vm15 = vcmp.lt.s32.totalorder %v5182_v4, 2  ;;  %v3595_v40 = vxor.u32 2147483648, %v3594_v21 }
 0x387   : > { %v4983_v56 = vsel %vm4981_vm0, %v12008_v37, %v12005_v51  ;;  %6954 = vst [vmem:[%s10893_s5 + $0x58] sm:$0xff] %v4882_v36  ;;  %vm12010_vm1 = vweird.f32 %v12009_v50  ;;  %v12012_v54 = vxor.u32 2147483648, %v12011_v18  ;;  %v12014_v16 = vxor.u32 2147483648, %v12013_v13  ;;  %v12026_v36 = vld [vmem:[#allocation60_spill] sm:$0xff] }
 0x388   : > { %v4984_v24 = vsel %vm4977_vm4, %v4980_v59, %v4983_v56  ;;  %vm5184_vm5 = vcmp.eq.s32.totalorder %v5182_v4, 0  ;;  %vm5187_vm3 = vcmp.eq.s32.totalorder %v5182_v4, 2  ;;  %v5285_v27 = vand.u32 3, %v12015_v22  ;;  %v12028_v4 = vld [vmem:[#allocation59_spill] sm:$0xff]  ;;  %v12029_v59 = vld [vmem:[#allocation65_spill] sm:$0xff]  ;;  %v12031_v50 = vld [vmem:[#allocation72_spill] sm:$0xff] }
 0x389   : > { %v4985_v0 = vsel %vm12010_vm1, nan, %v4984_v24  ;;  %v5083_v10 = vsel %vm5081_vm14, %v12013_v13, %v12012_v54  ;;  %v5086_v35 = vsel %vm5084_vm8, %v12014_v16, %v12011_v18  ;;  %v3596_v32 = vsel %vm3513_vm6, %v3595_v40, %v3594_v21  ;;  %v12024_v21 = vld [vmem:[#allocation61_spill] sm:$0xff]  ;;  %v12030_v24 = vld [vmem:[#allocation68_spill] sm:$0xff]  ;;  %v12033_v13 = vld [vmem:[#allocation46_spill] sm:$0xff] }
 0x38a   : > { %6955 = vst [vmem:[%s10893_s5 + $0x60] sm:$0xff] %v4985_v0  ;;  %v5087_v26 = vsel %vm5080_vm13, %v5083_v10, %v5086_v35  ;;  %vm12017_vm12 = vweird.f32 %v12016_v15  ;;  %v12019_v1 = vxor.u32 2147483648, %v12018_v44  ;;  %v12021_v60 = vxor.u32 2147483648, %v12020_v2  ;;  %v12032_v18 = vld [vmem:[#allocation76_spill] sm:$0xff] }
 0x38b   : > { %v5088_v45 = vsel %vm12017_vm12, nan, %v5087_v26  ;;  %v3599_v49 = vsel %vm11031_vm10, %v10815_v48, %v3596_v32  ;;  %vm5286_vm4 = vcmp.lt.s32.totalorder %v5285_v27, 2  ;;  %vm5287_vm6 = vcmp.eq.s32.totalorder %v5285_v27, 0  ;;  %v12035_v16 = vld [vmem:[#allocation64_spill] sm:$0xff]  ;;  %v12037_v26 = vld [vmem:[#allocation63_spill] sm:$0xff] }
 0x38c   : > { %v5186_v38 = vsel %vm5184_vm5, %v12020_v2, %v12019_v1  ;;  %v5189_v42 = vsel %vm5187_vm3, %v12021_v60, %v12018_v44  ;;  %6956 = vst [vmem:[%s10893_s5 + $0x68] sm:$0xff] %v5088_v45  ;;  %7694 = vcosq.f32 %v3599_v49  ;;  %vm12023_vm2 = vweird.f32 %v12022_v6  ;;  %v12039_v45 = vld [vmem:[#allocation69_spill] sm:$0xff]  ;;  %v12041_v1 = vld [vmem:[#allocation67_spill] sm:$0xff] }
 0x38d   : > { %v5190_v52 = vsel %vm5183_vm15, %v5186_v38, %v5189_v42  ;;  %v12025_v33 = vxor.u32 2147483648, %v12024_v21  ;;  %vm5290_vm0 = vcmp.eq.s32.totalorder %v5285_v27, 2  ;;  %7696 = vsinq.f32 %v3599_v49  ;;  %v12042_v38 = vld [vmem:[#allocation50_spill] sm:$0xff]  ;;  %v12045_v6 = vld [vmem:[#allocation73_spill] sm:$0xff] }
 0x38e   : > { %v5191_v61 = vsel %vm12023_vm2, nan, %v5190_v52  ;;  %v12027_v29 = vxor.u32 2147483648, %v12026_v36  ;;  %v5388_v3 = vand.u32 3, %v12028_v4  ;;  %v5491_v37 = vand.u32 3, %v12029_v59 }
 0x38f   : > { %v5289_v51 = vsel %vm5287_vm6, %v12026_v36, %v12025_v33  ;;  %6957 = vst [vmem:[%s10893_s5 + $0x70] sm:$0xff] %v5191_v61  ;;  %v5594_v40 = vand.u32 3, %v12030_v24  ;;  %v5697_v0 = vand.u32 3, %v12031_v50  ;;  %v5800_v54 = vand.u32 3, %v12032_v18  ;;  %v12055_v24 = vld [vmem:[#allocation75_spill] sm:$0xff] }
 0x390   : > { %v5292_v53 = vsel %vm5290_vm0, %v12027_v29, %v12024_v21  ;;  %vm12034_vm10 = vweird.f32 %v12033_v13  ;;  %vm5389_vm13 = vcmp.lt.s32.totalorder %v5388_v3, 2  ;;  %vm5390_vm11 = vcmp.eq.s32.totalorder %v5388_v3, 0  ;;  %v12047_v21 = vld [vmem:[#allocation71_spill] sm:$0xff]  ;;  %v12049_v29 = vld [vmem:[#allocation54_spill] sm:$0xff] }
 0x391   : > { %v5293_v56 = vsel %vm5286_vm4, %v5289_v51, %v5292_v53  ;;  %vm5393_vm14 = vcmp.eq.s32.totalorder %v5388_v3, 2  ;;  %v12036_v35 = vxor.u32 2147483648, %v12035_v16  ;;  %v12038_v27 = vxor.u32 2147483648, %v12037_v26  ;;  %v12051_v3 = vld [vmem:[#allocation58_spill] sm:$0xff] }
 0x392   : > { %v5294_v10 = vsel %vm12034_vm10, nan, %v5293_v56  ;;  %vm5492_vm8 = vcmp.lt.s32.totalorder %v5491_v37, 2  ;;  %vm5493_vm15 = vcmp.eq.s32.totalorder %v5491_v37, 0  ;;  %vm3610_vm1 = vcmp.eq.s32.totalorder %v11096_v55, 2 }
 0x393   : > { %6958 = vst [vmem:[%s10893_s5 + $0x78] sm:$0xff] %v5294_v10  ;;  %v5392_v22 = vsel %vm5390_vm11, %v12037_v26, %v12036_v35  ;;  %v5395_v32 = vsel %vm5393_vm14, %v12038_v27, %v12035_v16  ;;  %v12040_v44 = vxor.u32 2147483648, %v12039_v45  ;;  %vm5496_vm5 = vcmp.eq.s32.totalorder %v5491_v37, 2  ;;  %v12053_v37 = vld [vmem:[#allocation78_spill] sm:$0xff]  ;;  %v12057_v10 = vld [vmem:[#allocation81_spill] sm:$0xff]  ;;  %v12060_v26 = vld [vmem:[#allocation80_spill] sm:$0xff] }
 0x394   : > { %v5396_v15 = vsel %vm5389_vm13, %v5392_v22, %v5395_v32  ;;  %vm5595_vm3 = vcmp.lt.s32.totalorder %v5594_v40, 2  ;;  %vm3607_vm12 = vcmp.eq.s32.totalorder %v11096_v55, 0  ;;  %vm12043_vm4 = vweird.f32 %v12042_v38  ;;  %v12062_v27 = vld [vmem:[#allocation79_spill] sm:$0xff]  ;;  %v12065_v38 = vld [vmem:[#allocation66_spill] sm:$0xff] }
 0x395   : > { %v5495_v2 = vsel %vm5493_vm15, %v12041_v1, %v12040_v44  ;;  %v5397_v60 = vsel %vm12043_vm4, nan, %v5396_v15  ;;  %v12044_v42 = vxor.u32 2147483648, %v12041_v1  ;;  %vm5596_vm6 = vcmp.eq.s32.totalorder %v5594_v40, 0  ;;  %v12064_v44 = vld [vmem:[#allocation83_spill] sm:$0xff] }
 0x396   : > { %vm5599_vm2 = vcmp.eq.s32.totalorder %v5594_v40, 2  ;;  %vm3606_vm0 = vcmp.lt.s32.totalorder %v11096_v55, 2  ;;  %6959 = vst [vmem:[%s10893_s5 + $0x80] sm:$0xff] %v5397_v60  ;;  %v12046_v61 = vxor.u32 2147483648, %v12045_v6  ;;  %v12048_v36 = vxor.u32 2147483648, %v12047_v21 }
 0x397   : > { %v5498_v49 = vsel %vm5496_vm5, %v12044_v42, %v12039_v45  ;;  %vm5698_vm10 = vcmp.lt.s32.totalorder %v5697_v0, 2  ;;  %vm3603_vm13 = vweird.f32 %v10815_v48  ;;  %vm12050_vm11 = vweird.f32 %v12049_v29  ;;  %v12067_v42 = vld [vmem:[#allocation85_spill] sm:$0xff] }
 0x398   : > { %v5499_v52 = vsel %vm5492_vm8, %v5495_v2, %v5498_v49  ;;  %v5598_v33 = vsel %vm5596_vm6, %v12047_v21, %v12046_v61  ;;  %v5601_v51 = vsel %vm5599_vm2, %v12048_v36, %v12045_v6  ;;  %vm5699_vm14 = vcmp.eq.s32.totalorder %v5697_v0, 0 }
 0x399   : > { %v5500_v53 = vsel %vm12050_vm11, nan, %v5499_v52  ;;  %v5602_v4 = vsel %vm5595_vm3, %v5598_v33, %v5601_v51  ;;  %vm5702_vm15 = vcmp.eq.s32.totalorder %v5697_v0, 2  ;;  %vm12052_vm8 = vweird.f32 %v12051_v3  ;;  %v12058_v0 = vld [vmem:[#allocation62_spill] sm:$0xff]  ;;  %v12069_v52 = vld [vmem:[#allocation84_spill] sm:$0xff] }
 0x39a   : > { %6960 = vst [vmem:[%s10893_s5 + $0x88] sm:$0xff] %v5500_v53  ;;  %v5603_v59 = vsel %vm12052_vm8, nan, %v5602_v4  ;;  %v12054_v56 = vxor.u32 2147483648, %v12053_v37  ;;  %v12056_v50 = vxor.u32 2147483648, %v12055_v24  ;;  %vm5801_vm5 = vcmp.lt.s32.totalorder %v5800_v54, 2  ;;  %v12071_v53 = vld [vmem:[#allocation70_spill] sm:$0xff] }
 0x39b   : > { %6961 = vst [vmem:[%s10893_s5 + $0x90] sm:$0xff] %v5603_v59  ;;  %vm5802_vm4 = vcmp.eq.s32.totalorder %v5800_v54, 0  ;;  %vm5805_vm3 = vcmp.eq.s32.totalorder %v5800_v54, 2  ;;  %v5903_v16 = vand.u32 3, %v12057_v10  ;;  %vm12059_vm6 = vweird.f32 %v12058_v0  ;;  %v11273_v54 = vpop.eup %7694  ;;  %v12074_v59 = vld [vmem:[#allocation88_spill] sm:$0xff] }
 0x39c   : > { %v5701_v40 = vsel %vm5699_vm14, %v12055_v24, %v12054_v56  ;;  %v5704_v18 = vsel %vm5702_vm15, %v12056_v50, %v12053_v37  ;;  %v12061_v22 = vxor.u32 2147483648, %v12060_v26  ;;  %v12063_v15 = vxor.u32 2147483648, %v12062_v27  ;;  %v11283_v33 = vpop.eup %7696  ;;  %v12077_v10 = vld [vmem:[#allocation92_spill] sm:$0xff] }
 0x39d   : > { %v5705_v13 = vsel %vm5698_vm10, %v5701_v40, %v5704_v18  ;;  %v6006_v1 = vand.u32 3, %v12064_v44  ;;  %vm5904_vm2 = vcmp.lt.s32.totalorder %v5903_v16, 2  ;;  %vm5905_vm10 = vcmp.eq.s32.totalorder %v5903_v16, 0  ;;  %v12076_v18 = vld [vmem:[#allocation87_spill] sm:$0xff] }
 0x39e   : > { %v5706_v35 = vsel %vm12059_vm6, nan, %v5705_v13  ;;  %v5804_v32 = vsel %vm5802_vm4, %v12062_v27, %v12061_v22  ;;  %v5807_v45 = vsel %vm5805_vm3, %v12063_v15, %v12060_v26  ;;  %vm5908_vm11 = vcmp.eq.s32.totalorder %v5903_v16, 2  ;;  %v12082_v15 = vld [vmem:[#allocation90_spill] sm:$0xff] }
 0x39f   : > { %6962 = vst [vmem:[%s10893_s5 + $0x98] sm:$0xff] %v5706_v35  ;;  %v5808_v2 = vsel %vm5801_vm5, %v5804_v32, %v5807_v45  ;;  %vm12066_vm14 = vweird.f32 %v12065_v38  ;;  %v12068_v49 = vxor.u32 2147483648, %v12067_v42  ;;  %v12070_v61 = vxor.u32 2147483648, %v12069_v52 }
 0x3a0   : > { %v5809_v60 = vsel %vm12066_vm14, nan, %v5808_v2  ;;  %vm6007_vm15 = vcmp.lt.s32.totalorder %v6006_v1, 2  ;;  %v3611_v36 = vxor.u32 2147483648, %v11273_v54  ;;  %vm6008_vm8 = vcmp.eq.s32.totalorder %v6006_v1, 0  ;;  %v12084_v2 = vld [vmem:[#allocation77_spill] sm:$0xff] }
 0x3a1   : > { %v5907_v6 = vsel %vm5905_vm10, %v12069_v52, %v12068_v49  ;;  %v5910_v21 = vsel %vm5908_vm11, %v12070_v61, %v12067_v42  ;;  %6963 = vst [vmem:[%s10893_s5 + $0xa0] sm:$0xff] %v5809_v60  ;;  %vm6011_vm5 = vcmp.eq.s32.totalorder %v6006_v1, 2  ;;  %v3608_v29 = vxor.u32 2147483648, %v11283_v33  ;;  %v12086_v60 = vld [vmem:[#allocation94_spill] sm:$0xff]  ;;  %v12088_v49 = vld [vmem:[#allocation93_spill] sm:$0xff] }
 0x3a2   : > { %v5911_v51 = vsel %vm5904_vm2, %v5907_v6, %v5910_v21  ;;  %vm12072_vm4 = vweird.f32 %v12071_v53  ;;  %v12073_v3 = vxor.u32 2147483648, %v10302_v43  ;;  %v12075_v56 = vxor.u32 2147483648, %v12074_v59 }
 0x3a3   : > { %v5912_v4 = vsel %vm12072_vm4, nan, %v5911_v51  ;;  %v3612_v40 = vsel %vm3610_vm1, %v3611_v36, %v11283_v33  ;;  %v6109_v13 = vand.u32 3, %v12076_v18  ;;  %v6212_v16 = vand.u32 3, %v12077_v10 }
 0x3a4   : > { %v6010_v37 = vsel %vm6008_vm8, %v12074_v59, %v12073_v3  ;;  %v6013_v24 = vsel %vm6011_vm5, %v12075_v56, %v10302_v43  ;;  %6964 = vst [vmem:[%s10893_s5 + $0xa8] sm:$0xff] %v5912_v4  ;;  %v3609_v0 = vsel %vm3607_vm12, %v11273_v54, %v3608_v29  ;;  %v12078_v43 = vld [vmem:[#allocation74_spill] sm:$0xff]  ;;  %v6315_v26 = vand.u32 3, %v10482_v63 }
 0x3a5   : > { %v6014_v50 = vsel %vm6007_vm15, %v6010_v37, %v6013_v24  ;;  %vm12079_vm3 = vweird.f32 %v12078_v43  ;;  %v11315_v22 = vand.u32 3, %v10571_v9  ;;  %v3613_v27 = vsel %vm3606_vm0, %v3609_v0, %v3612_v40  ;;  %v12080_v9 = vld [vmem:[#allocation91_spill] sm:$0xff] }
 0x3a6   : > { %v6015_v35 = vsel %vm12079_vm3, nan, %v6014_v50  ;;  %vm6110_vm1 = vcmp.lt.s32.totalorder %v6109_v13, 2  ;;  %vm6111_vm12 = vcmp.eq.s32.totalorder %v6109_v13, 0  ;;  %vm6114_vm6 = vcmp.eq.s32.totalorder %v6109_v13, 2 }
 0x3a7   : > { %6965 = vst [vmem:[%s10893_s5 + $0xb0] sm:$0xff] %v6015_v35  ;;  %v3614_v63 = vsel %vm3603_vm13, nan, %v3613_v27  ;;  %v12081_v32 = vxor.u32 2147483648, %v12080_v9  ;;  %v12083_v44 = vxor.u32 2147483648, %v12082_v15  ;;  %vm6213_vm0 = vcmp.lt.s32.totalorder %v6212_v16, 2 }
 0x3a8   : > { %3646 = vst [vmem:[%s8258_s4 + $0xf8] sm:$0xff] %v3614_v63  ;;  %vm6214_vm2 = vcmp.eq.s32.totalorder %v6212_v16, 0  ;;  %vm6217_vm10 = vcmp.eq.s32.totalorder %v6212_v16, 2  ;;  %vm6316_vm11 = vcmp.lt.s32.totalorder %v6315_v26, 2  ;;  %vm12085_vm14 = vweird.f32 %v12084_v2 }
 0x3a9   : > { %v6113_v45 = vsel %vm6111_vm12, %v12082_v15, %v12081_v32  ;;  %v6116_v55 = vsel %vm6114_vm6, %v12083_v44, %v12080_v9  ;;  %v12087_v42 = vxor.u32 2147483648, %v12086_v60  ;;  %v12089_v6 = vxor.u32 2147483648, %v12088_v49 }
 0x3aa   : > { %v6117_v1 = vsel %vm6110_vm1, %v6113_v45, %v6116_v55  ;;  %vm6317_vm15 = vcmp.eq.s32.totalorder %v6315_v26, 0 }
 0x3ab   : > { %v6118_v38 = vsel %vm12085_vm14, nan, %v6117_v1  ;;  %v6216_v52 = vsel %vm6214_vm2, %v12088_v49, %v12087_v42  ;;  %v6219_v61 = vsel %vm6217_vm10, %v12089_v6, %v12086_v60 }
 0x3ac   : > { %7742 = shalt.err (!%p7739_p1)
}
 0x3ad   : > { %s7743_s25 = scalar_lea.hbm %s11322_s16, 4096  ;;  %s7747_s28 = scalar_lea.hbm %s11502_s1, 8192 }
 0x3ae   : > { %p7744_p2 = scmp.ne.s32.totalorder %s11322_s16, %s7743_s25  ;;  %p7748_p7 = scmp.lt.s32.totalorder %s11322_s16, %s11502_s1 }
 0x3af   : > { %p7749_p8 = scmp.lt.s32.totalorder %s7747_s28, %s7743_s25 }
 0x3b0   : > { %p7745_p3 = pnand %p7744_p2, %p7889_p5 }
 0x3b1   : > { %p7750_p9 = por %p7749_p8, %p7748_p7 }
 0x3b2   : > { %p7746_p4 = pneg %p7745_p3 }
 0x3b4   : > { %p7751_p10 = pnand %p7750_p9, %p7746_p4 }
 0x3b6   : > { %7754 = shalt.err (!%p7751_p10)
}
 0x3b7   : > { %s7833_s4 = smov 128   ;;  %s7834_s8 = smov 8   ;;  %6966 = vst [vmem:[%s10893_s5 + $0xb8] sm:$0xff] %v6118_v38  ;;  %v6220_v21 = vsel %vm6213_vm0, %v6216_v52, %v6219_v61  ;;  %v12090_v51 = vld [vmem:[#allocation96_spill] sm:$0xff]  ;;  %v12092_v4 = vld [vmem:[#allocation95_spill] sm:$0xff]  ;;  %vm6320_vm8 = vcmp.eq.s32.totalorder %v6315_v26, 2 }
 0x3b8   : > { %7511 = dma.vmem_to_hbm [thread:$0]  (%p7889_p5), %s11324_s7, 4096, %s11322_s16, %s6976_s17, %s7833_s4, %s7833_s4, %s7834_s8   ;;  %v12091_v53 = vxor.u32 2147483648, %v12090_v51  ;;  %vm6419_vm5 = vcmp.lt.s32.totalorder %v11315_v22, 2  ;;  %v12093_v59 = vld [vmem:[#allocation82_spill] sm:$0xff]  ;;  %v12095_v56 = vxor.u32 2147483648, %v12092_v4  ;;  %vm6420_vm3 = vcmp.eq.s32.totalorder %v11315_v22, 0 }
 0x3b9   : > { %vm12094_vm4 = vweird.f32 %v12093_v59  ;;  %vm6423_vm1 = vcmp.eq.s32.totalorder %v11315_v22, 2  ;;  %v12096_v50 = vld [vmem:[#allocation99_spill] sm:$0xff]  ;;  %v12098_v13 = vld [vmem:[#allocation98_spill] sm:$0xff]  ;;  %v12100_v43 = vld [vmem:[#allocation97_spill] sm:$0xff]  ;;  %v6624_v32 = vand.u32 3, %v10758_v57  ;;  %v6727_v22 = vand.u32 3, %v10857_v12  ;;  %s11453_s17 = scalar_lea.hbm %s11503_s2, %s7377_s6 }
 0x3ba   : > { %v6319_v3 = vsel %vm6317_vm15, %v12092_v4, %v12091_v53  ;;  %v6221_v37 = vsel %vm12094_vm4, nan, %v6220_v21  ;;  %v6322_v24 = vsel %vm6320_vm8, %v12095_v56, %v12090_v51  ;;  %v12097_v18 = vxor.u32 2147483648, %v12096_v50  ;;  %v12101_v27 = vld [vmem:[#allocation86_spill] sm:$0xff]  ;;  %v12103_v26 = vld [vmem:[#allocation89_spill] sm:$0xff]  ;;  %s7010_s7 = sshll.u32 %s10893_s5, 4  ;;  %s6981_s21 = scalar_lea.sflag [#allocation7], %s8209_s30  ;;  %s11455_s7 = int_to_ptr.vmem [resolvable:$true] %s7010_s7 }
 0x3bb   : > { %6967 = vst [vmem:[%s10893_s5 + $0xc0] sm:$0xff] %v6221_v37  ;;  %v6323_v40 = vsel %vm6316_vm11, %v6319_v3, %v6322_v24  ;;  %v12099_v16 = vxor.u32 2147483648, %v12098_v13  ;;  %v6521_v35 = vand.u32 3, %v12100_v43  ;;  %vm12102_vm12 = vweird.f32 %v12101_v27  ;;  %s7755_s22 = scalar_lea.vmem %s11455_s7, 4096  ;;  %s7835_s13 = smov [#allocation6]  }
 0x3bc   : > { %v6422_v10 = vsel %vm6420_vm3, %v12098_v13, %v12097_v18  ;;  %v6324_v63 = vsel %vm12102_vm12, nan, %v6323_v40  ;;  %vm12104_vm6 = vweird.f32 %v12103_v26  ;;  %v12105_v45 = vxor.u32 2147483648, %v10767_v7  ;;  %p7756_p11 = scmp.ne.s32.totalorder %s11455_s7, %s7755_s22  ;;  %s7759_s23 = sshll.u32 %s7835_s13, 4  ;;  %s7760_s23 = int_to_ptr.vmem [resolvable:$false] %s7759_s23 }
 0x3bd   : > { %v6425_v0 = vsel %vm6423_vm1, %v12099_v16, %v12096_v50  ;;  %6968 = vst [vmem:[%s10893_s5 + $0xc8] sm:$0xff] %v6324_v63  ;;  %vm6522_vm0 = vcmp.lt.s32.totalorder %v6521_v35, 2  ;;  %vm6523_vm2 = vcmp.eq.s32.totalorder %v6521_v35, 0  ;;  %vm6526_vm10 = vcmp.eq.s32.totalorder %v6521_v35, 2  ;;  %s7761_s6 = scalar_lea.vmem %s7760_s23, 8192  ;;  %p7762_p0 = scmp.lt.s32.totalorder %s11455_s7, %s7760_s23 }
 0x3be   : > { %v6426_v9 = vsel %vm6419_vm5, %v6422_v10, %v6425_v0  ;;  %v6525_v44 = vsel %vm6523_vm2, %v10762_v62, %v12105_v45  ;;  %v12106_v55 = vxor.u32 2147483648, %v10762_v62  ;;  %vm6625_vm11 = vcmp.lt.s32.totalorder %v6624_v32, 2  ;;  %p7757_p12 = pnand %p7756_p11, %p7889_p5  ;;  %p7763_p1 = scmp.lt.s32.totalorder %s7761_s6, %s7755_s22 }
 0x3bf   : > { %v6427_v15 = vsel %vm12104_vm6, nan, %v6426_v9  ;;  %vm6626_vm14 = vcmp.eq.s32.totalorder %v6624_v32, 0  ;;  %vm6629_vm15 = vcmp.eq.s32.totalorder %v6624_v32, 2  ;;  %vm6728_vm8 = vcmp.lt.s32.totalorder %v6727_v22, 2 }
 0x3c0   : > { %6969 = vst [vmem:[%s10893_s5 + $0xd0] sm:$0xff] %v6427_v15  ;;  %v6528_v1 = vsel %vm6526_vm10, %v12106_v55, %v10767_v7  ;;  %v6628_v12 = vsel %vm6626_vm14, %v10877_v34, %v3296_v46  ;;  %vm12107_vm5 = vweird.f32 %v10376_v30  ;;  %v6631_v38 = vsel %vm6629_vm15, %v3299_v28, %v10883_v41  ;;  %p7758_p13 = pneg %p7757_p12  ;;  %p7764_p2 = por %p7763_p1, %p7762_p0 }
 0x3c1   : > { %v6529_v57 = vsel %vm6522_vm0, %v6525_v44, %v6528_v1  ;;  %vm6729_vm4 = vcmp.eq.s32.totalorder %v6727_v22, 0  ;;  %vm6732_vm3 = vcmp.eq.s32.totalorder %v6727_v22, 2  ;;  %v6632_v62 = vsel %vm6625_vm11, %v6628_v12, %v6631_v38 }
 0x3c2   : > { %v6530_v2 = vsel %vm12107_vm5, nan, %v6529_v57  ;;  %v6731_v7 = vsel %vm6729_vm4, %v10983_v58, %v3400_v19  ;;  %v6734_v46 = vsel %vm6732_vm3, %v3403_v8, %v10991_v11  ;;  %v6830_v30 = vand.u32 3, %v10952_v31  ;;  %p7765_p3 = pnand %p7764_p2, %p7758_p13 }
 0x3c3   : > { %6970 = vst [vmem:[%s10893_s5 + $0xd8] sm:$0xff] %v6530_v2  ;;  %v6633_v34 = vsel %vm3291_vm9, nan, %v6632_v62  ;;  %v6735_v41 = vsel %vm6728_vm8, %v6731_v7, %v6734_v46  ;;  %v6933_v28 = vand.u32 3, %v11074_v5  ;;  %vm12108_vm1 = vweird.f32 %v10601_v39 }
 0x3c4   : > { %6971 = vst [vmem:[%s10893_s5 + $0xe0] sm:$0xff] %v6633_v34  ;;  %v6736_v60 = vsel %vm12108_vm1, nan, %v6735_v41  ;;  %vm6831_vm12 = vcmp.lt.s32.totalorder %v6830_v30, 2  ;;  %vm6832_vm6 = vcmp.eq.s32.totalorder %v6830_v30, 0  ;;  %vm6835_vm0 = vcmp.eq.s32.totalorder %v6830_v30, 2 }
 0x3c5   : > { %6972 = vst [vmem:[%s10893_s5 + $0xe8] sm:$0xff] %v6736_v60  ;;  %v6834_v31 = vsel %vm6832_vm6, %v11134_v23, %v3504_v17  ;;  %v6837_v47 = vsel %vm6835_vm0, %v3507_v25, %v11139_v20  ;;  %vm6934_vm9 = vcmp.lt.s32.totalorder %v6933_v28, 2  ;;  %vm6935_vm2 = vcmp.eq.s32.totalorder %v6933_v28, 0 }
 0x3c6   : > { %v6838_v39 = vsel %vm6831_vm12, %v6834_v31, %v6837_v47  ;;  %v6937_v58 = vsel %vm6935_vm2, %v11273_v54, %v3608_v29  ;;  %vm6938_vm10 = vcmp.eq.s32.totalorder %v6933_v28, 2 }
 0x3c7   : > { %v6839_v11 = vsel %vm3499_vm7, nan, %v6838_v39  ;;  %v6940_v8 = vsel %vm6938_vm10, %v3611_v36, %v11283_v33 }
 0x3c8   : > { %6973 = vst [vmem:[%s10893_s5 + $0xf0] sm:$0xff] %v6839_v11  ;;  %v6941_v19 = vsel %vm6934_vm9, %v6937_v58, %v6940_v8 }
 0x3c9   : > { %v6942_v14 = vsel %vm3603_vm13, nan, %v6941_v19 }
 0x3ca   : > { %6974 = vst [vmem:[%s10893_s5 + $0xf8] sm:$0xff] %v6942_v14 }
 0x3cb   : > { %7768 = shalt.err (!%p7765_p3)
}
 0x3cc   : > { %s7769_s5 = scalar_lea.hbm %s11453_s17, 4096  ;;  %s7773_s25 = scalar_lea.hbm %s11503_s2, 8192 }
 0x3cd   : > { %p7770_p4 = scmp.ne.s32.totalorder %s11453_s17, %s7769_s5  ;;  %p7774_p9 = scmp.lt.s32.totalorder %s11453_s17, %s11503_s2 }
 0x3ce   : > { %p7775_p10 = scmp.lt.s32.totalorder %s7773_s25, %s7769_s5 }
 0x3cf   : > { %p7771_p7 = pnand %p7770_p4, %p7889_p5 }
 0x3d0   : > { %p7776_p11 = por %p7775_p10, %p7774_p9 }
 0x3d1   : > { %p7772_p8 = pneg %p7771_p7 }
 0x3d3   : > { %p7777_p12 = pnand %p7776_p11, %p7772_p8 }
 0x3d5   : > { %7780 = shalt.err (!%p7777_p12)
}
 0x3d6   : > { %7512 = dma.vmem_to_hbm [thread:$0]  (%p7889_p5), %s11455_s7, 4096, %s11453_s17, %s6981_s21, %s7833_s4, %s7833_s4, %s7834_s8  }
 0x3d7 PF: > { %p7528_p13 = scmp.ge.s32.totalorder %s7823_s12, 2  ;;  %s7025_s28 = sand.u32 1, %s7811_s9  }
 0x3d8   : > { %s7026_s29 = scalar_lea.sflag [#allocation4], %s7025_s28 }
 0x3d9   : > { %p7520_p0 = pnand %p7528_p13, %p7893_p6 }
 0x3db   : > { %p7521_p1 = pneg %p7520_p0 }
 0x3dd   : > { %7802 = dma.done.wait (%p7521_p1), %s7026_s29, 4096  }
 0x3de   : > { %7804 = vsyncadd (%p7521_p1), %s7026_s29, 4294963200  ;;  %s7035_s3 = scalar_lea.sflag [#allocation7], %s7025_s28 }
 0x3df   : > { %7806 = dma.done.wait (%p7521_p1), %s7035_s3, 4096  }
 0x3e0   : > { %7808 = vsyncadd (%p7521_p1), %s7035_s3, 4294963200  ;;  %p17_p5 = scmp.ge.s32.totalorder %s7876_s15, 4   ;;  %s12109_s9 = smov %s7815_s10 }
 0x3e1   : > { %s12110_s10 = smov %s7819_s11  ;;  %s12111_s11 = smov %s7887_s18 }
 0x3e2   : > { %s12112_s12 = smov %s7876_s15  ;;  %19 = sbr.rel (!%p17_p5) target bundleno = 6 (0x6), region = 78 }
 0x3e7   :  { %7040 = vsyncpa [#allocation3], 1 }
 0x3e8   :  { %7042 = vsyncpa [#allocation3 + $0x1], 1 }
 0x3e9   :  { %7043 = vsyncpa [#allocation4], 1 }
 0x3ea   :  { %7045 = vsyncpa [#allocation4 + $0x1], 1 }
 0x3eb   :  { %7046 = vsyncpa [#allocation7], 1 }
 0x3ec   :  { %7048 = vsyncpa [#allocation7 + $0x1], 1 }

</bundles_post_ra>
